<compile_context>
chip_gen: v6e
topology: v6e:2x2x1
jax: 0.10.0
libtpu: 0.0.40
codegen_flags: <defaults>
</compile_context>

<pallas_src>
import jax
import jax.numpy as jnp
import numpy as np
from jax import lax
from jax.experimental import pallas as pl
from jax.experimental.pallas import tpu as pltpu

KH = KW = 5          # every LeNet conv is 5x5, stride 1, VALID


# ------------------------------ fused kernel --------------------------------

def _lenet_kernel(x_ref, t1_ref, t2_ref, t3_ref, q1_ref, rp1_ref, q2_ref,
                  rp2_ref, sel_ref, w4_ref, w5_ref,
                  b1_ref, b2_ref, b3_ref, b4_ref, b5_ref,
                  out_ref, p1_scr, p2_scr):
    f32, bf16 = jnp.float32, jnp.bfloat16
    n1 = x_ref.shape[0] - 8     # B*32 conv1 rows (incl. discarded tail rows)
    n2 = p1_scr.shape[0] - 8    # B*16 pool1 / conv2 rows
    n3 = p2_scr.shape[0] - 8    # B*8  pool2 / conv3 rows

    def conv(src_ref, t_ref, n_rows):
        # conv = sum_kh  src[kh:kh+n_rows, :] @ T_kh   (bf16 x bf16 -> f32 acc)
        acc = jnp.dot(src_ref[0:n_rows, :], t_ref[0],
                      preferred_element_type=f32)
        for kh in range(1, KH):
            acc = acc + jnp.dot(src_ref[kh:kh + n_rows, :], t_ref[kh],
                                preferred_element_type=f32)
        return acc

    def mm(a, b_ref):
        return jnp.dot(a.astype(bf16), b_ref[...], preferred_element_type=f32)

    def pool(act, q_ref, rp_ref):
        # 2x2 avg pool: lane pairs via q (0.5 entries), row pairs via rp (0.5).
        return jnp.dot(rp_ref[...], mm(act, q_ref).astype(bf16),
                       preferred_element_type=f32)

    # ---- conv1 + relu + pool1 -> p1_scr : (B*16, 14*6) bf16 ----------------
    c1 = jnp.maximum(conv(x_ref, t1_ref, n1) + b1_ref[...], 0.0)
    p1_scr[0:n2, :] = pool(c1, q1_ref, rp1_ref).astype(bf16)
    p1_scr[n2:n2 + 8, :] = jnp.zeros((8, p1_scr.shape[1]), bf16)  # zero tail

    # ---- conv2 + relu + pool2 -> p2_scr : (B*8, 5*16) bf16 -----------------
    c2 = jnp.maximum(conv(p1_scr, t2_ref, n2) + b2_ref[...], 0.0)
    p2_scr[0:n3, :] = pool(c2, q2_ref, rp2_ref).astype(bf16)
    p2_scr[n3:n3 + 8, :] = jnp.zeros((8, p2_scr.shape[1]), bf16)  # zero tail

    # ---- conv3 (1x1 spatial output) + relu ----------------------------------
    c3 = conv(p2_scr, t3_ref, n3)                                  # (B*8, 120)
    h3 = jnp.dot(sel_ref[...], c3.astype(bf16),                    # pick row 0
                 preferred_element_type=f32)                       # of each img
    h3 = jnp.maximum(h3 + b3_ref[...], 0.0)                        # (B, 120)

    # ---- fc4 (relu) + fc5 ----------------------------------------------------
    h4 = jnp.maximum(mm(h3, w4_ref) + b4_ref[...], 0.0)            # (B, 84)
    out_ref[...] = mm(h4, w5_ref) + b5_ref[...]                    # (B, 128)


# ------------------------------ weight packing -------------------------------

def pack_params(params, block_b):
    """Pre-pack LeNet weights into the kernel's matmul layout (done once)."""
    B = block_b
    g = lambda k: np.asarray(params[k], np.float32)

    def tap_mats(w, win):
        # w: (5,5,cin,cout) -> (5, win*cin, wout*cout) block-Toeplitz matrices.
        kh_n, kw_n, cin, cout = w.shape
        wout = win - kw_n + 1
        t = np.zeros((kh_n, win * cin, wout * cout), np.float32)
        for kh in range(kh_n):
            for ow in range(wout):
                for kw in range(kw_n):
                    wc = ow + kw
                    t[kh, wc * cin:(wc + 1) * cin,
                      ow * cout:(ow + 1) * cout] = w[kh, kw]
        return t

    def col_pool(wout, c):
        # (wout*c, (wout//2)*c): 0.5 * (adjacent lane-group sum), per channel.
        q = np.zeros((wout * c, (wout // 2) * c), np.float32)
        eye = 0.5 * np.eye(c, dtype=np.float32)
        for oc in range(wout // 2):
            q[(2 * oc) * c:(2 * oc + 1) * c, oc * c:(oc + 1) * c] = eye
            q[(2 * oc + 1) * c:(2 * oc + 2) * c, oc * c:(oc + 1) * c] = eye
        return q

    def row_pool(rows_out, rows_in, valid):
        # (B*rows_out, B*rows_in): 0.5 * (row-pair sum), per image block.
        p = np.zeros((B * rows_out, B * rows_in), np.float32)
        for b in range(B):
            for r in range(valid):
                p[b * rows_out + r, b * rows_in + 2 * r] = 0.5
                p[b * rows_out + r, b * rows_in + 2 * r + 1] = 0.5
        return p

    sel = np.zeros((B, B * 8), np.float32)
    sel[np.arange(B), np.arange(B) * 8] = 1.0            # pick each image's row 0

    w5 = np.zeros((84, 128), np.float32)
    w5[:, :10] = g("w5")
    b5 = np.zeros((1, 128), np.float32)
    b5[0, :10] = g("b5")

    bf = lambda a: jnp.asarray(a, jnp.bfloat16)
    fp = lambda a: jnp.asarray(a, jnp.float32)
    return dict(
        t1=bf(tap_mats(g("w1"), 32)),          # (5, 32, 168)
        t2=bf(tap_mats(g("w2"), 14)),          # (5, 84, 160)
        t3=bf(tap_mats(g("w3"), 5)),           # (5, 80, 120)
        q1=bf(col_pool(28, 6)),                # (168, 84)
        rp1=bf(row_pool(16, 32, 14)),          # (B*16, B*32)
        q2=bf(col_pool(10, 16)),               # (160, 80)
        rp2=bf(row_pool(8, 16, 5)),            # (B*8, B*16)
        sel=bf(sel),                           # (B, B*8)
        w4=bf(g("w4")),                        # (120, 84)
        w5=bf(w5),                             # (84, 128)
        b1=fp(np.tile(g("b1"), 28)[None]),     # (1, 168)
        b2=fp(np.tile(g("b2"), 10)[None]),     # (1, 160)
        b3=fp(g("b3")[None]),                  # (1, 120)
        b4=fp(g("b4")[None]),                  # (1, 84)
        b5=fp(b5),                             # (1, 128)
    )


# ------------------------------ wrapper ---------------------------------------

def _const_spec(arr):
    zeros = (0,) * arr.ndim
    return pl.BlockSpec(arr.shape, lambda i: zeros)       # resident, DMA'd once


def lenet_forward(x_nchw, packed, block_b=4):
    """LeNet forward. x_nchw: (N, 1, 32, 32) f32 -> logits (N, 10) f32.
    `packed` must come from pack_params(params, block_b)."""
    B = block_b
    n = x_nchw.shape[0]
    grid_n = (n + B - 1) // B
    n_pad = grid_n * B

    # Raw single-channel image as bf16, one (B*32 + 8, 32) row-slab per grid
    # step (8 trailing zero rows so kh-shifted in-kernel slices never run off).
    xi = x_nchw[:, 0, :, :].astype(jnp.bfloat16)                  # (N, 32, 32)
    xi = jnp.pad(xi, ((0, n_pad - n), (0, 0), (0, 0)))
    xp = jnp.zeros((grid_n, B * 32 + 8, 32), jnp.bfloat16)
    xp = xp.at[:, :B * 32, :].set(xi.reshape(grid_n, B * 32, 32))

    out = pl.pallas_call(
        _lenet_kernel,
        out_shape=jax.ShapeDtypeStruct((grid_n, B, 128), jnp.float32),
        grid_spec=pltpu.PrefetchScalarGridSpec(
            num_scalar_prefetch=0,
            grid=(grid_n,),                                # one image block/step
            in_specs=[
                pl.BlockSpec((None, B * 32 + 8, 32), lambda i: (i, 0, 0)),
                _const_spec(packed["t1"]), _const_spec(packed["t2"]),
                _const_spec(packed["t3"]), _const_spec(packed["q1"]),
                _const_spec(packed["rp1"]), _const_spec(packed["q2"]),
                _const_spec(packed["rp2"]), _const_spec(packed["sel"]),
                _const_spec(packed["w4"]), _const_spec(packed["w5"]),
                _const_spec(packed["b1"]), _const_spec(packed["b2"]),
                _const_spec(packed["b3"]), _const_spec(packed["b4"]),
                _const_spec(packed["b5"]),
            ],
            out_specs=pl.BlockSpec((None, B, 128), lambda i: (i, 0, 0)),
            scratch_shapes=[
                pltpu.VMEM((B * 16 + 8, 14 * 6), jnp.bfloat16),   # pool1 output
                pltpu.VMEM((B * 8 + 8, 5 * 16), jnp.bfloat16),    # pool2 output
            ]),
        compiler_params=pltpu.CompilerParams(
            dimension_semantics=("parallel",),
            vmem_limit_bytes=32 * 1024 * 1024),
    )(xp, packed["t1"], packed["t2"], packed["t3"], packed["q1"],
      packed["rp1"], packed["q2"], packed["rp2"], packed["sel"],
      packed["w4"], packed["w5"], packed["b1"], packed["b2"],
      packed["b3"], packed["b4"], packed["b5"])
    return out.reshape(grid_n * B, 128)[:n, :10]


# ------------------------------- params / reference --------------------------

def init_lenet_params(key):
    """Deterministic synthetic parameters (shapes from LeNet.__init__)."""
    def conv_w(k, kh, kw, cin, cout):
        fan_in = kh * kw * cin
        return jax.random.normal(k, (kh, kw, cin, cout), jnp.float32) / np.sqrt(fan_in)

    def lin_w(k, cin, cout):
        return jax.random.normal(k, (cin, cout), jnp.float32) / np.sqrt(cin)

    ks = jax.random.split(key, 10)
    return {
        "w1": conv_w(ks[0], 5, 5, 1, 6),
        "b1": 0.01 * jax.random.normal(ks[1], (6,), jnp.float32),
        "w2": conv_w(ks[2], 5, 5, 6, 16),
        "b2": 0.01 * jax.random.normal(ks[3], (16,), jnp.float32),
        "w3": conv_w(ks[4], 5, 5, 16, 120),
        "b3": 0.01 * jax.random.normal(ks[5], (120,), jnp.float32),
        "w4": lin_w(ks[6], 120, 84),
        "b4": 0.01 * jax.random.normal(ks[7], (84,), jnp.float32),
        "w5": lin_w(ks[8], 84, 10),
        "b5": 0.01 * jax.random.normal(ks[9], (10,), jnp.float32),
    }


def lenet_forward_ref(x_nchw, params):
    """Pure-JAX f32 reference for correctness checking."""
    x = jnp.transpose(x_nchw, (0, 2, 3, 1)).astype(jnp.float32)
    dn = ("NHWC", "HWIO", "NHWC")

    def conv(x, w, b):
        y = lax.conv_general_dilated(x, w, (1, 1), "VALID", dimension_numbers=dn)
        return jax.nn.relu(y + b)

    def pool(x):
        y = lax.reduce_window(x, 0.0, lax.add, (1, 2, 2, 1), (1, 2, 2, 1), "VALID")
        return y * 0.25

    x = pool(conv(x, params["w1"], params["b1"]))
    x = pool(conv(x, params["w2"], params["b2"]))
    x = conv(x, params["w3"], params["b3"])
    x = x.reshape(x.shape[0], -1)
    x = jax.nn.relu(x @ params["w4"] + params["b4"])
    return x @ params["w5"] + params["b5"]


if __name__ == "__main__":
    key = jax.random.PRNGKey(0)
    k_x, k_p = jax.random.split(key)
    # LeNet geometry needs a 32x32 single-channel input; batch=6 is deliberately
    # not a multiple of the per-step image block (4) to exercise batch padding.
    batch, block_b = 6, 4
    x = jax.random.normal(k_x, (batch, 1, 32, 32), jnp.float32)
    params = init_lenet_params(k_p)

    packed = pack_params(params, block_b)
    fwd = jax.jit(lenet_forward, static_argnames="block_b")
    out = jax.block_until_ready(fwd(x, packed, block_b=block_b))

    ref = lenet_forward_ref(x, params)
    assert out.shape == (batch, 10)
    # bf16 MXU matmuls (f32 accumulation): loosened tolerance vs f32 reference.
    np.testing.assert_allclose(np.asarray(out), np.asarray(ref),
                               rtol=5e-2, atol=5e-2)
    print("KERNEL_OK")
</pallas_src>

<mosaic_0001>
module attributes {stable_mosaic.version = 11 : i64} {
  func.func @_lenet_kernel(%arg0: i32, %arg1: memref<1x136x32xbf16, #tpu.memory_space<vmem>>, %arg2: memref<5x32x168xbf16, #tpu.memory_space<vmem>>, %arg3: memref<5x84x160xbf16, #tpu.memory_space<vmem>>, %arg4: memref<5x80x120xbf16, #tpu.memory_space<vmem>>, %arg5: memref<168x84xbf16, #tpu.memory_space<vmem>>, %arg6: memref<64x128xbf16, #tpu.memory_space<vmem>>, %arg7: memref<160x80xbf16, #tpu.memory_space<vmem>>, %arg8: memref<32x64xbf16, #tpu.memory_space<vmem>>, %arg9: memref<4x32xbf16, #tpu.memory_space<vmem>>, %arg10: memref<120x84xbf16, #tpu.memory_space<vmem>>, %arg11: memref<84x128xbf16, #tpu.memory_space<vmem>>, %arg12: memref<1x168xf32, #tpu.memory_space<vmem>>, %arg13: memref<1x160xf32, #tpu.memory_space<vmem>>, %arg14: memref<1x120xf32, #tpu.memory_space<vmem>>, %arg15: memref<1x84xf32, #tpu.memory_space<vmem>>, %arg16: memref<1x128xf32, #tpu.memory_space<vmem>>, %arg17: memref<1x4x128xf32, #tpu.memory_space<vmem>>, %arg18: memref<72x84xbf16, #tpu.memory_space<vmem>>, %arg19: memref<40x80xbf16, #tpu.memory_space<vmem>>) attributes {dimension_semantics = [#tpu.dimension_semantics<parallel>], iteration_bounds = array<i64: 2>, scalar_prefetch = 0 : i64, scratch_operands = 2 : i64, tpu.core_type = #tpu.core_type<tc>, window_params = [{transform_indices = @transform_0, window_bounds = array<i64: 1, 136, 32>}, {pipeline_mode = #tpu.pipeline_mode<synchronous>, transform_indices = @transform_1, window_bounds = array<i64: 5, 32, 168>}, {pipeline_mode = #tpu.pipeline_mode<synchronous>, transform_indices = @transform_2, window_bounds = array<i64: 5, 84, 160>}, {pipeline_mode = #tpu.pipeline_mode<synchronous>, transform_indices = @transform_3, window_bounds = array<i64: 5, 80, 120>}, {pipeline_mode = #tpu.pipeline_mode<synchronous>, transform_indices = @transform_4, window_bounds = array<i64: 168, 84>}, {pipeline_mode = #tpu.pipeline_mode<synchronous>, transform_indices = @transform_5, window_bounds = array<i64: 64, 128>}, {pipeline_mode = #tpu.pipeline_mode<synchronous>, transform_indices = @transform_6, window_bounds = array<i64: 160, 80>}, {pipeline_mode = #tpu.pipeline_mode<synchronous>, transform_indices = @transform_7, window_bounds = array<i64: 32, 64>}, {pipeline_mode = #tpu.pipeline_mode<synchronous>, transform_indices = @transform_8, window_bounds = array<i64: 4, 32>}, {pipeline_mode = #tpu.pipeline_mode<synchronous>, transform_indices = @transform_9, window_bounds = array<i64: 120, 84>}, {pipeline_mode = #tpu.pipeline_mode<synchronous>, transform_indices = @transform_10, window_bounds = array<i64: 84, 128>}, {pipeline_mode = #tpu.pipeline_mode<synchronous>, transform_indices = @transform_11, window_bounds = array<i64: 1, 168>}, {pipeline_mode = #tpu.pipeline_mode<synchronous>, transform_indices = @transform_12, window_bounds = array<i64: 1, 160>}, {pipeline_mode = #tpu.pipeline_mode<synchronous>, transform_indices = @transform_13, window_bounds = array<i64: 1, 120>}, {pipeline_mode = #tpu.pipeline_mode<synchronous>, transform_indices = @transform_14, window_bounds = array<i64: 1, 84>}, {pipeline_mode = #tpu.pipeline_mode<synchronous>, transform_indices = @transform_15, window_bounds = array<i64: 1, 128>}, {transform_indices = @transform_16, window_bounds = array<i64: 1, 4, 128>}]} {
    %c0 = arith.constant 0 : index
    %c0_0 = arith.constant 0 : index
    %c0_1 = arith.constant 0 : index
    %0 = vector.load %arg1[%c0, %c0_0, %c0_1] : memref<1x136x32xbf16, #tpu.memory_space<vmem>>, vector<1x128x32xbf16>
    %1 = vector.shape_cast %0 : vector<1x128x32xbf16> to vector<128x32xbf16>
    %c0_2 = arith.constant 0 : index
    %c0_3 = arith.constant 0 : index
    %c0_4 = arith.constant 0 : index
    %2 = vector.load %arg2[%c0_2, %c0_3, %c0_4] : memref<5x32x168xbf16, #tpu.memory_space<vmem>>, vector<1x32x168xbf16>
    %3 = vector.shape_cast %2 : vector<1x32x168xbf16> to vector<32x168xbf16>
    %cst = arith.constant dense<0.000000e+00> : vector<128x168xf32>
    %4 = tpu.matmul %1, %3, %cst {dimension_numbers = #tpu.dot_dimension_numbers<[1], [0], [0], [1], [0, 0, 1, 1], [], []>} : vector<128x32xbf16>, vector<32x168xbf16>, vector<128x168xf32> -> vector<128x168xf32>
    %c0_5 = arith.constant 0 : index
    %c1 = arith.constant 1 : index
    %c0_6 = arith.constant 0 : index
    %5 = vector.load %arg1[%c0_5, %c1, %c0_6] : memref<1x136x32xbf16, #tpu.memory_space<vmem>>, vector<1x128x32xbf16>
    %6 = vector.shape_cast %5 : vector<1x128x32xbf16> to vector<128x32xbf16>
    %c1_7 = arith.constant 1 : index
    %c0_8 = arith.constant 0 : index
    %c0_9 = arith.constant 0 : index
    %7 = vector.load %arg2[%c1_7, %c0_8, %c0_9] : memref<5x32x168xbf16, #tpu.memory_space<vmem>>, vector<1x32x168xbf16>
    %8 = vector.shape_cast %7 : vector<1x32x168xbf16> to vector<32x168xbf16>
    %cst_10 = arith.constant dense<0.000000e+00> : vector<128x168xf32>
    %9 = tpu.matmul %6, %8, %cst_10 {dimension_numbers = #tpu.dot_dimension_numbers<[1], [0], [0], [1], [0, 0, 1, 1], [], []>} : vector<128x32xbf16>, vector<32x168xbf16>, vector<128x168xf32> -> vector<128x168xf32>
    %10 = arith.addf %4, %9 : vector<128x168xf32>
    %c0_11 = arith.constant 0 : index
    %c2 = arith.constant 2 : index
    %c0_12 = arith.constant 0 : index
    %11 = vector.load %arg1[%c0_11, %c2, %c0_12] : memref<1x136x32xbf16, #tpu.memory_space<vmem>>, vector<1x128x32xbf16>
    %12 = vector.shape_cast %11 : vector<1x128x32xbf16> to vector<128x32xbf16>
    %c2_13 = arith.constant 2 : index
    %c0_14 = arith.constant 0 : index
    %c0_15 = arith.constant 0 : index
    %13 = vector.load %arg2[%c2_13, %c0_14, %c0_15] : memref<5x32x168xbf16, #tpu.memory_space<vmem>>, vector<1x32x168xbf16>
    %14 = vector.shape_cast %13 : vector<1x32x168xbf16> to vector<32x168xbf16>
    %cst_16 = arith.constant dense<0.000000e+00> : vector<128x168xf32>
    %15 = tpu.matmul %12, %14, %cst_16 {dimension_numbers = #tpu.dot_dimension_numbers<[1], [0], [0], [1], [0, 0, 1, 1], [], []>} : vector<128x32xbf16>, vector<32x168xbf16>, vector<128x168xf32> -> vector<128x168xf32>
    %16 = arith.addf %10, %15 : vector<128x168xf32>
    %c0_17 = arith.constant 0 : index
    %c3 = arith.constant 3 : index
    %c0_18 = arith.constant 0 : index
    %17 = vector.load %arg1[%c0_17, %c3, %c0_18] : memref<1x136x32xbf16, #tpu.memory_space<vmem>>, vector<1x128x32xbf16>
    %18 = vector.shape_cast %17 : vector<1x128x32xbf16> to vector<128x32xbf16>
    %c3_19 = arith.constant 3 : index
    %c0_20 = arith.constant 0 : index
    %c0_21 = arith.constant 0 : index
    %19 = vector.load %arg2[%c3_19, %c0_20, %c0_21] : memref<5x32x168xbf16, #tpu.memory_space<vmem>>, vector<1x32x168xbf16>
    %20 = vector.shape_cast %19 : vector<1x32x168xbf16> to vector<32x168xbf16>
    %cst_22 = arith.constant dense<0.000000e+00> : vector<128x168xf32>
    %21 = tpu.matmul %18, %20, %cst_22 {dimension_numbers = #tpu.dot_dimension_numbers<[1], [0], [0], [1], [0, 0, 1, 1], [], []>} : vector<128x32xbf16>, vector<32x168xbf16>, vector<128x168xf32> -> vector<128x168xf32>
    %22 = arith.addf %16, %21 : vector<128x168xf32>
    %c0_23 = arith.constant 0 : index
    %c4 = arith.constant 4 : index
    %c0_24 = arith.constant 0 : index
    %23 = vector.load %arg1[%c0_23, %c4, %c0_24] : memref<1x136x32xbf16, #tpu.memory_space<vmem>>, vector<1x128x32xbf16>
    %24 = vector.shape_cast %23 : vector<1x128x32xbf16> to vector<128x32xbf16>
    %c4_25 = arith.constant 4 : index
    %c0_26 = arith.constant 0 : index
    %c0_27 = arith.constant 0 : index
    %25 = vector.load %arg2[%c4_25, %c0_26, %c0_27] : memref<5x32x168xbf16, #tpu.memory_space<vmem>>, vector<1x32x168xbf16>
    %26 = vector.shape_cast %25 : vector<1x32x168xbf16> to vector<32x168xbf16>
    %cst_28 = arith.constant dense<0.000000e+00> : vector<128x168xf32>
    %27 = tpu.matmul %24, %26, %cst_28 {dimension_numbers = #tpu.dot_dimension_numbers<[1], [0], [0], [1], [0, 0, 1, 1], [], []>} : vector<128x32xbf16>, vector<32x168xbf16>, vector<128x168xf32> -> vector<128x168xf32>
    %28 = arith.addf %22, %27 : vector<128x168xf32>
    %c0_29 = arith.constant 0 : index
    %c0_30 = arith.constant 0 : index
    %29 = vector.load %arg12[%c0_29, %c0_30] : memref<1x168xf32, #tpu.memory_space<vmem>>, vector<1x168xf32>
    %30 = vector.broadcast %29 : vector<1x168xf32> to vector<128x168xf32>
    %31 = arith.addf %28, %30 : vector<128x168xf32>
    %cst_31 = arith.constant 0.000000e+00 : f32
    %32 = vector.broadcast %cst_31 : f32 to vector<128x168xf32>
    %33 = arith.maximumf %31, %32 : vector<128x168xf32>
    %c0_32 = arith.constant 0 : index
    %c0_33 = arith.constant 0 : index
    %34 = vector.load %arg6[%c0_32, %c0_33] : memref<64x128xbf16, #tpu.memory_space<vmem>>, vector<64x128xbf16>
    %35 = arith.truncf %33 : vector<128x168xf32> to vector<128x168xbf16>
    %c0_34 = arith.constant 0 : index
    %c0_35 = arith.constant 0 : index
    %36 = vector.load %arg5[%c0_34, %c0_35] : memref<168x84xbf16, #tpu.memory_space<vmem>>, vector<168x84xbf16>
    %cst_36 = arith.constant dense<0.000000e+00> : vector<128x84xf32>
    %37 = tpu.matmul %35, %36, %cst_36 {dimension_numbers = #tpu.dot_dimension_numbers<[1], [0], [0], [1], [0, 0, 1, 1], [], []>} : vector<128x168xbf16>, vector<168x84xbf16>, vector<128x84xf32> -> vector<128x84xf32>
    %38 = arith.truncf %37 : vector<128x84xf32> to vector<128x84xbf16>
    %cst_37 = arith.constant dense<0.000000e+00> : vector<64x84xf32>
    %39 = tpu.matmul %34, %38, %cst_37 {dimension_numbers = #tpu.dot_dimension_numbers<[1], [0], [0], [1], [0, 0, 1, 1], [], []>} : vector<64x128xbf16>, vector<128x84xbf16>, vector<64x84xf32> -> vector<64x84xf32>
    %40 = arith.truncf %39 : vector<64x84xf32> to vector<64x84xbf16>
    %c0_38 = arith.constant 0 : index
    %c0_39 = arith.constant 0 : index
    %41 = vector.load %arg18[%c0_38, %c0_39] : memref<72x84xbf16, #tpu.memory_space<vmem>>, vector<64x84xbf16>
    tpu.vector_store %arg18[%c0_38, %c0_39], %40 {strides = array<i32>} : memref<72x84xbf16, #tpu.memory_space<vmem>>, vector<64x84xbf16>,
    %cst_40 = arith.constant 0.000000e+00 : bf16
    %42 = vector.broadcast %cst_40 : bf16 to vector<8x84xbf16>
    %c64 = arith.constant 64 : index
    %c0_41 = arith.constant 0 : index
    %43 = vector.load %arg18[%c64, %c0_41] : memref<72x84xbf16, #tpu.memory_space<vmem>>, vector<8x84xbf16>
    tpu.vector_store %arg18[%c64, %c0_41], %42 {strides = array<i32>} : memref<72x84xbf16, #tpu.memory_space<vmem>>, vector<8x84xbf16>,
    %c0_42 = arith.constant 0 : index
    %c0_43 = arith.constant 0 : index
    %44 = vector.load %arg18[%c0_42, %c0_43] : memref<72x84xbf16, #tpu.memory_space<vmem>>, vector<64x84xbf16>
    %c0_44 = arith.constant 0 : index
    %c0_45 = arith.constant 0 : index
    %c0_46 = arith.constant 0 : index
    %45 = vector.load %arg3[%c0_44, %c0_45, %c0_46] : memref<5x84x160xbf16, #tpu.memory_space<vmem>>, vector<1x84x160xbf16>
    %46 = vector.shape_cast %45 : vector<1x84x160xbf16> to vector<84x160xbf16>
    %cst_47 = arith.constant dense<0.000000e+00> : vector<64x160xf32>
    %47 = tpu.matmul %44, %46, %cst_47 {dimension_numbers = #tpu.dot_dimension_numbers<[1], [0], [0], [1], [0, 0, 1, 1], [], []>} : vector<64x84xbf16>, vector<84x160xbf16>, vector<64x160xf32> -> vector<64x160xf32>
    %c1_48 = arith.constant 1 : index
    %c0_49 = arith.constant 0 : index
    %48 = vector.load %arg18[%c1_48, %c0_49] : memref<72x84xbf16, #tpu.memory_space<vmem>>, vector<64x84xbf16>
    %c1_50 = arith.constant 1 : index
    %c0_51 = arith.constant 0 : index
    %c0_52 = arith.constant 0 : index
    %49 = vector.load %arg3[%c1_50, %c0_51, %c0_52] : memref<5x84x160xbf16, #tpu.memory_space<vmem>>, vector<1x84x160xbf16>
    %50 = vector.shape_cast %49 : vector<1x84x160xbf16> to vector<84x160xbf16>
    %cst_53 = arith.constant dense<0.000000e+00> : vector<64x160xf32>
    %51 = tpu.matmul %48, %50, %cst_53 {dimension_numbers = #tpu.dot_dimension_numbers<[1], [0], [0], [1], [0, 0, 1, 1], [], []>} : vector<64x84xbf16>, vector<84x160xbf16>, vector<64x160xf32> -> vector<64x160xf32>
    %52 = arith.addf %47, %51 : vector<64x160xf32>
    %c2_54 = arith.constant 2 : index
    %c0_55 = arith.constant 0 : index
    %53 = vector.load %arg18[%c2_54, %c0_55] : memref<72x84xbf16, #tpu.memory_space<vmem>>, vector<64x84xbf16>
    %c2_56 = arith.constant 2 : index
    %c0_57 = arith.constant 0 : index
    %c0_58 = arith.constant 0 : index
    %54 = vector.load %arg3[%c2_56, %c0_57, %c0_58] : memref<5x84x160xbf16, #tpu.memory_space<vmem>>, vector<1x84x160xbf16>
    %55 = vector.shape_cast %54 : vector<1x84x160xbf16> to vector<84x160xbf16>
    %cst_59 = arith.constant dense<0.000000e+00> : vector<64x160xf32>
    %56 = tpu.matmul %53, %55, %cst_59 {dimension_numbers = #tpu.dot_dimension_numbers<[1], [0], [0], [1], [0, 0, 1, 1], [], []>} : vector<64x84xbf16>, vector<84x160xbf16>, vector<64x160xf32> -> vector<64x160xf32>
    %57 = arith.addf %52, %56 : vector<64x160xf32>
    %c3_60 = arith.constant 3 : index
    %c0_61 = arith.constant 0 : index
    %58 = vector.load %arg18[%c3_60, %c0_61] : memref<72x84xbf16, #tpu.memory_space<vmem>>, vector<64x84xbf16>
    %c3_62 = arith.constant 3 : index
    %c0_63 = arith.constant 0 : index
    %c0_64 = arith.constant 0 : index
    %59 = vector.load %arg3[%c3_62, %c0_63, %c0_64] : memref<5x84x160xbf16, #tpu.memory_space<vmem>>, vector<1x84x160xbf16>
    %60 = vector.shape_cast %59 : vector<1x84x160xbf16> to vector<84x160xbf16>
    %cst_65 = arith.constant dense<0.000000e+00> : vector<64x160xf32>
    %61 = tpu.matmul %58, %60, %cst_65 {dimension_numbers = #tpu.dot_dimension_numbers<[1], [0], [0], [1], [0, 0, 1, 1], [], []>} : vector<64x84xbf16>, vector<84x160xbf16>, vector<64x160xf32> -> vector<64x160xf32>
    %62 = arith.addf %57, %61 : vector<64x160xf32>
    %c4_66 = arith.constant 4 : index
    %c0_67 = arith.constant 0 : index
    %63 = vector.load %arg18[%c4_66, %c0_67] : memref<72x84xbf16, #tpu.memory_space<vmem>>, vector<64x84xbf16>
    %c4_68 = arith.constant 4 : index
    %c0_69 = arith.constant 0 : index
    %c0_70 = arith.constant 0 : index
    %64 = vector.load %arg3[%c4_68, %c0_69, %c0_70] : memref<5x84x160xbf16, #tpu.memory_space<vmem>>, vector<1x84x160xbf16>
    %65 = vector.shape_cast %64 : vector<1x84x160xbf16> to vector<84x160xbf16>
    %cst_71 = arith.constant dense<0.000000e+00> : vector<64x160xf32>
    %66 = tpu.matmul %63, %65, %cst_71 {dimension_numbers = #tpu.dot_dimension_numbers<[1], [0], [0], [1], [0, 0, 1, 1], [], []>} : vector<64x84xbf16>, vector<84x160xbf16>, vector<64x160xf32> -> vector<64x160xf32>
    %67 = arith.addf %62, %66 : vector<64x160xf32>
    %c0_72 = arith.constant 0 : index
    %c0_73 = arith.constant 0 : index
    %68 = vector.load %arg13[%c0_72, %c0_73] : memref<1x160xf32, #tpu.memory_space<vmem>>, vector<1x160xf32>
    %69 = vector.broadcast %68 : vector<1x160xf32> to vector<64x160xf32>
    %70 = arith.addf %67, %69 : vector<64x160xf32>
    %cst_74 = arith.constant 0.000000e+00 : f32
    %71 = vector.broadcast %cst_74 : f32 to vector<64x160xf32>
    %72 = arith.maximumf %70, %71 : vector<64x160xf32>
    %c0_75 = arith.constant 0 : index
    %c0_76 = arith.constant 0 : index
    %73 = vector.load %arg8[%c0_75, %c0_76] : memref<32x64xbf16, #tpu.memory_space<vmem>>, vector<32x64xbf16>
    %74 = arith.truncf %72 : vector<64x160xf32> to vector<64x160xbf16>
    %c0_77 = arith.constant 0 : index
    %c0_78 = arith.constant 0 : index
    %75 = vector.load %arg7[%c0_77, %c0_78] : memref<160x80xbf16, #tpu.memory_space<vmem>>, vector<160x80xbf16>
    %cst_79 = arith.constant dense<0.000000e+00> : vector<64x80xf32>
    %76 = tpu.matmul %74, %75, %cst_79 {dimension_numbers = #tpu.dot_dimension_numbers<[1], [0], [0], [1], [0, 0, 1, 1], [], []>} : vector<64x160xbf16>, vector<160x80xbf16>, vector<64x80xf32> -> vector<64x80xf32>
    %77 = arith.truncf %76 : vector<64x80xf32> to vector<64x80xbf16>
    %cst_80 = arith.constant dense<0.000000e+00> : vector<32x80xf32>
    %78 = tpu.matmul %73, %77, %cst_80 {dimension_numbers = #tpu.dot_dimension_numbers<[1], [0], [0], [1], [0, 0, 1, 1], [], []>} : vector<32x64xbf16>, vector<64x80xbf16>, vector<32x80xf32> -> vector<32x80xf32>
    %79 = arith.truncf %78 : vector<32x80xf32> to vector<32x80xbf16>
    %c0_81 = arith.constant 0 : index
    %c0_82 = arith.constant 0 : index
    %80 = vector.load %arg19[%c0_81, %c0_82] : memref<40x80xbf16, #tpu.memory_space<vmem>>, vector<32x80xbf16>
    tpu.vector_store %arg19[%c0_81, %c0_82], %79 {strides = array<i32>} : memref<40x80xbf16, #tpu.memory_space<vmem>>, vector<32x80xbf16>,
    %cst_83 = arith.constant 0.000000e+00 : bf16
    %81 = vector.broadcast %cst_83 : bf16 to vector<8x80xbf16>
    %c32 = arith.constant 32 : index
    %c0_84 = arith.constant 0 : index
    %82 = vector.load %arg19[%c32, %c0_84] : memref<40x80xbf16, #tpu.memory_space<vmem>>, vector<8x80xbf16>
    tpu.vector_store %arg19[%c32, %c0_84], %81 {strides = array<i32>} : memref<40x80xbf16, #tpu.memory_space<vmem>>, vector<8x80xbf16>,
    %c0_85 = arith.constant 0 : index
    %c0_86 = arith.constant 0 : index
    %83 = vector.load %arg19[%c0_85, %c0_86] : memref<40x80xbf16, #tpu.memory_space<vmem>>, vector<32x80xbf16>
    %c0_87 = arith.constant 0 : index
    %c0_88 = arith.constant 0 : index
    %c0_89 = arith.constant 0 : index
    %84 = vector.load %arg4[%c0_87, %c0_88, %c0_89] : memref<5x80x120xbf16, #tpu.memory_space<vmem>>, vector<1x80x120xbf16>
    %85 = vector.shape_cast %84 : vector<1x80x120xbf16> to vector<80x120xbf16>
    %cst_90 = arith.constant dense<0.000000e+00> : vector<32x120xf32>
    %86 = tpu.matmul %83, %85, %cst_90 {dimension_numbers = #tpu.dot_dimension_numbers<[1], [0], [0], [1], [0, 0, 1, 1], [], []>} : vector<32x80xbf16>, vector<80x120xbf16>, vector<32x120xf32> -> vector<32x120xf32>
    %c1_91 = arith.constant 1 : index
    %c0_92 = arith.constant 0 : index
    %87 = vector.load %arg19[%c1_91, %c0_92] : memref<40x80xbf16, #tpu.memory_space<vmem>>, vector<32x80xbf16>
    %c1_93 = arith.constant 1 : index
    %c0_94 = arith.constant 0 : index
    %c0_95 = arith.constant 0 : index
    %88 = vector.load %arg4[%c1_93, %c0_94, %c0_95] : memref<5x80x120xbf16, #tpu.memory_space<vmem>>, vector<1x80x120xbf16>
    %89 = vector.shape_cast %88 : vector<1x80x120xbf16> to vector<80x120xbf16>
    %cst_96 = arith.constant dense<0.000000e+00> : vector<32x120xf32>
    %90 = tpu.matmul %87, %89, %cst_96 {dimension_numbers = #tpu.dot_dimension_numbers<[1], [0], [0], [1], [0, 0, 1, 1], [], []>} : vector<32x80xbf16>, vector<80x120xbf16>, vector<32x120xf32> -> vector<32x120xf32>
    %91 = arith.addf %86, %90 : vector<32x120xf32>
    %c2_97 = arith.constant 2 : index
    %c0_98 = arith.constant 0 : index
    %92 = vector.load %arg19[%c2_97, %c0_98] : memref<40x80xbf16, #tpu.memory_space<vmem>>, vector<32x80xbf16>
    %c2_99 = arith.constant 2 : index
    %c0_100 = arith.constant 0 : index
    %c0_101 = arith.constant 0 : index
    %93 = vector.load %arg4[%c2_99, %c0_100, %c0_101] : memref<5x80x120xbf16, #tpu.memory_space<vmem>>, vector<1x80x120xbf16>
    %94 = vector.shape_cast %93 : vector<1x80x120xbf16> to vector<80x120xbf16>
    %cst_102 = arith.constant dense<0.000000e+00> : vector<32x120xf32>
    %95 = tpu.matmul %92, %94, %cst_102 {dimension_numbers = #tpu.dot_dimension_numbers<[1], [0], [0], [1], [0, 0, 1, 1], [], []>} : vector<32x80xbf16>, vector<80x120xbf16>, vector<32x120xf32> -> vector<32x120xf32>
    %96 = arith.addf %91, %95 : vector<32x120xf32>
    %c3_103 = arith.constant 3 : index
    %c0_104 = arith.constant 0 : index
    %97 = vector.load %arg19[%c3_103, %c0_104] : memref<40x80xbf16, #tpu.memory_space<vmem>>, vector<32x80xbf16>
    %c3_105 = arith.constant 3 : index
    %c0_106 = arith.constant 0 : index
    %c0_107 = arith.constant 0 : index
    %98 = vector.load %arg4[%c3_105, %c0_106, %c0_107] : memref<5x80x120xbf16, #tpu.memory_space<vmem>>, vector<1x80x120xbf16>
    %99 = vector.shape_cast %98 : vector<1x80x120xbf16> to vector<80x120xbf16>
    %cst_108 = arith.constant dense<0.000000e+00> : vector<32x120xf32>
    %100 = tpu.matmul %97, %99, %cst_108 {dimension_numbers = #tpu.dot_dimension_numbers<[1], [0], [0], [1], [0, 0, 1, 1], [], []>} : vector<32x80xbf16>, vector<80x120xbf16>, vector<32x120xf32> -> vector<32x120xf32>
    %101 = arith.addf %96, %100 : vector<32x120xf32>
    %c4_109 = arith.constant 4 : index
    %c0_110 = arith.constant 0 : index
    %102 = vector.load %arg19[%c4_109, %c0_110] : memref<40x80xbf16, #tpu.memory_space<vmem>>, vector<32x80xbf16>
    %c4_111 = arith.constant 4 : index
    %c0_112 = arith.constant 0 : index
    %c0_113 = arith.constant 0 : index
    %103 = vector.load %arg4[%c4_111, %c0_112, %c0_113] : memref<5x80x120xbf16, #tpu.memory_space<vmem>>, vector<1x80x120xbf16>
    %104 = vector.shape_cast %103 : vector<1x80x120xbf16> to vector<80x120xbf16>
    %cst_114 = arith.constant dense<0.000000e+00> : vector<32x120xf32>
    %105 = tpu.matmul %102, %104, %cst_114 {dimension_numbers = #tpu.dot_dimension_numbers<[1], [0], [0], [1], [0, 0, 1, 1], [], []>} : vector<32x80xbf16>, vector<80x120xbf16>, vector<32x120xf32> -> vector<32x120xf32>
    %106 = arith.addf %101, %105 : vector<32x120xf32>
    %c0_115 = arith.constant 0 : index
    %c0_116 = arith.constant 0 : index
    %107 = vector.load %arg9[%c0_115, %c0_116] : memref<4x32xbf16, #tpu.memory_space<vmem>>, vector<4x32xbf16>
    %108 = arith.truncf %106 : vector<32x120xf32> to vector<32x120xbf16>
    %cst_117 = arith.constant dense<0.000000e+00> : vector<4x120xf32>
    %109 = tpu.matmul %107, %108, %cst_117 {dimension_numbers = #tpu.dot_dimension_numbers<[1], [0], [0], [1], [0, 0, 1, 1], [], []>} : vector<4x32xbf16>, vector<32x120xbf16>, vector<4x120xf32> -> vector<4x120xf32>
    %c0_118 = arith.constant 0 : index
    %c0_119 = arith.constant 0 : index
    %110 = vector.load %arg14[%c0_118, %c0_119] : memref<1x120xf32, #tpu.memory_space<vmem>>, vector<1x120xf32>
    %111 = vector.broadcast %110 : vector<1x120xf32> to vector<4x120xf32>
    %112 = arith.addf %109, %111 : vector<4x120xf32>
    %cst_120 = arith.constant 0.000000e+00 : f32
    %113 = vector.broadcast %cst_120 : f32 to vector<4x120xf32>
    %114 = arith.maximumf %112, %113 : vector<4x120xf32>
    %115 = arith.truncf %114 : vector<4x120xf32> to vector<4x120xbf16>
    %c0_121 = arith.constant 0 : index
    %c0_122 = arith.constant 0 : index
    %116 = vector.load %arg10[%c0_121, %c0_122] : memref<120x84xbf16, #tpu.memory_space<vmem>>, vector<120x84xbf16>
    %cst_123 = arith.constant dense<0.000000e+00> : vector<4x84xf32>
    %117 = tpu.matmul %115, %116, %cst_123 {dimension_numbers = #tpu.dot_dimension_numbers<[1], [0], [0], [1], [0, 0, 1, 1], [], []>} : vector<4x120xbf16>, vector<120x84xbf16>, vector<4x84xf32> -> vector<4x84xf32>
    %c0_124 = arith.constant 0 : index
    %c0_125 = arith.constant 0 : index
    %118 = vector.load %arg15[%c0_124, %c0_125] : memref<1x84xf32, #tpu.memory_space<vmem>>, vector<1x84xf32>
    %119 = vector.broadcast %118 : vector<1x84xf32> to vector<4x84xf32>
    %120 = arith.addf %117, %119 : vector<4x84xf32>
    %cst_126 = arith.constant 0.000000e+00 : f32
    %121 = vector.broadcast %cst_126 : f32 to vector<4x84xf32>
    %122 = arith.maximumf %120, %121 : vector<4x84xf32>
    %123 = arith.truncf %122 : vector<4x84xf32> to vector<4x84xbf16>
    %c0_127 = arith.constant 0 : index
    %c0_128 = arith.constant 0 : index
    %124 = vector.load %arg11[%c0_127, %c0_128] : memref<84x128xbf16, #tpu.memory_space<vmem>>, vector<84x128xbf16>
    %cst_129 = arith.constant dense<0.000000e+00> : vector<4x128xf32>
    %125 = tpu.matmul %123, %124, %cst_129 {dimension_numbers = #tpu.dot_dimension_numbers<[1], [0], [0], [1], [0, 0, 1, 1], [], []>} : vector<4x84xbf16>, vector<84x128xbf16>, vector<4x128xf32> -> vector<4x128xf32>
    %c0_130 = arith.constant 0 : index
    %c0_131 = arith.constant 0 : index
    %126 = vector.load %arg16[%c0_130, %c0_131] : memref<1x128xf32, #tpu.memory_space<vmem>>, vector<1x128xf32>
    %127 = vector.broadcast %126 : vector<1x128xf32> to vector<4x128xf32>
    %128 = arith.addf %125, %127 : vector<4x128xf32>
    %c0_132 = arith.constant 0 : index
    %c0_133 = arith.constant 0 : index
    %c0_134 = arith.constant 0 : index
    %129 = vector.load %arg17[%c0_132, %c0_133, %c0_134] : memref<1x4x128xf32, #tpu.memory_space<vmem>>, vector<1x4x128xf32>
    %130 = vector.shape_cast %129 : vector<1x4x128xf32> to vector<4x128xf32>
    %131 = vector.shape_cast %128 : vector<4x128xf32> to vector<1x4x128xf32>
    tpu.vector_store %arg17[%c0_132, %c0_133, %c0_134], %131 {strides = array<i32>} : memref<1x4x128xf32, #tpu.memory_space<vmem>>, vector<1x4x128xf32>,
    return
  }
  func.func @transform_0(%arg0: i32) -> (i32, i32, i32) {
    %c0_i32 = arith.constant 0 : i32
    %c0_i32_0 = arith.constant 0 : i32
    %c0_i32_1 = arith.constant 0 : i32
    return %arg0, %c0_i32, %c0_i32_0 : i32, i32, i32
  }
  func.func @transform_1(%arg0: i32) -> (i32, i32, i32) {
    %c0_i32 = arith.constant 0 : i32
    %c0_i32_0 = arith.constant 0 : i32
    %c0_i32_1 = arith.constant 0 : i32
    %c0_i32_2 = arith.constant 0 : i32
    return %c0_i32, %c0_i32_0, %c0_i32_1 : i32, i32, i32
  }
  func.func @transform_2(%arg0: i32) -> (i32, i32, i32) {
    %c0_i32 = arith.constant 0 : i32
    %c0_i32_0 = arith.constant 0 : i32
    %c0_i32_1 = arith.constant 0 : i32
    %c0_i32_2 = arith.constant 0 : i32
    return %c0_i32, %c0_i32_0, %c0_i32_1 : i32, i32, i32
  }
  func.func @transform_3(%arg0: i32) -> (i32, i32, i32) {
    %c0_i32 = arith.constant 0 : i32
    %c0_i32_0 = arith.constant 0 : i32
    %c0_i32_1 = arith.constant 0 : i32
    %c0_i32_2 = arith.constant 0 : i32
    return %c0_i32, %c0_i32_0, %c0_i32_1 : i32, i32, i32
  }
  func.func @transform_4(%arg0: i32) -> (i32, i32) {
    %c0_i32 = arith.constant 0 : i32
    %c0_i32_0 = arith.constant 0 : i32
    %c0_i32_1 = arith.constant 0 : i32
    return %c0_i32, %c0_i32_0 : i32, i32
  }
  func.func @transform_5(%arg0: i32) -> (i32, i32) {
    %c0_i32 = arith.constant 0 : i32
    %c0_i32_0 = arith.constant 0 : i32
    %c0_i32_1 = arith.constant 0 : i32
    return %c0_i32, %c0_i32_0 : i32, i32
  }
  func.func @transform_6(%arg0: i32) -> (i32, i32) {
    %c0_i32 = arith.constant 0 : i32
    %c0_i32_0 = arith.constant 0 : i32
    %c0_i32_1 = arith.constant 0 : i32
    return %c0_i32, %c0_i32_0 : i32, i32
  }
  func.func @transform_7(%arg0: i32) -> (i32, i32) {
    %c0_i32 = arith.constant 0 : i32
    %c0_i32_0 = arith.constant 0 : i32
    %c0_i32_1 = arith.constant 0 : i32
    return %c0_i32, %c0_i32_0 : i32, i32
  }
  func.func @transform_8(%arg0: i32) -> (i32, i32) {
    %c0_i32 = arith.constant 0 : i32
    %c0_i32_0 = arith.constant 0 : i32
    %c0_i32_1 = arith.constant 0 : i32
    return %c0_i32, %c0_i32_0 : i32, i32
  }
  func.func @transform_9(%arg0: i32) -> (i32, i32) {
    %c0_i32 = arith.constant 0 : i32
    %c0_i32_0 = arith.constant 0 : i32
    %c0_i32_1 = arith.constant 0 : i32
    return %c0_i32, %c0_i32_0 : i32, i32
  }
  func.func @transform_10(%arg0: i32) -> (i32, i32) {
    %c0_i32 = arith.constant 0 : i32
    %c0_i32_0 = arith.constant 0 : i32
    %c0_i32_1 = arith.constant 0 : i32
    return %c0_i32, %c0_i32_0 : i32, i32
  }
  func.func @transform_11(%arg0: i32) -> (i32, i32) {
    %c0_i32 = arith.constant 0 : i32
    %c0_i32_0 = arith.constant 0 : i32
    %c0_i32_1 = arith.constant 0 : i32
    return %c0_i32, %c0_i32_0 : i32, i32
  }
  func.func @transform_12(%arg0: i32) -> (i32, i32) {
    %c0_i32 = arith.constant 0 : i32
    %c0_i32_0 = arith.constant 0 : i32
    %c0_i32_1 = arith.constant 0 : i32
    return %c0_i32, %c0_i32_0 : i32, i32
  }
  func.func @transform_13(%arg0: i32) -> (i32, i32) {
    %c0_i32 = arith.constant 0 : i32
    %c0_i32_0 = arith.constant 0 : i32
    %c0_i32_1 = arith.constant 0 : i32
    return %c0_i32, %c0_i32_0 : i32, i32
  }
  func.func @transform_14(%arg0: i32) -> (i32, i32) {
    %c0_i32 = arith.constant 0 : i32
    %c0_i32_0 = arith.constant 0 : i32
    %c0_i32_1 = arith.constant 0 : i32
    return %c0_i32, %c0_i32_0 : i32, i32
  }
  func.func @transform_15(%arg0: i32) -> (i32, i32) {
    %c0_i32 = arith.constant 0 : i32
    %c0_i32_0 = arith.constant 0 : i32
    %c0_i32_1 = arith.constant 0 : i32
    return %c0_i32, %c0_i32_0 : i32, i32
  }
  func.func @transform_16(%arg0: i32) -> (i32, i32, i32) {
    %c0_i32 = arith.constant 0 : i32
    %c0_i32_0 = arith.constant 0 : i32
    %c0_i32_1 = arith.constant 0 : i32
    return %arg0, %c0_i32, %c0_i32_0 : i32, i32, i32
  }
}

</mosaic_0001>

<bundles_post_ra>
// kernel: lenet_forward.1
= control target key start
LH: loop header
LB: loop body
LE: loop exit
PB: predicated region body
PF: predicated region fallthrough
CT: control target
= control target key end

     0   :  { %s6829_s0 = inlined_call_operand.vmem [shape: bf16[2,136,32], index: 0, kind: input, shape index: {}]   ;;  %s6830_s1 = inlined_call_operand.vmem [shape: bf16[5,32,168], index: 1, kind: input, shape index: {}]   ;;  %s6831_s2 = inlined_call_operand.vmem [shape: bf16[5,84,160], index: 2, kind: input, shape index: {}]   ;;  %s6832_s3 = inlined_call_operand.vmem [shape: bf16[5,80,120], index: 3, kind: input, shape index: {}]   ;;  %s6833_s4 = inlined_call_operand.vmem [shape: bf16[168,84], index: 4, kind: input, shape index: {}]   ;;  %s6834_s5 = inlined_call_operand.vmem [shape: bf16[64,128], index: 5, kind: input, shape index: {}]   ;;  %s6835_s6 = inlined_call_operand.vmem [shape: bf16[160,80], index: 6, kind: input, shape index: {}]   ;;  %s6836_s7 = inlined_call_operand.vmem [shape: bf16[32,64], index: 7, kind: input, shape index: {}]   ;;  %s6837_s8 = inlined_call_operand.vmem [shape: bf16[4,32], index: 8, kind: input, shape index: {}]   ;;  %s6838_s9 = inlined_call_operand.vmem [shape: bf16[120,84], index: 9, kind: input, shape index: {}]   ;;  %s6839_s10 = inlined_call_operand.vmem [shape: bf16[84,128], index: 10, kind: input, shape index: {}]   ;;  %s6840_s11 = inlined_call_operand.vmem [shape: f32[1,168], index: 11, kind: input, shape index: {}]   ;;  %s6841_s12 = inlined_call_operand.vmem [shape: f32[1,160], index: 12, kind: input, shape index: {}]   ;;  %s6842_s13 = inlined_call_operand.vmem [shape: f32[1,120], index: 13, kind: input, shape index: {}]   ;;  %s6843_s14 = inlined_call_operand.vmem [shape: f32[1,84], index: 14, kind: input, shape index: {}]   ;;  %s6844_s15 = inlined_call_operand.vmem [shape: f32[1,128], index: 15, kind: input, shape index: {}]   ;;  %s6845_s16 = inlined_call_operand.hbm [shape: f32[2,4,128], index: 16, kind: output, shape index: {}]  }
   0x1   :  { %6857 = sst [smem:[#allocation42_spill]] %s6829_s0 }
   0x2   :  { %6858 = sst [smem:[#allocation43_spill]] %s6844_s15 }
   0x3   :  { %6859 = sst [smem:[#allocation44_spill]] %s6845_s16 }
   0x4   :  { %21 = vsyncpa [#allocation5], 0 }
   0x5   :  { %23 = vsyncpa [#allocation5 + $0x1], 0  ;;  %s5295_s21 = smov 0   ;;  %s5297_s22 = smov 0  }
   0x6   :  { %s5299_s23 = smov 0   ;;  %s5301_s24 = smov 0  }
   0x7 LB: > { %6860 = sst [smem:[#allocation7_spill]] %s5192_s21  ;;  %s5316_s25 = sadd.s32 4294967295, %s5204_s24   ;;  %s5204_s24 = sphi %s5301_s24, %s6945_s24   ;;  %s5200_s23 = sphi %s5299_s23, %s6950_s23   ;;  %s5196_s22 = sphi %s5297_s22, %s6949_s22   ;;  %s5192_s21 = sphi %s5295_s21, %s6948_s21  }
   0x8   : > { %6861 = sst [smem:[#allocation8_spill]] %s5200_s23  ;;  %s4271_s26 = sadd.s32 4294967294, %s5204_s24  }
   0x9   : > { %6862 = sst [smem:[#allocation9_spill]] %s5204_s24  ;;  %s5320_s27 = sadd.s32 1, %s5204_s24  }
   0xa   : > { %6863 = sst [smem:[#allocation10_spill]] %s5320_s27  ;;  %s377_s28 = sadd.s32 1, %s5200_s23 }
   0xb   : > { %s374_s29 = ssub.s32 %s5204_s24, %s5320_s27  ;;  %p387_p0 = scmp.ne.s32.totalorder %s5200_s23, %s5196_s22 }
   0xc   : > { %p375_p1 = scmp.eq.s32.totalorder %s374_s29, 0  ;;  %p388_p2 = scmp.eq.s32.totalorder %s5316_s25, 1 }
   0xd   : > { %p393_p3 = scmp.ne.s32.totalorder %s5196_s22, %s5192_s21  ;;  %p394_p4 = scmp.eq.s32.totalorder %s4271_s26, 1 }
   0xe   : > { %s5331_s30 = scalar_select %p375_p1, %s5200_s23, %s377_s28  }
   0xf   : > { %p5333_p5 = por %p388_p2, %p387_p0  ;;  %p5337_p6 = por %p394_p4, %p393_p3 }
  0x10   : > { %6864 = sst [smem:[#allocation11_spill]] %s5331_s30  ;;  %p4274_p7 = scmp.ge.s32.totalorder %s5204_s24, 1 }
  0x11   : > { %s6866_s17 = scalar_select %p5337_p6, 1, 0 }
  0x12   : > { %p465_p8 = scmp.lt.s32.totalorder %s5204_s24, 3 }
  0x13   : > { %6867 = sst [smem:[#allocation12_spill]] %s6866_s17 }
  0x14   : > { %p466_p9 = pnand %p4274_p7, %p465_p8 }
  0x16   : > { %469 = sbr.rel (%p466_p9) target bundleno = 2473 (0x9a9), region = 84 }
  0x1b   : > { %v4937_v0 = vld [vmem:[%s6830_s1 + $0x34] ss:$8 sps:$4 sm:$0xff]   ;;  %p515_p10 = scmp.lt.s32.totalorder %s5316_s25, 1  ;;  %v6853_v2 = vmov 0   ;;  %v4941_v3 = vld [vmem:[%s6830_s1 + $0x30] ss:$8 sps:$4 sm:$0xff]  }
  0x1c   : > { %v4939_v1 = vld [vmem:[%s6830_s1 + $0x14] ss:$8 sps:$4 sm:$0xff]   ;;  %736 = vmatprep.mubr.bf16.mxu0 %v6853_v2  ;;  %885 = vmatprep.mubr.bf16.mxu1 %v6853_v2  ;;  %v4942_v4 = vld [vmem:[%s6830_s1 + $0x10] ss:$8 sps:$4 sm:$0xff]   ;;  %v4943_v5 = vld [vmem:[%s6830_s1 + $0x24] ss:$8 sps:$4 sm:$0xff]  }
  0x1d   : > { %716 = vmatprep.subr.bf16.mxu0 %v4937_v0  ;;  %s516_s19 = scalar_select %p515_p10, %s5316_s25, 1  ;;  %865 = vmatprep.subr.bf16.mxu1 %v4939_v1  ;;  %v4945_v6 = vld [vmem:[%s6830_s1 + $0x4] ss:$8 sps:$4 sm:$0xff]   ;;  %v4947_v7 = vld [vmem:[%s6830_s1 + $0x20] ss:$8 sps:$4 sm:$0xff]   ;;  %vm679_vm0 = vcmask 261120  }
  0x1e   : > { %717 = vmatpush1.bf16.msra.mxu0 %v4941_v3  ;;  %866 = vmatpush1.bf16.msra.mxu1 %v4942_v4  ;;  %v4948_v8 = vld [vmem:[%s6830_s1] ss:$8 sps:$4 sm:$0xff]   ;;  %s6868_s27 = sld [smem:[#allocation42_spill]]  ;;  %v4957_v9 = vld [vmem:[%s6830_s1 + $0x54] ss:$8 sps:$4 sm:$0xff]   ;;  %vm975_vm2 = vcmask 1046528  }
  0x1f   : > { %s4894_s28 = smul.u32 68, %s516_s19  ;;  %718 = vmatprep.subr.bf16.mxu0 %v4943_v5  ;;  %867 = vmatprep.subr.bf16.mxu1 %v4945_v6  ;;  %vm590_vm1 = vsmask.f32 7424  ;;  %v4955_v20 = vld [vmem:[%s6830_s1 + $0x50] ss:$8 sps:$4 sm:$0xff]   ;;  %vm1435_vm3 = vcmask 1045504  }
  0x20   : > { %v4961_v28 = vld [vmem:[%s6830_s1 + $0x70] ss:$8 sps:$4 sm:$0xff]   ;;  %v4963_v29 = vld [vmem:[%s6830_s1 + $0x74] ss:$8 sps:$4 sm:$0xff]   ;;  %v4964_v30 = vld [vmem:[%s6830_s1 + $0x40] ss:$8 sps:$4 sm:$0xff]  }
  0x21   : > { %v4966_v31 = vld [vmem:[%s6830_s1 + $0x44] ss:$8 sps:$4 sm:$0xff]   ;;  %v4967_v35 = vld [vmem:[%s6830_s1 + $0x60] ss:$8 sps:$4 sm:$0xff]   ;;  %v4973_v42 = vld [vmem:[%s6830_s1 + $0x94] ss:$8 sps:$4 sm:$0xff]  }
  0x22   : > { %719 = vmatpush1.bf16.msra.mxu0 %v4947_v7  ;;  %868 = vmatpush1.bf16.msra.mxu1 %v4948_v8  ;;  %v4969_v36 = vld [vmem:[%s6830_s1 + $0x64] ss:$8 sps:$4 sm:$0xff]   ;;  %vm1191_vm4 = vsmask.f32 6400  ;;  %vm1851_vm5 = vcmask 1043456   ;;  %vm1826_vm6 = vcmask 326656  }
  0x23   : > { %1049 = vmatprep.subr.bf16.mxu0 %v4957_v9  ;;  %1293 = vmatprep.subr.bf16.mxu1 %v4963_v29  ;;  %vm2250_vm7 = vcmask 1041408   ;;  %vm2081_vm8 = vcmask 683008   ;;  %vm2237_vm9 = vcmask 687104   ;;  %vm3280_vm10 = vcmask 523264   ;;  %s512_s30 = sand.u32 1, %s5196_s22   ;;  %s4657_s15 = sshll.u32 %s5316_s25, 6 }
  0x24   : > { %s5374_s24 = scalar_lea.vmem %s6868_s27, %s4894_s28  ;;  %vm3352_vm11 = vcmask 650240   ;;  %vm3447_vm12 = vcmask 654336   ;;  %vm5208_vm13 = vmmov 0   ;;  %vm4051_vm14 = vcmask 982016   ;;  %s4275_s29 = sshll.u32 %s512_s30, 2 }
  0x25   : > { %v521_v10 = vld [vmem:[%s5374_s24] sm:$0xf]  ;;  %v5381_v11 = vld [vmem:[%s5374_s24 + $0x4] sm:$0xf]  ;;  %v5385_v13 = vld [vmem:[%s5374_s24 + $0x8] sm:$0xff]   ;;  %s6940_s27 = sld [smem:[#allocation43_spill]] }
  0x26   : > { %v4281_v12 = vcombine.low %v521_v10, %v5381_v11  ;;  %v599_v16 = vshll.u32 %v5385_v13, 16  ;;  %v5389_v17 = vld [vmem:[%s5374_s24 + $0x10] sm:$0xff]   ;;  %v603_v22 = vshrl.u32 %v5385_v13, 16  ;;  %v5403_v25 = vld [vmem:[%s5374_s24 + $0x18] sm:$0xff]   ;;  %v977_v37 = vrot.slane %v5385_v13, 1  ;;  %v5438_v40 = vld [vmem:[%s5374_s24 + $0x20] sm:$0xff]  }
  0x27   : > { %v607_v23 = vshll.u32 %v5389_v17, 16  ;;  %v611_v32 = vshrl.u32 %v5389_v17, 16  ;;  %v615_v33 = vshll.u32 %v5403_v25, 16  ;;  %v979_v38 = vrot.slane %v5389_v17, 1  ;;  %v5455_v45 = vld [vmem:[%s5374_s24 + $0x28] sm:$0xff]   ;;  %v5464_v48 = vld [vmem:[%s5374_s24 + $0x30] sm:$0xff]  }
  0x28   : > { %v592_v14 = vshrl.u32 %v4281_v12, 16  ;;  %v594_v15 = vshll.u32 %v4281_v12, 16  ;;  %4306 = vmatmul.mubr.msk.bf16.vlgmr.msra.gmra.mxu1 %vm679_vm0, %v4281_v12  ;;  %v601_v19 = vrot.slane %v599_v16, 1  ;;  %v981_v39 = vrot.slane %v5403_v25, 1  ;;  %v5475_v53 = vld [vmem:[%s5374_s24 + $0x38] sm:$0xff]   ;;  %s514_s16 = scalar_lea.vmem [#allocation4], %s4275_s29 }
  0x29   : > { %895 = vmatprep.mubr.bf16.mxu1 %v6853_v2  ;;  %v609_v27 = vrot.slane %v607_v23, 1  ;;  %1294 = vmatpush1.bf16.msra.mxu1 %v4961_v28  ;;  %v5443_v41 = vsel %vm975_vm2, %v977_v37, %v979_v38  ;;  %v617_v44 = vrot.slane %v615_v33, 1  ;;  %v983_v47 = vrot.slane %v5438_v40, 1  ;;  %v4960_v54 = vld [vmem:[%s5374_s24 + $0x40] ss:$0 sps:$4 sm:$0x11]  }
  0x2a   : > { %v596_v18 = vrot.slane %v594_v15, 1  ;;  %v605_v26 = vor.u32 %v603_v22, %v601_v19  ;;  %1295 = vmatprep.subr.bf16.mxu1 %v4969_v36  ;;  %v5458_v46 = vsel %vm975_vm2, %v979_v38, %v981_v39  ;;  %v619_v49 = vshrl.u32 %v5403_v25, 16  ;;  %v1426_v58 = vld [vmem:[%s5374_s24] sm:$0xc]  ;;  %s4212_s21 = sshll.u32 %s514_s16, 4  ;;  %s6941_s19 = sld [smem:[#allocation44_spill]]  ;;  %s6790_s21 = int_to_ptr.vmem [resolvable:$true] %s4212_s21 }
  0x2b   : > { %v613_v43 = vor.u32 %v611_v32, %v609_v27  ;;  %v5469_v50 = vsel %vm975_vm2, %v981_v39, %v983_v47  ;;  %v985_v51 = vrot.slane %v5455_v45, 1  ;;  %v623_v52 = vshll.u32 %v5438_v40, 16  ;;  %s4199_s26 = scalar_lea.sflag [#allocation5], %s512_s30  ;;  %s5144_s28 = scalar_lea.vmem %s6790_s21, 64 }
  0x2c   : > { %v597_v21 = vor.u32 %v596_v18, %v592_v14  ;;  %v610_v34 = vsel %vm590_vm1, %v605_v26, %v609_v27  ;;  %v987_v55 = vrot.slane %v5464_v48, 1  ;;  %v989_v60 = vrot.slane %v5475_v53, 1  ;;  %v966_v26 = vld [vmem:[%s5374_s24] sm:$0xe]  ;;  %p5145_p11 = scmp.ne.s32.totalorder %s6790_s21, %s5144_s28  ;;  %s5209_s25 = smov [#allocation4]  }
  0x2d   : > { %1296 = vmatpush1.bf16.msra.mxu1 %v4967_v35  ;;  %v618_v56 = vsel %vm590_vm1, %v613_v43, %v617_v44  ;;  %v5481_v57 = vsel %vm975_vm2, %v983_v47, %v985_v51  ;;  %v991_v62 = vrot.slane %v4960_v54, 1  ;;  %v621_v63 = vor.u32 %v619_v49, %v617_v44  ;;  %s5148_s29 = sshll.u32 %s5209_s25, 4  ;;  %s5149_s29 = int_to_ptr.vmem [resolvable:$false] %s5148_s29 }
  0x2e   : > { %v602_v24 = vsel %vm590_vm1, %v597_v21, %v601_v19  ;;  %1855 = vmatprep.subr.bf16.mxu1 %v6853_v2  ;;  %v5485_v59 = vsel %vm975_vm2, %v985_v51, %v987_v55  ;;  %v5490_v61 = vsel %vm975_vm2, %v987_v55, %v989_v60  ;;  %v625_v0 = vrot.slane %v623_v52, 1  ;;  %p5146_p12 = pnand %p5145_p11, %p5333_p5  ;;  %s5150_s18 = scalar_lea.vmem %s5149_s29, 128 }
  0x2f   : > { %4294 = vmatmul.mubr.msk.bf16.vlgmr.msra.gmra.mxu0 %vm679_vm0, %v602_v24  ;;  %v4352_v1 = vcombine.low %v1426_v58, %v5381_v11  ;;  %v627_v3 = vshrl.u32 %v5438_v40, 16  ;;  %v5502_v4 = vsel %vm975_vm2, %v989_v60, %v991_v62  ;;  %v1437_v5 = vrot.slane %v5385_v13, 2  ;;  %p5151_p0 = scmp.lt.s32.totalorder %s6790_s21, %s5149_s29  ;;  %p5152_p1 = scmp.lt.s32.totalorder %s5150_s18, %s5144_s28 }
  0x30   : > { %746 = vmatprep.mubr.bf16.mxu0 %v6853_v2  ;;  %1050 = vmatpush1.bf16.msra.mxu0 %v4955_v20  ;;  %v631_v6 = vshll.u32 %v5455_v45, 16  ;;  %v1439_v8 = vrot.slane %v5389_v17, 2  ;;  %v1441_v9 = vrot.slane %v5403_v25, 2  ;;  %v1443_v10 = vrot.slane %v5438_v40, 2  ;;  %s6788_s20 = scalar_lea.hbm %s6941_s19, %s4657_s15  ;;  %p5147_p13 = pneg %p5146_p12 }
  0x31   : > { %4307 = vmatmul.mubr.msk.bf16.gmra.mxu1 %vm679_vm0, %v5385_v13  ;;  %1051 = vmatprep.subr.bf16.mxu0 %v4966_v31  ;;  %v1436_v7 = vrot.slane %v4352_v1, 2  ;;  %v626_v12 = vsel %vm590_vm1, %v621_v63, %v625_v0  ;;  %v629_v20 = vor.u32 %v627_v3, %v625_v0  ;;  %v1445_v24 = vrot.slane %v5455_v45, 2  ;;  %p5153_p2 = por %p5152_p1, %p5151_p0 }
  0x32   : > { %905 = vmatprep.mubr.bf16.mxu1 %v6853_v2  ;;  %v5515_v15 = vsel %vm1435_vm3, %v1437_v5, %v1439_v8  ;;  %v5518_v18 = vsel %vm1435_vm3, %v1439_v8, %v1441_v9  ;;  %v5521_v19 = vsel %vm1435_vm3, %v1441_v9, %v1443_v10  ;;  %v633_v21 = vrot.slane %v631_v6, 1 }
  0x33   : > { %v5512_v14 = vsel %vm1435_vm3, %v1436_v7, %v1437_v5  ;;  %v5533_v27 = vsel %vm1435_vm3, %v1443_v10, %v1445_v24  ;;  %v635_v29 = vshrl.u32 %v5455_v45, 16  ;;  %v4318_v31 = vcombine.low %v966_v26, %v5381_v11  ;;  %p5154_p3 = pnand %p5153_p2, %p5147_p13 }
  0x34   : > { %1052 = vmatpush1.bf16.msra.mxu0 %v4964_v30  ;;  %v634_v28 = vsel %vm590_vm1, %v629_v20, %v633_v21  ;;  %v639_v30 = vshll.u32 %v5464_v48, 16  ;;  %v655_v38 = vshll.u32 %v4960_v54, 16  ;;  %v1447_v39 = vrot.slane %v5464_v48, 2 }
  0x35   : > { %1509 = vmatprep.subr.bf16.mxu0 %v4973_v42  ;;  %v637_v35 = vor.u32 %v635_v29, %v633_v21  ;;  %v1201_v11 = vrot.slane %v599_v16, 2  ;;  %v1200_v42 = vrot.slane %v603_v22, 1  ;;  %v1193_v43 = vshrl.u32 %v4318_v31, 16  ;;  %v4977_v21 = vld [vmem:[%s6830_s1 + $0x84] ss:$8 sps:$4 sm:$0xff]  }
  0x36   : > { %v641_v36 = vrot.slane %v639_v30, 1  ;;  %v5555_v44 = vsel %vm1435_vm3, %v1445_v24, %v1447_v39  ;;  %v643_v47 = vshrl.u32 %v5464_v48, 16  ;;  %v651_v54 = vshrl.u32 %v5475_v53, 16 }
  0x37   : > { %4295 = vmatmul.mubr.msk.bf16.gmra.mxu0 %vm679_vm0, %v610_v34  ;;  %v647_v34 = vshll.u32 %v5475_v53, 16  ;;  %v1196_v16 = vshll.u32 %v4318_v31, 16  ;;  %v1204_v22 = vrot.slane %v611_v32, 1  ;;  %v1205_v58 = vrot.slane %v607_v23, 2 }
  0x38   : > { %756 = vmatprep.mubr.bf16.mxu0 %v6853_v2  ;;  %v642_v55 = vsel %vm590_vm1, %v637_v35, %v641_v36  ;;  %v1208_v60 = vrot.slane %v619_v49, 1  ;;  %v1209_v62 = vrot.slane %v615_v33, 2  ;;  %v976_v63 = vrot.slane %v4318_v31, 1  ;;  %v5583_v33 = vld [vmem:[%s5374_s24 + $0x40] ss:$0 sps:$4 sm:$0x33]  }
  0x39   : > { %4308 = vmatmul.mubr.msk.bf16.gmra.mxu1 %vm679_vm0, %v5389_v17  ;;  %v649_v51 = vrot.slane %v647_v34, 1  ;;  %v1195_v0 = vrot.slane %v1193_v43, 1  ;;  %v1212_v1 = vrot.slane %v627_v3, 1  ;;  %v645_v32 = vor.u32 %v643_v47, %v641_v36 }
  0x3a   : > { %915 = vmatprep.mubr.bf16.mxu1 %v6853_v2  ;;  %v1198_v5 = vrot.slane %v1196_v16, 2  ;;  %v1449_v17 = vrot.slane %v5475_v53, 2  ;;  %v1213_v3 = vrot.slane %v623_v52, 2  ;;  %v1451_v7 = vrot.slane %v5583_v33, 2  ;;  %v4971_v52 = vld [vmem:[%s6830_s1 + $0x90] ss:$8 sps:$4 sm:$0xff]  }
  0x3b   : > { %v653_v49 = vor.u32 %v651_v54, %v649_v51  ;;  %v1202_v9 = vor.u32 %v1201_v11, %v1200_v42  ;;  %v978_v24 = vsel %vm975_vm2, %v976_v63, %v977_v37  ;;  %v1210_v31 = vor.u32 %v1209_v62, %v1208_v60  ;;  %v4987_v60 = vld [vmem:[%s6833_s4 + $0x50] ss:$0 sps:$4 sm:$0xff]  }
  0x3c   : > { %v5579_v23 = vsel %vm1435_vm3, %v1447_v39, %v1449_v17  ;;  %v1199_v8 = vor.u32 %v1198_v5, %v1195_v0  ;;  %v5596_v10 = vsel %vm1435_vm3, %v1449_v17, %v1451_v7  ;;  %v1214_v37 = vor.u32 %v1213_v3, %v1212_v1  ;;  %v4988_v17 = vld [vmem:[%s6833_s4 + $0x48] sm:$0xff]  }
  0x3d   : > { %v1216_v36 = vrot.slane %v635_v29, 1  ;;  %v1220_v11 = vrot.slane %v643_v47, 1  ;;  %v1221_v29 = vrot.slane %v639_v30, 2  ;;  %v1225_v42 = vrot.slane %v647_v34, 2 }
  0x3e   : > { %v1203_v20 = vsel %vm1191_vm4, %v1199_v8, %v1202_v9  ;;  %v1215_v35 = vsel %vm1191_vm4, %v1210_v31, %v1214_v37  ;;  %v1232_v30 = vshll.u32 %v5583_v33, 16  ;;  %v1853_v1 = vsel %vm1851_vm5, %v4987_v60, 0  ;;  %v4989_v8 = vld [vmem:[%s6833_s4 + $0x40] sm:$0xff]  }
  0x3f   : > { %4296 = vmatmul.mubr.msk.bf16.gmra.mxu0 %vm679_vm0, %v618_v56  ;;  %v657_v56 = vrot.slane %v655_v38, 1  ;;  %v1217_v38 = vrot.slane %v631_v6, 2  ;;  %v1224_v6 = vrot.slane %v651_v54, 1  ;;  %v4986_v54 = vld [vmem:[%s6833_s4] sm:$0xff]  }
  0x40   : > { %766 = vmatprep.mubr.bf16.mxu0 %v6853_v2 }
  0x41   : > { %4309 = vmatmul.mubr.msk.bf16.gmra.mxu1 %vm679_vm0, %v5403_v25  ;;  %v650_v25 = vsel %vm590_vm1, %v645_v32, %v649_v51  ;;  %v1234_v51 = vrot.slane %v1232_v30, 2 }
  0x42   : > { %925 = vmatprep.mubr.bf16.mxu1 %v6853_v2 }
  0x47   : > { %4297 = vmatmul.mubr.msk.bf16.gmra.mxu0 %vm679_vm0, %v626_v12  ;;  %v658_v12 = vsel %vm590_vm1, %v653_v49, %v657_v56 }
  0x48   : > { %776 = vmatprep.mubr.bf16.mxu0 %v6853_v2 }
  0x49   : > { %4310 = vmatmul.mubr.msk.bf16.gmra.mxu1 %vm679_vm0, %v5438_v40  ;;  %v1206_v40 = vor.u32 %v1205_v58, %v1204_v22 }
  0x4a   : > { %935 = vmatprep.mubr.bf16.mxu1 %v6853_v2 }
  0x4b   : > { %v1207_v26 = vsel %vm1191_vm4, %v1202_v9, %v1206_v40  ;;  %v1211_v13 = vsel %vm1191_vm4, %v1206_v40, %v1210_v31 }
  0x4f   : > { %4298 = vmatmul.mubr.msk.bf16.gmra.mxu0 %vm679_vm0, %v634_v28  ;;  %v4975_v28 = vld [vmem:[%s6830_s1 + $0x80] ss:$8 sps:$4 sm:$0xff]  }
  0x50   : > { %786 = vmatprep.mubr.bf16.mxu0 %v6853_v2 }
  0x51   : > { %4311 = vmatmul.mubr.msk.bf16.gmra.mxu1 %vm679_vm0, %v5455_v45  ;;  %v1222_v45 = vor.u32 %v1221_v29, %v1220_v11 }
  0x52   : > { %945 = vmatprep.mubr.bf16.mxu1 %v6853_v2 }
  0x57   : > { %4299 = vmatmul.mubr.msk.bf16.gmra.mxu0 %vm679_vm0, %v642_v55 }
  0x58   : > { %796 = vmatprep.mubr.bf16.mxu0 %v6853_v2 }
  0x59   : > { %4312 = vmatmul.mubr.msk.bf16.gmra.mxu1 %vm679_vm0, %v5464_v48  ;;  %v1226_v48 = vor.u32 %v1225_v42, %v1224_v6 }
  0x5a   : > { %955 = vmatprep.mubr.bf16.mxu1 %v6853_v2 }
  0x5b   : > { %v1227_v43 = vsel %vm1191_vm4, %v1222_v45, %v1226_v48 }
  0x5f   : > { %4300 = vmatmul.mubr.msk.bf16.gmra.mxu0 %vm679_vm0, %v650_v25 }
  0x60   : > { %806 = vmatprep.mubr.bf16.mxu0 %v6853_v2 }
  0x61   : > { %4313 = vmatmul.mubr.msk.bf16.gmra.mxu1 %vm679_vm0, %v5475_v53 }
  0x62   : > { %1313 = vmatprep.mubr.bf16.mxu1 %v6853_v2 }
  0x67   : > { %4301 = vmatmul.mubr.msk.bf16.gmra.mxu0 %vm679_vm0, %v658_v12 }
  0x68   : > { %1069 = vmatprep.mubr.bf16.mxu0 %v6853_v2 }
  0x69   : > { %4340 = vmatmul.mubr.msk.bf16.vlgmr.msra.gmra.mxu1 %vm679_vm0, %v1203_v20 }
  0x6a   : > { %1323 = vmatprep.mubr.bf16.mxu1 %v6853_v2 }
  0x6f   : > { %4323 = vmatmul.mubr.msk.bf16.vlgmr.msra.gmra.mxu0 %vm679_vm0, %v978_v24 }
  0x70   : > { %1079 = vmatprep.mubr.bf16.mxu0 %v6853_v2  ;;  %1510 = vmatpush1.bf16.msra.mxu0 %v4971_v52 }
  0x71   : > { %4341 = vmatmul.mubr.msk.bf16.gmra.mxu1 %vm679_vm0, %v1207_v26  ;;  %1511 = vmatprep.subr.bf16.mxu0 %v4977_v21 }
  0x72   : > { %1333 = vmatprep.mubr.bf16.mxu1 %v6853_v2 }
  0x74   : > { %1512 = vmatpush1.bf16.msra.mxu0 %v4975_v28 }
  0x77   : > { %4324 = vmatmul.mubr.msk.bf16.gmra.mxu0 %vm679_vm0, %v5443_v41  ;;  %v1218_v41 = vor.u32 %v1217_v38, %v1216_v36 }
  0x78   : > { %1089 = vmatprep.mubr.bf16.mxu0 %v6853_v2 }
  0x79   : > { %4342 = vmatmul.mubr.msk.bf16.gmra.mxu1 %vm679_vm0, %v1211_v13  ;;  %v1219_v39 = vsel %vm1191_vm4, %v1214_v37, %v1218_v41 }
  0x7a   : > { %1343 = vmatprep.mubr.bf16.mxu1 %v6853_v2 }
  0x7f   : > { %4325 = vmatmul.mubr.msk.bf16.gmra.mxu0 %vm679_vm0, %v5458_v46  ;;  %v1223_v46 = vsel %vm1191_vm4, %v1218_v41, %v1222_v45 }
  0x80   : > { %1099 = vmatprep.mubr.bf16.mxu0 %v6853_v2 }
  0x81   : > { %4343 = vmatmul.mubr.msk.bf16.gmra.mxu1 %vm679_vm0, %v1215_v35 }
  0x82   : > { %1353 = vmatprep.mubr.bf16.mxu1 %v6853_v2 }
  0x87   : > { %4326 = vmatmul.mubr.msk.bf16.gmra.mxu0 %vm679_vm0, %v5469_v50  ;;  %v1229_v50 = vshrl.u32 %v5583_v33, 16 }
  0x88   : > { %1109 = vmatprep.mubr.bf16.mxu0 %v6853_v2 }
  0x89   : > { %4344 = vmatmul.mubr.msk.bf16.gmra.mxu1 %vm679_vm0, %v1219_v39  ;;  %v1231_v47 = vrot.slane %v1229_v50, 1 }
  0x8a   : > { %1363 = vmatprep.mubr.bf16.mxu1 %v6853_v2 }
  0x8b   : > { %v1235_v53 = vor.u32 %v1234_v51, %v1231_v47 }
  0x8f   : > { %4327 = vmatmul.mubr.msk.bf16.gmra.mxu0 %vm679_vm0, %v5481_v57  ;;  %v1236_v57 = vsel %vm1191_vm4, %v1226_v48, %v1235_v53 }
  0x90   : > { %1119 = vmatprep.mubr.bf16.mxu0 %v6853_v2 }
  0x91   : > { %4345 = vmatmul.mubr.msk.bf16.gmra.mxu1 %vm679_vm0, %v1223_v46 }
  0x92   : > { %1373 = vmatprep.mubr.bf16.mxu1 %v6853_v2 }
  0x97   : > { %4328 = vmatmul.mubr.msk.bf16.gmra.mxu0 %vm679_vm0, %v5485_v59  ;;  %v4979_v59 = vld [vmem:[%s6833_s4 + $0x38] sm:$0xff]  }
  0x98   : > { %1129 = vmatprep.mubr.bf16.mxu0 %v6853_v2  ;;  %1856 = vmatpush1.bf16.msra.mxu1 %v4979_v59 }
  0x99   : > { %4346 = vmatmul.mubr.msk.bf16.gmra.mxu1 %vm679_vm0, %v1227_v43  ;;  %1857 = vmatprep.subr.bf16.mxu1 %v6853_v2 }
  0x9a   : > { %1383 = vmatprep.mubr.bf16.mxu1 %v6853_v2 }
  0x9f   : > { %4329 = vmatmul.mubr.msk.bf16.gmra.mxu0 %vm679_vm0, %v5490_v61  ;;  %v4980_v61 = vld [vmem:[%s6833_s4 + $0x30] sm:$0xff]  }
  0xa0   : > { %1139 = vmatprep.mubr.bf16.mxu0 %v6853_v2  ;;  %1858 = vmatpush1.bf16.msra.mxu1 %v4980_v61 }
  0xa1   : > { %4347 = vmatmul.mubr.msk.bf16.gmra.mxu1 %vm679_vm0, %v1236_v57  ;;  %1859 = vmatprep.subr.bf16.mxu1 %v6853_v2 }
  0xa7   : > { %4330 = vmatmul.mubr.msk.bf16.gmra.mxu0 %vm679_vm0, %v5502_v4  ;;  %v4981_v4 = vld [vmem:[%s6833_s4 + $0x28] sm:$0xff]  }
  0xa8   : > { %1529 = vmatprep.mubr.bf16.mxu0 %v6853_v2  ;;  %1860 = vmatpush1.bf16.msra.mxu1 %v4981_v4 }
  0xa9   : > { %1861 = vmatprep.subr.bf16.mxu1 %v6853_v2 }
  0xaf   : > { %4357 = vmatmul.mubr.msk.bf16.vlgmr.msra.gmra.mxu0 %vm679_vm0, %v5512_v14  ;;  %v4982_v14 = vld [vmem:[%s6833_s4 + $0x20] sm:$0xff]  }
  0xb0   : > { %1539 = vmatprep.mubr.bf16.mxu0 %v6853_v2  ;;  %1862 = vmatpush1.bf16.msra.mxu1 %v4982_v14 }
  0xb1   : > { %1863 = vmatprep.subr.bf16.mxu1 %v6853_v2 }
  0xb7   : > { %4358 = vmatmul.mubr.msk.bf16.gmra.mxu0 %vm679_vm0, %v5515_v15  ;;  %v4983_v15 = vld [vmem:[%s6833_s4 + $0x18] sm:$0xff]  }
  0xb8   : > { %1549 = vmatprep.mubr.bf16.mxu0 %v6853_v2  ;;  %1864 = vmatpush1.bf16.msra.mxu1 %v4983_v15 }
  0xb9   : > { %1865 = vmatprep.subr.bf16.mxu1 %v6853_v2 }
  0xbf   : > { %4359 = vmatmul.mubr.msk.bf16.gmra.mxu0 %vm679_vm0, %v5518_v18  ;;  %v4984_v18 = vld [vmem:[%s6833_s4 + $0x10] sm:$0xff]  }
  0xc0   : > { %1559 = vmatprep.mubr.bf16.mxu0 %v6853_v2  ;;  %1866 = vmatpush1.bf16.msra.mxu1 %v4984_v18 }
  0xc1   : > { %1867 = vmatprep.subr.bf16.mxu1 %v6853_v2 }
  0xc7   : > { %4360 = vmatmul.mubr.msk.bf16.gmra.mxu0 %vm679_vm0, %v5521_v19 }
  0xc8   : > { %1569 = vmatprep.mubr.bf16.mxu0 %v6853_v2 }
  0xcf   : > { %4361 = vmatmul.mubr.msk.bf16.gmra.mxu0 %vm679_vm0, %v5533_v27  ;;  %v4985_v27 = vld [vmem:[%s6833_s4 + $0x8] sm:$0xff]  }
  0xd0   : > { %1579 = vmatprep.mubr.bf16.mxu0 %v6853_v2  ;;  %1868 = vmatpush1.bf16.msra.mxu1 %v4985_v27 }
  0xd1   : > { %1869 = vmatprep.subr.bf16.mxu1 %v6853_v2 }
  0xd4   : > { %1870 = vmatpush1.bf16.msra.mxu1 %v4986_v54 }
  0xd5   : > { %1881 = vmatprep.subr.bf16.mxu1 %v6853_v2 }
  0xd7   : > { %4362 = vmatmul.mubr.msk.bf16.gmra.mxu0 %vm679_vm0, %v5555_v44 }
  0xd8   : > { %1589 = vmatprep.mubr.bf16.mxu0 %v6853_v2  ;;  %1882 = vmatpush2.bf16.msra.mxu1 %v1853_v1 }
  0xd9   : > { %1883 = vmatprep.subr.bf16.mxu1 %v6853_v2 }
  0xdc   : > { %1884 = vmatpush2.bf16.msra.mxu1 %v4988_v17 }
  0xdd   : > { %1885 = vmatprep.subr.bf16.mxu1 %v6853_v2 }
  0xdf   : > { %4363 = vmatmul.mubr.msk.bf16.gmra.mxu0 %vm679_vm0, %v5579_v23 }
  0xe0   : > { %1599 = vmatprep.mubr.bf16.mxu0 %v6853_v2  ;;  %1886 = vmatpush2.bf16.msra.mxu1 %v4989_v8 }
  0xe7   : > { %4364 = vmatmul.mubr.msk.bf16.gmra.mxu0 %vm679_vm0, %v5596_v10 }
  0xe8   : > { %v887_v19 = vpop.f32.mrf.mxu1 }
  0xea   : > { %v889_v34 = vpop.f32.mrf.mxu1 }
  0xec   : > { %v5723_v44 = vpop.f32.mrf.mxu1 }
  0xee   : > { %v5729_v56 = vpop.f32.mrf.mxu1 }
  0xef   : > { %v738_v55 = vpop.f32.mrf.mxu0 }
  0xf0   : > { %v5731_v16 = vadd.f32 %v887_v19, %v738_v55 }
  0xf1   : > { %v740_v22 = vpop.f32.mrf.mxu0  ;;  %v897_v58 = vpop.f32.mrf.mxu1 }
  0xf2   : > { %v5737_v62 = vadd.f32 %v889_v34, %v740_v22 }
  0xf3   : > { %v5739_v63 = vpop.f32.mrf.mxu0  ;;  %v899_v0 = vpop.f32.mrf.mxu1 }
  0xf5   : > { %v5742_v32 = vpop.f32.mrf.mxu0  ;;  %v5744_v5 = vpop.f32.mrf.mxu1 }
  0xf7   : > { %v748_v23 = vpop.f32.mrf.mxu0  ;;  %v5750_v25 = vpop.f32.mrf.mxu1 }
  0xf8   : > { %v5752_v33 = vadd.f32 %v897_v58, %v748_v23 }
  0xf9   : > { %v750_v49 = vpop.f32.mrf.mxu0  ;;  %v907_v3 = vpop.f32.mrf.mxu1 }
  0xfa   : > { %v5755_v7 = vadd.f32 %v899_v0, %v750_v49 }
  0xfb   : > { %v5760_v9 = vpop.f32.mrf.mxu0  ;;  %v909_v10 = vpop.f32.mrf.mxu1 }
  0xfd   : > { %v5762_v12 = vpop.f32.mrf.mxu0  ;;  %v5764_v20 = vpop.f32.mrf.mxu1 }
  0xff   : > { %v758_v40 = vpop.f32.mrf.mxu0  ;;  %v5766_v52 = vpop.f32.mrf.mxu1 }
 0x100   : > { %v5768_v21 = vadd.f32 %v907_v3, %v758_v40 }
 0x101   : > { %v760_v24 = vpop.f32.mrf.mxu0  ;;  %v917_v26 = vpop.f32.mrf.mxu1 }
 0x102   : > { %v5770_v28 = vadd.f32 %v909_v10, %v760_v24 }
 0x103   : > { %v5772_v31 = vpop.f32.mrf.mxu0  ;;  %v919_v13 = vpop.f32.mrf.mxu1 }
 0x105   : > { %v5774_v37 = vpop.f32.mrf.mxu0  ;;  %v5776_v35 = vpop.f32.mrf.mxu1 }
 0x107   : > { %v768_v36 = vpop.f32.mrf.mxu0  ;;  %v5778_v38 = vpop.f32.mrf.mxu1 }
 0x108   : > { %v5780_v41 = vadd.f32 %v917_v26, %v768_v36 }
 0x109   : > { %v770_v39 = vpop.f32.mrf.mxu0  ;;  %v927_v11 = vpop.f32.mrf.mxu1 }
 0x10a   : > { %v5782_v29 = vadd.f32 %v919_v13, %v770_v39 }
 0x10b   : > { %v5784_v45 = vpop.f32.mrf.mxu0  ;;  %v929_v46 = vpop.f32.mrf.mxu1 }
 0x10d   : > { %v5786_v6 = vpop.f32.mrf.mxu0  ;;  %v5788_v42 = vpop.f32.mrf.mxu1 }
 0x10f   : > { %v778_v48 = vpop.f32.mrf.mxu0  ;;  %v5790_v50 = vpop.f32.mrf.mxu1 }
 0x110   : > { %6869 = vst [vmem:[#allocation13_spill] sm:$0xff] %v5790_v50  ;;  %v5792_v30 = vadd.f32 %v927_v11, %v778_v48 }
 0x111   : > { %v780_v43 = vpop.f32.mrf.mxu0  ;;  %v937_v47 = vpop.f32.mrf.mxu1 }
 0x112   : > { %v5794_v51 = vadd.f32 %v929_v46, %v780_v43 }
 0x113   : > { %v5796_v53 = vpop.f32.mrf.mxu0  ;;  %v939_v57 = vpop.f32.mrf.mxu1 }
 0x115   : > { %v5798_v59 = vpop.f32.mrf.mxu0  ;;  %v5800_v61 = vpop.f32.mrf.mxu1 }
 0x116   : > { %6870 = vst [vmem:[#allocation14_spill] sm:$0xff] %v5800_v61 }
 0x117   : > { %v788_v4 = vpop.f32.mrf.mxu0  ;;  %v5802_v14 = vpop.f32.mrf.mxu1 }
 0x118   : > { %6871 = vst [vmem:[#allocation15_spill] sm:$0xff] %v5802_v14  ;;  %v5804_v15 = vadd.f32 %v937_v47, %v788_v4 }
 0x119   : > { %v790_v18 = vpop.f32.mrf.mxu0  ;;  %v947_v19 = vpop.f32.mrf.mxu1 }
 0x11a   : > { %v5806_v27 = vadd.f32 %v939_v57, %v790_v18 }
 0x11b   : > { %v5808_v34 = vpop.f32.mrf.mxu0  ;;  %v949_v54 = vpop.f32.mrf.mxu1 }
 0x11c   : > { %6872 = vst [vmem:[#allocation16_spill] sm:$0xff] %v5808_v34 }
 0x11d   : > { %v5810_v55 = vpop.f32.mrf.mxu0  ;;  %v5812_v22 = vpop.f32.mrf.mxu1 }
 0x11e   : > { %6873 = vst [vmem:[#allocation17_spill] sm:$0xff] %v5810_v55  ;;  %6874 = vst [vmem:[#allocation18_spill] sm:$0xff] %v5812_v22 }
 0x11f   : > { %v798_v58 = vpop.f32.mrf.mxu0  ;;  %v5814_v60 = vpop.f32.mrf.mxu1 }
 0x120   : > { %6875 = vst [vmem:[#allocation19_spill] sm:$0xff] %v5814_v60  ;;  %v5816_v0 = vadd.f32 %v947_v19, %v798_v58 }
 0x121   : > { %v800_v1 = vpop.f32.mrf.mxu0  ;;  %v957_v17 = vpop.f32.mrf.mxu1 }
 0x122   : > { %v5818_v23 = vadd.f32 %v949_v54, %v800_v1 }
 0x123   : > { %v5820_v49 = vpop.f32.mrf.mxu0  ;;  %v959_v3 = vpop.f32.mrf.mxu1 }
 0x124   : > { %6876 = vst [vmem:[#allocation20_spill] sm:$0xff] %v5820_v49 }
 0x125   : > { %v5822_v8 = vpop.f32.mrf.mxu0  ;;  %v5824_v40 = vpop.f32.mrf.mxu1 }
 0x126   : > { %6877 = vst [vmem:[#allocation21_spill] sm:$0xff] %v5822_v8  ;;  %6878 = vst [vmem:[#allocation22_spill] sm:$0xff] %v5824_v40 }
 0x127   : > { %v808_v10 = vpop.f32.mrf.mxu0  ;;  %v5832_v39 = vpop.f32.mrf.mxu1 }
 0x128   : > { %v5826_v24 = vadd.f32 %v957_v17, %v808_v10  ;;  %6880 = vst [vmem:[#allocation24_spill] sm:$0xff] %v5832_v39 }
 0x129   : > { %v810_v26 = vpop.f32.mrf.mxu0  ;;  %v5836_v46 = vpop.f32.mrf.mxu1 }
 0x12a   : > { %v5828_v13 = vadd.f32 %v959_v3, %v810_v26 }
 0x12b   : > { %v5830_v36 = vpop.f32.mrf.mxu0  ;;  %v5841_v57 = vpop.f32.mrf.mxu1 }
 0x12c   : > { %6879 = vst [vmem:[#allocation23_spill] sm:$0xff] %v5830_v36 }
 0x12d   : > { %v5834_v11 = vpop.f32.mrf.mxu0  ;;  %v5850_v54 = vpop.f32.mrf.mxu1 }
 0x12e   : > { %6881 = vst [vmem:[#allocation25_spill] sm:$0xff] %v5834_v11 }
 0x12f   : > { %v1071_v48 = vpop.f32.mrf.mxu0  ;;  %v5855_v17 = vpop.f32.mrf.mxu1 }
 0x130   : > { %v5839_v43 = vadd.f32 %v1071_v48, %v5731_v16 }
 0x131   : > { %v1073_v47 = vpop.f32.mrf.mxu0 }
 0x132   : > { %v5844_v4 = vadd.f32 %v1073_v47, %v5737_v62  ;;  %v5862_v62 = vpop.f32.mrf.mxu1 }
 0x133   : > { %v5846_v18 = vpop.f32.mrf.mxu0 }
 0x134   : > { %v5869_v2 = vpop.f32.mrf.mxu1 }
 0x135   : > { %v5848_v19 = vpop.f32.mrf.mxu0 }
 0x137   : > { %v1081_v58 = vpop.f32.mrf.mxu0 }
 0x138   : > { %v5853_v1 = vadd.f32 %v1081_v58, %v5752_v33 }
 0x139   : > { %v1083_v16 = vpop.f32.mrf.mxu0 }
 0x13a   : > { %v5858_v3 = vadd.f32 %v1083_v16, %v5755_v7  ;;  %v5876_v7 = vpop.f32.mrf.mxu1 }
 0x13b   : > { %v5860_v10 = vpop.f32.mrf.mxu0 }
 0x13c   : > { %v5883_v36 = vpop.f32.mrf.mxu1 }
 0x13d   : > { %v5864_v26 = vpop.f32.mrf.mxu0 }
 0x13f   : > { %v1091_v48 = vpop.f32.mrf.mxu0 }
 0x140   : > { %v5867_v47 = vadd.f32 %v1091_v48, %v5768_v21 }
 0x141   : > { %v1093_v33 = vpop.f32.mrf.mxu0 }
 0x142   : > { %v5872_v58 = vadd.f32 %v1093_v33, %v5770_v28  ;;  %v5890_v28 = vpop.f32.mrf.mxu1 }
 0x143   : > { %v5874_v39 = vpop.f32.mrf.mxu0 }
 0x144   : > { %v5897_v49 = vpop.f32.mrf.mxu1 }
 0x145   : > { %v5878_v16 = vpop.f32.mrf.mxu0 }
 0x147   : > { %v1101_v11 = vpop.f32.mrf.mxu0 }
 0x148   : > { %v5881_v40 = vadd.f32 %v1101_v11, %v5780_v41 }
 0x149   : > { %v1103_v21 = vpop.f32.mrf.mxu0 }
 0x14a   : > { %v5886_v48 = vadd.f32 %v1103_v21, %v5782_v29  ;;  %v5904_v29 = vpop.f32.mrf.mxu1 }
 0x14b   : > { %v5888_v60 = vpop.f32.mrf.mxu0 }
 0x14c   : > { %v5911_v34 = vpop.f32.mrf.mxu1 }
 0x14d   : > { %v5892_v33 = vpop.f32.mrf.mxu0 }
 0x14f   : > { %v1111_v8 = vpop.f32.mrf.mxu0 }
 0x150   : > { %v5895_v22 = vadd.f32 %v1111_v8, %v5792_v30 }
 0x151   : > { %v1113_v41 = vpop.f32.mrf.mxu0 }
 0x152   : > { %6882 = vst [vmem:[#allocation26_spill] sm:$0xff] %v5895_v22  ;;  %v5900_v11 = vadd.f32 %v1113_v41, %v5794_v51  ;;  %v5918_v51 = vpop.f32.mrf.mxu1 }
 0x153   : > { %v5902_v14 = vpop.f32.mrf.mxu0 }
 0x154   : > { %6883 = vst [vmem:[#allocation27_spill] sm:$0xff] %v5900_v11  ;;  %6884 = vst [vmem:[#allocation28_spill] sm:$0xff] %v5902_v14 }
 0x155   : > { %v5906_v21 = vpop.f32.mrf.mxu0 }
 0x156   : > { %6885 = vst [vmem:[#allocation29_spill] sm:$0xff] %v5906_v21  ;;  %v5925_v21 = vpop.f32.mrf.mxu1 }
 0x157   : > { %v1121_v55 = vpop.f32.mrf.mxu0 }
 0x158   : > { %v5909_v61 = vadd.f32 %v1121_v55, %v5804_v15 }
 0x159   : > { %v1123_v30 = vpop.f32.mrf.mxu0 }
 0x15a   : > { %6886 = vst [vmem:[#allocation30_spill] sm:$0xff] %v5909_v61  ;;  %v5914_v8 = vadd.f32 %v1123_v30, %v5806_v27  ;;  %v1644_v27 = vlaneseq  ;;  %v5932_v30 = vpop.f32.mrf.mxu1 }
 0x15b   : > { %v5916_v22 = vpop.f32.mrf.mxu0 }
 0x15c   : > { %6887 = vst [vmem:[#allocation31_spill] sm:$0xff] %v5914_v8  ;;  %6888 = vst [vmem:[#allocation32_spill] sm:$0xff] %v5916_v22  ;;  %v5939_v50 = vshrl.u32 %v1644_v27, 7 }
 0x15d   : > { %v5920_v41 = vpop.f32.mrf.mxu0 }
 0x15e   : > { %6889 = vst [vmem:[#allocation33_spill] sm:$0xff] %v5920_v41 }
 0x15f   : > { %v1131_v11 = vpop.f32.mrf.mxu0 }
 0x160   : > { %v5923_v14 = vadd.f32 %v1131_v11, %v5816_v0  ;;  %v5941_v0 = vpop.f32.mrf.mxu1 }
 0x161   : > { %v1133_v15 = vpop.f32.mrf.mxu0 }
 0x162   : > { %6890 = vst [vmem:[#allocation34_spill] sm:$0xff] %v5923_v14  ;;  %v5928_v55 = vadd.f32 %v1133_v15, %v5818_v23  ;;  %v892_v15 = vadd.f32 %v5723_v44, %v5739_v63  ;;  %v6855_v44 = vsub.s32 1, %v5939_v50 }
 0x163   : > { %v5930_v61 = vpop.f32.mrf.mxu0 }
 0x164   : > { %6891 = vst [vmem:[#allocation35_spill] sm:$0xff] %v5928_v55  ;;  %6892 = vst [vmem:[#allocation36_spill] sm:$0xff] %v5930_v61  ;;  %v1152_v27 = vadd.f32 %v5846_v18, %v892_v15  ;;  %v904_v15 = vadd.f32 %v5750_v25, %v5762_v12 }
 0x165   : > { %v5934_v8 = vpop.f32.mrf.mxu0 }
 0x166   : > { %6893 = vst [vmem:[#allocation37_spill] sm:$0xff] %v5934_v8  ;;  %v5951_v8 = vpop.f32.mrf.mxu1 }
 0x167   : > { %v1141_v22 = vpop.f32.mrf.mxu0 }
 0x168   : > { %v5937_v41 = vadd.f32 %v1141_v22, %v5826_v24  ;;  %v1642_v22 = vld [vmem:[%s6840_s11] sm:$0x3]  ;;  %v894_v24 = vadd.f32 %v5729_v56, %v5742_v32  ;;  %v1396_v32 = vadd.f32 %v5850_v54, %v1152_v27 }
 0x169   : > { %v1143_v11 = vpop.f32.mrf.mxu0 }
 0x16a   : > { %6894 = vst [vmem:[#allocation38_spill] sm:$0xff] %v5937_v41  ;;  %v5944_v14 = vadd.f32 %v1143_v11, %v5828_v13  ;;  %v1394_v13 = vadd.f32 %v5836_v46, %v5839_v43  ;;  %v1395_v11 = vadd.f32 %v5841_v57, %v5844_v4  ;;  %v1153_v55 = vadd.f32 %v5848_v19, %v894_v24 }
 0x16b   : > { %v5946_v23 = vpop.f32.mrf.mxu0  ;;  %v5976_v43 = vrot.slane %v1642_v22, %v6855_v44  ;;  %v902_v57 = vadd.f32 %v5744_v5, %v5760_v9 }
 0x16c   : > { %6895 = vst [vmem:[#allocation39_spill] sm:$0xff] %v5944_v14  ;;  %6896 = vst [vmem:[#allocation40_spill] sm:$0xff] %v5946_v23  ;;  %v6898_v14 = vsub.s32 0, %v5939_v50  ;;  %v5971_v23 = vpop.f32.mrf.mxu1  ;;  %v1397_v18 = vadd.f32 %v5855_v17, %v1153_v55  ;;  %v1157_v17 = vadd.f32 %v5864_v26, %v904_v15 }
 0x16d   : > { %v5953_v61 = vpop.f32.mrf.mxu0  ;;  %v1156_v24 = vadd.f32 %v5860_v10, %v902_v57 }
 0x16e   : > { %6897 = vst [vmem:[#allocation41_spill] sm:$0xff] %v5953_v61  ;;  %v5969_v41 = vrot.slane %v1642_v22, %v6898_v14  ;;  %v5985_v54 = vpop.f32.mrf.mxu1  ;;  %v1398_v22 = vadd.f32 %v5862_v62, %v5853_v1  ;;  %v1401_v26 = vadd.f32 %v5883_v36, %v1157_v17 }
 0x16f   : > { %v1531_v63 = vpop.f32.mrf.mxu0 }
 0x170   : > { %v1610_v61 = vadd.f32 %v1531_v63, %v1394_v13 }
 0x171   : > { %v1533_v56 = vpop.f32.mrf.mxu0 }
 0x172   : > { %v1611_v46 = vadd.f32 %v1533_v56, %v1395_v11  ;;  %v1654_v19 = vadd.f32 %v5969_v41, %v1610_v61  ;;  %v1399_v61 = vadd.f32 %v5869_v2, %v5858_v3  ;;  %v1400_v11 = vadd.f32 %v5876_v7, %v1156_v24  ;;  %v5996_v56 = vpop.f32.mrf.mxu1 }
 0x173   : > { %v1535_v4 = vpop.f32.mrf.mxu0  ;;  %v912_v2 = vadd.f32 %v5764_v20, %v5772_v31  ;;  %v914_v7 = vadd.f32 %v5766_v52, %v5774_v37 }
 0x174   : > { %v1612_v14 = vadd.f32 %v1535_v4, %v1396_v32  ;;  %v1655_v27 = vadd.f32 %v5976_v43, %v1611_v46  ;;  %v1686_v25 = vmax.f32 %v1654_v19, 0.0  ;;  %v6005_v15 = vpop.f32.mrf.mxu1 }
 0x175   : > { %v1537_v13 = vpop.f32.mrf.mxu0  ;;  %v1161_v52 = vadd.f32 %v5878_v16, %v914_v7 }
 0x176   : > { %v1656_v5 = vadd.f32 %v5969_v41, %v1612_v14  ;;  %v1613_v9 = vadd.f32 %v1537_v13, %v1397_v18  ;;  %v1687_v62 = vmax.f32 %v1655_v27, 0.0  ;;  %v1160_v14 = vadd.f32 %v5874_v39, %v912_v2 }
 0x177   : > { %v1541_v55 = vpop.f32.mrf.mxu0  ;;  %v1402_v13 = vadd.f32 %v5890_v28, %v5867_v47  ;;  %v6017_v28 = vpop.f32.mrf.mxu1  ;;  %v1405_v16 = vadd.f32 %v5911_v34, %v1161_v52 }
 0x178   : > { %v1688_v12 = vmax.f32 %v1656_v5, 0.0  ;;  %v1657_v10 = vadd.f32 %v5976_v43, %v1613_v9  ;;  %v1614_v63 = vadd.f32 %v1541_v55, %v1398_v22  ;;  %v1403_v22 = vadd.f32 %v5897_v49, %v5872_v58 }
 0x179   : > { %v1543_v1 = vpop.f32.mrf.mxu0  ;;  %v1404_v47 = vadd.f32 %v5904_v29, %v1160_v14  ;;  %v922_v49 = vadd.f32 %v5776_v35, %v5784_v45  ;;  %v924_v29 = vadd.f32 %v5778_v38, %v5786_v6 }
 0x17a   : > { %v1726_v32 = vpack.c.bf16 %v1688_v12, %v1686_v25  ;;  %v1689_v46 = vmax.f32 %v1657_v10, 0.0  ;;  %v1615_v57 = vadd.f32 %v1543_v1, %v1399_v61  ;;  %v1658_v18 = vadd.f32 %v5969_v41, %v1614_v63 }
 0x17b   : > { %v1545_v3 = vpop.f32.mrf.mxu0  ;;  %v1164_v1 = vadd.f32 %v5888_v60, %v922_v49  ;;  %v1165_v38 = vadd.f32 %v5892_v33, %v924_v29  ;;  %v6904_v29 = vld [vmem:[#allocation16_spill] sm:$0xff] }
 0x17c   : > { %v1727_v4 = vpack.c.bf16 %v1689_v46, %v1687_v62  ;;  %v1616_v19 = vadd.f32 %v1545_v3, %v1400_v11  ;;  %v1659_v20 = vadd.f32 %v5976_v43, %v1615_v57  ;;  %v1690_v39 = vmax.f32 %v1658_v18, 0.0  ;;  %v6026_v62 = vpop.f32.mrf.mxu1 }
 0x17d   : > { %v1547_v24 = vpop.f32.mrf.mxu0  ;;  %v1406_v46 = vadd.f32 %v5918_v51, %v5881_v40  ;;  %v1407_v57 = vadd.f32 %v5925_v21, %v5886_v48  ;;  %v1408_v40 = vadd.f32 %v5932_v30, %v1164_v1  ;;  %v932_v48 = vadd.f32 %v5788_v42, %v5796_v53  ;;  %v6905_v1 = vld [vmem:[#allocation14_spill] sm:$0xff] }
 0x17e   : > { %v1660_v31 = vadd.f32 %v5969_v41, %v1616_v19  ;;  %v1617_v36 = vadd.f32 %v1547_v24, %v1401_v26  ;;  %4376 = vmatprep.mubr.msk.bf16.mxu1 %vm1826_vm6, %v1727_v4  ;;  %v1691_v17 = vmax.f32 %v1659_v20, 0.0  ;;  %v6038_v51 = vpop.f32.mrf.mxu1  ;;  %v1409_v21 = vadd.f32 %v5941_v0, %v1165_v38  ;;  %v6902_v0 = vld [vmem:[#allocation27_spill] sm:$0xff] }
 0x17f   : > { %v1551_v37 = vpop.f32.mrf.mxu0  ;;  %1888 = vmatmul.mubr.bf16.vlgmr.msra.gmra.mxu1 %v1726_v32  ;;  %v6907_v38 = vld [vmem:[#allocation15_spill] sm:$0xff] }
 0x180   : > { %v1692_v27 = vmax.f32 %v1660_v31, 0.0  ;;  %v1661_v5 = vadd.f32 %v5976_v43, %v1617_v36  ;;  %v1618_v9 = vadd.f32 %v1551_v37, %v1402_v13  ;;  %v6899_v31 = vld [vmem:[#allocation13_spill] sm:$0xff]  ;;  %v6900_v36 = vld [vmem:[#allocation28_spill] sm:$0xff]  ;;  %v1375_v52 = vpop.f32.mrf.mxu1 }
 0x181   : > { %v1553_v61 = vpop.f32.mrf.mxu0  ;;  %v934_v30 = vadd.f32 %v6899_v31, %v5798_v59 }
 0x182   : > { %v1693_v55 = vmax.f32 %v1661_v5, 0.0  ;;  %v1619_v25 = vadd.f32 %v1553_v61, %v1403_v22  ;;  %v1728_v12 = vpack.c.bf16 %v1692_v27, %v1690_v39  ;;  %v1662_v63 = vadd.f32 %v5969_v41, %v1618_v9  ;;  %v6901_v39 = vld [vmem:[#allocation26_spill] sm:$0xff]  ;;  %v1377_v49 = vpop.f32.mrf.mxu1 }
 0x183   : > { %v1555_v58 = vpop.f32.mrf.mxu0  ;;  %v1168_v22 = vadd.f32 %v6900_v36, %v932_v48  ;;  %v1410_v27 = vadd.f32 %v5951_v8, %v6901_v39  ;;  %v1411_v9 = vadd.f32 %v5971_v23, %v6902_v0  ;;  %v942_v23 = vadd.f32 %v6905_v1, %v6904_v29  ;;  %v6919_v29 = vld [vmem:[#allocation37_spill] sm:$0xff] }
 0x184   : > { %v1729_v10 = vpack.c.bf16 %v1693_v55, %v1691_v17  ;;  %v1620_v11 = vadd.f32 %v1555_v58, %v1404_v47  ;;  %v1663_v35 = vadd.f32 %v5976_v43, %v1619_v25  ;;  %v1694_v60 = vmax.f32 %v1662_v63, 0.0  ;;  %v6903_v47 = vld [vmem:[#allocation29_spill] sm:$0xff] }
 0x185   : > { %v1557_v32 = vpop.f32.mrf.mxu0  ;;  %v1169_v61 = vadd.f32 %v6903_v47, %v934_v30  ;;  %v1412_v8 = vadd.f32 %v5985_v54, %v1168_v22  ;;  %v6908_v54 = vld [vmem:[#allocation32_spill] sm:$0xff] }
 0x186   : > { %v1664_v45 = vadd.f32 %v5969_v41, %v1620_v11  ;;  %v1621_v34 = vadd.f32 %v1557_v32, %v1405_v16  ;;  %4377 = vmatprep.mubr.msk.bf16.mxu1 %vm1826_vm6, %v1729_v10  ;;  %v1695_v18 = vmax.f32 %v1663_v35, 0.0 }
 0x187   : > { %v1561_v6 = vpop.f32.mrf.mxu0  ;;  %1896 = vmatmul.mubr.bf16.gmra.mxu1 %v1728_v12 }
 0x188   : > { %v1696_v2 = vmax.f32 %v1664_v45, 0.0  ;;  %v1665_v3 = vadd.f32 %v5976_v43, %v1621_v34  ;;  %v1622_v26 = vadd.f32 %v1561_v6, %v1406_v46  ;;  %v1413_v46 = vadd.f32 %v5996_v56, %v1169_v61  ;;  %v6910_v56 = vld [vmem:[#allocation31_spill] sm:$0xff]  ;;  %v6914_v61 = vld [vmem:[#allocation21_spill] sm:$0xff] }
 0x189   : > { %v1563_v4 = vpop.f32.mrf.mxu0 }
 0x18a   : > { %v1697_v19 = vmax.f32 %v1665_v3, 0.0  ;;  %v1623_v7 = vadd.f32 %v1563_v4, %v1407_v57  ;;  %v1730_v14 = vpack.c.bf16 %v1696_v2, %v1694_v60  ;;  %v1666_v13 = vadd.f32 %v5969_v41, %v1622_v26  ;;  %v6906_v57 = vld [vmem:[#allocation17_spill] sm:$0xff]  ;;  %v1379_v2 = vpop.f32.mrf.mxu1  ;;  %v6909_v26 = vld [vmem:[#allocation30_spill] sm:$0xff] }
 0x18b   : > { %v1565_v33 = vpop.f32.mrf.mxu0  ;;  %v944_v6 = vadd.f32 %v6907_v38, %v6906_v57  ;;  %v1172_v60 = vadd.f32 %v6908_v54, %v942_v23 }
 0x18c   : > { %v1731_v24 = vpack.c.bf16 %v1697_v19, %v1695_v18  ;;  %v1624_v20 = vadd.f32 %v1565_v33, %v1408_v40  ;;  %v1667_v5 = vadd.f32 %v5976_v43, %v1623_v7  ;;  %v1698_v17 = vmax.f32 %v1666_v13, 0.0  ;;  %v1381_v31 = vpop.f32.mrf.mxu1 }
 0x18d   : > { %v1567_v37 = vpop.f32.mrf.mxu0  ;;  %v1414_v40 = vadd.f32 %v6005_v15, %v6909_v26  ;;  %v1415_v7 = vadd.f32 %v6017_v28, %v6910_v56  ;;  %v1416_v15 = vadd.f32 %v6026_v62, %v1172_v60  ;;  %v6916_v62 = vld [vmem:[#allocation36_spill] sm:$0xff]  ;;  %v6921_v26 = vld [vmem:[#allocation22_spill] sm:$0xff] }
 0x18e   : > { %v1668_v42 = vadd.f32 %v5969_v41, %v1624_v20  ;;  %v1625_v53 = vadd.f32 %v1567_v37, %v1409_v21  ;;  %4378 = vmatprep.mubr.msk.bf16.mxu1 %vm1826_vm6, %v1731_v24  ;;  %v1699_v16 = vmax.f32 %v1667_v5, 0.0  ;;  %v6913_v5 = vld [vmem:[#allocation18_spill] sm:$0xff] }
 0x18f   : > { %v1571_v59 = vpop.f32.mrf.mxu0  ;;  %1904 = vmatmul.mubr.bf16.gmra.mxu1 %v1730_v14  ;;  %v6911_v14 = vld [vmem:[#allocation33_spill] sm:$0xff] }
 0x190   : > { %v1700_v55 = vmax.f32 %v1668_v42, 0.0  ;;  %v1669_v25 = vadd.f32 %v5976_v43, %v1625_v53  ;;  %v1626_v12 = vadd.f32 %v1571_v59, %v1410_v27  ;;  %v1173_v48 = vadd.f32 %v6911_v14, %v944_v6  ;;  %v6912_v27 = vld [vmem:[#allocation20_spill] sm:$0xff]  ;;  %v6915_v59 = vld [vmem:[#allocation19_spill] sm:$0xff] }
 0x191   : > { %v1573_v58 = vpop.f32.mrf.mxu0  ;;  %v952_v28 = vadd.f32 %v6913_v5, %v6912_v27  ;;  %v6923_v14 = vld [vmem:[#allocation24_spill] sm:$0xff] }
 0x192   : > { %v1701_v10 = vmax.f32 %v1669_v25, 0.0  ;;  %v1627_v63 = vadd.f32 %v1573_v58, %v1411_v9  ;;  %v1732_v11 = vpack.c.bf16 %v1700_v55, %v1698_v17  ;;  %v1670_v45 = vadd.f32 %v5969_v41, %v1626_v12  ;;  %v1385_v25 = vpop.f32.mrf.mxu1 }
 0x193   : > { %v1575_v32 = vpop.f32.mrf.mxu0  ;;  %v1417_v53 = vadd.f32 %v6038_v51, %v1173_v48  ;;  %v954_v17 = vadd.f32 %v6915_v59, %v6914_v61  ;;  %v1176_v55 = vadd.f32 %v6916_v62, %v952_v28  ;;  %v6918_v51 = vld [vmem:[#allocation35_spill] sm:$0xff] }
 0x194   : > { %v1733_v35 = vpack.c.bf16 %v1701_v10, %v1699_v16  ;;  %v1628_v34 = vadd.f32 %v1575_v32, %v1412_v8  ;;  %v1671_v4 = vadd.f32 %v5976_v43, %v1627_v63  ;;  %v1702_v21 = vmax.f32 %v1670_v45, 0.0  ;;  %v6917_v8 = vld [vmem:[#allocation34_spill] sm:$0xff] }
 0x195   : > { %v1577_v3 = vpop.f32.mrf.mxu0  ;;  %v1418_v58 = vadd.f32 %v1375_v52, %v6917_v8  ;;  %v1177_v1 = vadd.f32 %v6919_v29, %v954_v17  ;;  %v1387_v52 = vpop.f32.mrf.mxu1 }
 0x196   : > { %v1672_v18 = vadd.f32 %v5969_v41, %v1628_v34  ;;  %v1629_v19 = vadd.f32 %v1577_v3, %v1413_v46  ;;  %4379 = vmatprep.mubr.msk.bf16.mxu1 %vm1826_vm6, %v1733_v35  ;;  %v1703_v36 = vmax.f32 %v1671_v4, 0.0  ;;  %v1420_v34 = vadd.f32 %v1379_v2, %v1176_v55  ;;  %v6920_v3 = vld [vmem:[#allocation23_spill] sm:$0xff] }
 0x197   : > { %v1581_v33 = vpop.f32.mrf.mxu0  ;;  %1912 = vmatmul.mubr.bf16.gmra.mxu1 %v1732_v11  ;;  %v1419_v11 = vadd.f32 %v1377_v49, %v6918_v51  ;;  %v1421_v4 = vadd.f32 %v1381_v31, %v1177_v1  ;;  %v6926_v31 = vld [vmem:[#allocation39_spill] sm:$0xff] }
 0x198   : > { %v1704_v24 = vmax.f32 %v1672_v18, 0.0  ;;  %v1673_v13 = vadd.f32 %v5976_v43, %v1629_v19  ;;  %v1630_v20 = vadd.f32 %v1581_v33, %v1414_v40  ;;  %v962_v40 = vadd.f32 %v6921_v26, %v6920_v3  ;;  %v6924_v33 = vld [vmem:[#allocation40_spill] sm:$0xff] }
 0x199   : > { %v1583_v30 = vpop.f32.mrf.mxu0 }
 0x19a   : > { %v1705_v22 = vmax.f32 %v1673_v13, 0.0  ;;  %v1631_v37 = vadd.f32 %v1583_v30, %v1415_v7  ;;  %v1734_v39 = vpack.c.bf16 %v1704_v24, %v1702_v21  ;;  %v1674_v9 = vadd.f32 %v5969_v41, %v1630_v20  ;;  %v6922_v7 = vld [vmem:[#allocation25_spill] sm:$0xff]  ;;  %v1389_v21 = vpop.f32.mrf.mxu1  ;;  %v6925_v13 = vld [vmem:[#allocation38_spill] sm:$0xff] }
 0x19b   : > { %v1585_v42 = vpop.f32.mrf.mxu0  ;;  %v964_v48 = vadd.f32 %v6923_v14, %v6922_v7  ;;  %v1180_v2 = vadd.f32 %v6924_v33, %v962_v40  ;;  %v1422_v20 = vadd.f32 %v1385_v25, %v6925_v13 }
 0x19c   : > { %v1735_v0 = vpack.c.bf16 %v1705_v22, %v1703_v36  ;;  %v1632_v47 = vadd.f32 %v1585_v42, %v1416_v15  ;;  %v1675_v16 = vadd.f32 %v5976_v43, %v1631_v37  ;;  %v1706_v32 = vmax.f32 %v1674_v9, 0.0  ;;  %v6927_v37 = vld [vmem:[#allocation41_spill] sm:$0xff]  ;;  %v1391_v9 = vpop.f32.mrf.mxu1 }
 0x19d   : > { %v1587_v12 = vpop.f32.mrf.mxu0  ;;  %v1423_v22 = vadd.f32 %v1387_v52, %v6926_v31 }
 0x19e   : > { %v1676_v10 = vadd.f32 %v5969_v41, %v1632_v47  ;;  %v1633_v63 = vadd.f32 %v1587_v12, %v1417_v53  ;;  %4380 = vmatprep.mubr.msk.bf16.mxu1 %vm1826_vm6, %v1735_v0  ;;  %v1707_v38 = vmax.f32 %v1675_v16, 0.0  ;;  %v1424_v0 = vadd.f32 %v1389_v21, %v1180_v2 }
 0x19f   : > { %v1591_v23 = vpop.f32.mrf.mxu0  ;;  %1920 = vmatmul.mubr.bf16.gmra.mxu1 %v1734_v39  ;;  %v1181_v39 = vadd.f32 %v6927_v37, %v964_v48 }
 0x1a0   : > { %v1708_v46 = vmax.f32 %v1676_v10, 0.0  ;;  %v1677_v35 = vadd.f32 %v5976_v43, %v1633_v63  ;;  %v1634_v45 = vadd.f32 %v1591_v23, %v1418_v58 }
 0x1a1   : > { %v1593_v57 = vpop.f32.mrf.mxu0  ;;  %v1425_v25 = vadd.f32 %v1391_v9, %v1181_v39 }
 0x1a2   : > { %v1709_v6 = vmax.f32 %v1677_v35, 0.0  ;;  %v1635_v54 = vadd.f32 %v1593_v57, %v1419_v11  ;;  %v1736_v60 = vpack.c.bf16 %v1708_v46, %v1706_v32  ;;  %v1678_v19 = vadd.f32 %v5969_v41, %v1634_v45 }
 0x1a3   : > { %v1595_v49 = vpop.f32.mrf.mxu0  ;;  %v6928_v45 = vmov 0  }
 0x1a4   : > { %v1737_v18 = vpack.c.bf16 %v1709_v6, %v1707_v38  ;;  %v1636_v56 = vadd.f32 %v1595_v49, %v1420_v34  ;;  %v1679_v15 = vadd.f32 %v5976_v43, %v1635_v54  ;;  %v1710_v5 = vmax.f32 %v1678_v19, 0.0  ;;  %v4406_v34 = vld [vmem:[%s6831_s2 + $0xa8] sm:$0x33]  ;;  %2090 = vst.msk [vmem:[#allocation2 + $0x20] sm:$0xf] %vm2081_vm8, %v6928_v45 }
 0x1a5   : > { %v1597_v24 = vpop.f32.mrf.mxu0  ;;  %v4423_v52 = vcombine.high %v4406_v34, %v4406_v34 }
 0x1a6   : > { %v1680_v30 = vadd.f32 %v5969_v41, %v1636_v56  ;;  %v1637_v36 = vadd.f32 %v1597_v24, %v1421_v4  ;;  %4381 = vmatprep.mubr.msk.bf16.mxu1 %vm1826_vm6, %v1737_v18  ;;  %v1711_v61 = vmax.f32 %v1679_v15, 0.0 }
 0x1a7   : > { %v1601_v27 = vpop.f32.mrf.mxu0  ;;  %1928 = vmatmul.mubr.bf16.gmra.mxu1 %v1736_v60  ;;  %4424 = vmatprep.subr.msk.bf16.mxu1 %vm2250_vm7, %v4423_v52  ;;  %v5013_v52 = vld [vmem:[%s6831_s2 + $0x10] ss:$8 sps:$4 sm:$0xff]  }
 0x1a8   : > { %v1712_v28 = vmax.f32 %v1680_v30, 0.0  ;;  %v1681_v42 = vadd.f32 %v5976_v43, %v1637_v36  ;;  %v1638_v53 = vadd.f32 %v1601_v27, %v1422_v20 }
 0x1a9   : > { %v1603_v47 = vpop.f32.mrf.mxu0 }
 0x1aa   : > { %v1713_v59 = vmax.f32 %v1681_v42, 0.0  ;;  %v1639_v17 = vadd.f32 %v1603_v47, %v1423_v22  ;;  %v1738_v62 = vpack.c.bf16 %v1712_v28, %v1710_v5  ;;  %v1682_v8 = vadd.f32 %v5969_v41, %v1638_v53 }
 0x1ab   : > { %v1605_v55 = vpop.f32.mrf.mxu0 }
 0x1ac   : > { %v1739_v12 = vpack.c.bf16 %v1713_v59, %v1711_v61  ;;  %v1640_v58 = vadd.f32 %v1605_v55, %v1424_v0  ;;  %v1683_v10 = vadd.f32 %v5976_v43, %v1639_v17  ;;  %v1714_v11 = vmax.f32 %v1682_v8, 0.0  ;;  %v2109_v55 = vld [vmem:[%s6831_s2 + $0x50] sm:$0x33]  ;;  %v4991_v8 = vld [vmem:[%s6834_s5 + $0x8] sm:$0xff]  }
 0x1ad   : > { %v1607_v16 = vpop.f32.mrf.mxu0 }
 0x1ae   : > { %v1684_v63 = vadd.f32 %v5969_v41, %v1640_v58  ;;  %v1641_v51 = vadd.f32 %v1607_v16, %v1425_v25  ;;  %4382 = vmatprep.mubr.msk.bf16.mxu1 %vm1826_vm6, %v1739_v12  ;;  %v1715_v23 = vmax.f32 %v1683_v10, 0.0  ;;  %v4990_v41 = vld [vmem:[%s6834_s5] sm:$0xff]   ;;  %v4440_v25 = vcombine.high %v2109_v55, %v2109_v55  ;;  %v4992_v58 = vld [vmem:[%s6834_s5 + $0x10] sm:$0xff]  }
 0x1af   : > { %1936 = vmatmul.mubr.bf16.gmra.mxu1 %v1738_v62  ;;  %4760 = vmatprep.mubr.bf16.mxu0 %v4990_v41  ;;  %v4439_v12 = vcombine.low %v2109_v55, %v2109_v55  ;;  %v5000_v10 = vld [vmem:[%s6831_s2 + $0x44] ss:$8 sps:$4 sm:$0xff]   ;;  %v5010_v41 = vld [vmem:[%s6831_s2 + $0x88] ss:$8 sps:$4 sm:$0xff]  }
 0x1b0   : > { %v1716_v29 = vmax.f32 %v1684_v63, 0.0  ;;  %v1685_v1 = vadd.f32 %v5976_v43, %v1641_v51  ;;  %v4422_v43 = vcombine.low %v4406_v34, %v4406_v34  ;;  %v4998_v63 = vld [vmem:[%s6831_s2 + $0x40] ss:$8 sps:$4 sm:$0xff]   ;;  %v4993_v51 = vld [vmem:[%s6834_s5 + $0x18] sm:$0xff]  }
 0x1b1   : > { %v2394_v16 = vsel %vm2250_vm7, %v4439_v12, 0  ;;  %v5015_v34 = vld [vmem:[%s6831_s2 + $0x14] ss:$8 sps:$4 sm:$0xff]  }
 0x1b2   : > { %v1717_v32 = vmax.f32 %v1685_v1, 0.0  ;;  %v1740_v46 = vpack.c.bf16 %v1716_v29, %v1714_v11  ;;  %v2252_v57 = vsel %vm2250_vm7, %v4422_v43, 0  ;;  %v5003_v11 = vld [vmem:[%s6831_s2 + $0x34] ss:$8 sps:$4 sm:$0xff]   ;;  %v5001_v29 = vld [vmem:[%s6831_s2 + $0x30] ss:$8 sps:$4 sm:$0xff]  }
 0x1b3   : > { %2262 = vmatpush1.bf16.msra.mxu1 %v2252_v57  ;;  %v5006_v1 = vld [vmem:[%s6831_s2 + $0x9c] ss:$8 sps:$4 sm:$0xff]   ;;  %v5016_v57 = vld [vmem:[%s6831_s2 + $0x78] ss:$8 sps:$4 sm:$0xff]  }
 0x1b4   : > { %v1741_v35 = vpack.c.bf16 %v1717_v32, %v1715_v23  ;;  %v5004_v23 = vld [vmem:[%s6831_s2 + $0x98] ss:$8 sps:$4 sm:$0xff]   ;;  %v5009_v32 = vld [vmem:[%s6831_s2 + $0x24] ss:$8 sps:$4 sm:$0xff]   ;;  %2263 = vmatprep.subr.bf16.mxu1 %v5006_v1  ;;  %v5044_v1 = vld [vmem:[%s6831_s2 + $0xf4] ss:$8 sps:$4 sm:$0xff]  }
 0x1b5   : > { %v5018_v43 = vld [vmem:[%s6831_s2 + $0x7c] ss:$8 sps:$4 sm:$0xff]  }
 0x1b6   : > { %4383 = vmatprep.mubr.msk.bf16.mxu1 %vm1826_vm6, %v1741_v35  ;;  %v5012_v35 = vld [vmem:[%s6831_s2 + $0x8c] ss:$8 sps:$4 sm:$0xff]  }
 0x1b7   : > { %1944 = vmatmul.mubr.bf16.gmra.mxu1 %v1740_v46  ;;  %v5007_v46 = vld [vmem:[%s6831_s2 + $0x20] ss:$8 sps:$4 sm:$0xff]  }
 0x1b8   : > { %2289 = vmatprep.mubr.bf16.mxu1 %v6928_v45  ;;  %2264 = vmatpush1.bf16.msra.mxu1 %v5004_v23 }
 0x1b9   : > { %2265 = vmatprep.subr.bf16.mxu1 %v5012_v35 }
 0x1bc   : > { %2266 = vmatpush1.bf16.msra.mxu1 %v5010_v41  ;;  %v5042_v41 = vld [vmem:[%s6831_s2 + $0xf0] ss:$8 sps:$4 sm:$0xff]  }
 0x1bd   : > { %2267 = vmatprep.subr.bf16.mxu1 %v5018_v43 }
 0x1c0   : > { %2268 = vmatpush1.bf16.msra.mxu1 %v5016_v57  ;;  %v5051_v57 = vld [vmem:[%s6831_s2 + $0xe4] ss:$8 sps:$4 sm:$0xff]  }
 0x23f   : > { %v1889_v38 = vpop.f32.mrf.mxu1 }
 0x241   : > { %v1891_v6 = vpop.f32.mrf.mxu1 }
 0x242   : > { %v5019_v6 = vld [vmem:[%s6831_s2] ss:$8 sps:$4 sm:$0xff]  }
 0x243   : > { %v1892_v54 = vpop.f32.mrf.mxu1 }
 0x244   : > { %v1952_v60 = vpack.c.bf16 %v1892_v54, %v1889_v38  ;;  %v5021_v38 = vld [vmem:[%s6831_s2 + $0x4] ss:$8 sps:$4 sm:$0xff]  }
 0x245   : > { %v1894_v3 = vpop.f32.mrf.mxu1  ;;  %v5024_v54 = vld [vmem:[%s6831_s2 + $0x6c] ss:$8 sps:$4 sm:$0xff]  }
 0x246   : > { %2269 = vmatprep.subr.bf16.mxu1 %v5024_v54  ;;  %v5027_v3 = vld [vmem:[%s6831_s2 + $0x58] ss:$8 sps:$4 sm:$0xff]  }
 0x247   : > { %v1897_v26 = vpop.f32.mrf.mxu1 }
 0x249   : > { %v1899_v40 = vpop.f32.mrf.mxu1 }
 0x24a   : > { %v4485_v40 = vld [vmem:[%s6831_s2 + $0x158] sm:$0x33] }
 0x24b   : > { %v1900_v49 = vpop.f32.mrf.mxu1 }
 0x24c   : > { %v1953_v4 = vpack.c.bf16 %v1900_v49, %v1897_v26  ;;  %v5029_v26 = vld [vmem:[%s6831_s2 + $0x5c] ss:$8 sps:$4 sm:$0xff]   ;;  %v4498_v49 = vcombine.high %v4485_v40, %v4485_v40 }
 0x24d   : > { %v1902_v18 = vpop.f32.mrf.mxu1 }
 0x24f   : > { %v1905_v19 = vpop.f32.mrf.mxu1 }
 0x251   : > { %v1907_v56 = vpop.f32.mrf.mxu1 }
 0x253   : > { %v1908_v7 = vpop.f32.mrf.mxu1 }
 0x254   : > { %v1954_v62 = vpack.c.bf16 %v1908_v7, %v1905_v19 }
 0x255   : > { %v1910_v14 = vpop.f32.mrf.mxu1 }
 0x257   : > { %v1913_v48 = vpop.f32.mrf.mxu1 }
 0x259   : > { %v1915_v33 = vpop.f32.mrf.mxu1 }
 0x25b   : > { %v1916_v2 = vpop.f32.mrf.mxu1 }
 0x25c   : > { %v1955_v17 = vpack.c.bf16 %v1916_v2, %v1913_v48 }
 0x25d   : > { %v1918_v21 = vpop.f32.mrf.mxu1 }
 0x25f   : > { %v1921_v24 = vpop.f32.mrf.mxu1 }
 0x261   : > { %v1923_v13 = vpop.f32.mrf.mxu1 }
 0x263   : > { %v1924_v20 = vpop.f32.mrf.mxu1 }
 0x264   : > { %v1956_v59 = vpack.c.bf16 %v1924_v20, %v1921_v24 }
 0x265   : > { %v1926_v15 = vpop.f32.mrf.mxu1 }
 0x267   : > { %v1929_v30 = vpop.f32.mrf.mxu1 }
 0x269   : > { %v1931_v36 = vpop.f32.mrf.mxu1 }
 0x26b   : > { %v1932_v31 = vpop.f32.mrf.mxu1 }
 0x26c   : > { %v1957_v61 = vpack.c.bf16 %v1932_v31, %v1929_v30  ;;  %v4497_v31 = vcombine.low %v4485_v40, %v4485_v40 }
 0x26d   : > { %v1934_v22 = vpop.f32.mrf.mxu1 }
 0x26f   : > { %v1937_v37 = vpop.f32.mrf.mxu1 }
 0x271   : > { %v1939_v39 = vpop.f32.mrf.mxu1 }
 0x273   : > { %v1940_v27 = vpop.f32.mrf.mxu1 }
 0x274   : > { %v1958_v47 = vpack.c.bf16 %v1940_v27, %v1937_v37 }
 0x275   : > { %v1942_v5 = vpop.f32.mrf.mxu1 }
 0x277   : > { %v1945_v28 = vpop.f32.mrf.mxu1 }
 0x279   : > { %v1947_v42 = vpop.f32.mrf.mxu1 }
 0x27b   : > { %v1948_v53 = vpop.f32.mrf.mxu1 }
 0x27c   : > { %v1959_v0 = vpack.c.bf16 %v1948_v53, %v1945_v28  ;;  %v2772_v53 = vsel %vm2250_vm7, %v4497_v31, 0 }
 0x27d   : > { %v1950_v9 = vpop.f32.mrf.mxu1 }
 0x27e   : > { %4744 = vmatprep.subr.bf16.mxu0 %v1959_v0 }
 0x27f   : > { %4745 = vmatpush3.bf16.msra.mxu0 %v1959_v0  ;;  %v5035_v0 = vld [vmem:[%s6831_s2 + $0x14c] ss:$8 sps:$4 sm:$0xff]  }
 0x280   : > { %4746 = vmatprep.subr.bf16.mxu0 %v1958_v47 }
 0x283   : > { %4747 = vmatpush3.bf16.msra.mxu0 %v1958_v47 }
 0x284   : > { %4748 = vmatprep.subr.bf16.mxu0 %v1957_v61 }
 0x287   : > { %4749 = vmatpush3.bf16.msra.mxu0 %v1957_v61 }
 0x288   : > { %4750 = vmatprep.subr.bf16.mxu0 %v1956_v59 }
 0x28b   : > { %4751 = vmatpush3.bf16.msra.mxu0 %v1956_v59  ;;  %v5033_v59 = vld [vmem:[%s6831_s2 + $0x148] ss:$8 sps:$4 sm:$0xff]  }
 0x28c   : > { %4752 = vmatprep.subr.bf16.mxu0 %v1955_v17 }
 0x28f   : > { %4753 = vmatpush3.bf16.msra.mxu0 %v1955_v17 }
 0x290   : > { %4754 = vmatprep.subr.bf16.mxu0 %v1954_v62 }
 0x293   : > { %4755 = vmatpush3.bf16.msra.mxu0 %v1954_v62 }
 0x294   : > { %4756 = vmatprep.subr.bf16.mxu0 %v1953_v4 }
 0x297   : > { %4757 = vmatpush3.bf16.msra.mxu0 %v1953_v4  ;;  %v4456_v4 = vld [vmem:[%s6831_s2 + $0x100] sm:$0x33] }
 0x298   : > { %4758 = vmatprep.subr.bf16.mxu0 %v1952_v60  ;;  %v4469_v18 = vcombine.high %v4456_v4, %v4456_v4  ;;  %v4468_v12 = vcombine.low %v4456_v4, %v4456_v4  ;;  %v5052_v4 = vld [vmem:[%s6831_s2 + $0x118] ss:$8 sps:$4 sm:$0xff]  }
 0x29b   : > { %4759 = vmatpush3.bf16.msra.mxu0 %v1952_v60  ;;  %v5022_v60 = vld [vmem:[%s6831_s2 + $0x68] ss:$8 sps:$4 sm:$0xff]  }
 0x29c   : > { %4441 = vmatprep.subr.msk.bf16.mxu0 %vm2250_vm7, %v4440_v25  ;;  %2270 = vmatpush1.bf16.msra.mxu1 %v5022_v60 }
 0x29d   : > { %2271 = vmatprep.subr.bf16.mxu1 %v5029_v26  ;;  %v5049_v26 = vld [vmem:[%s6831_s2 + $0xe0] ss:$8 sps:$4 sm:$0xff]  }
 0x29e   : > { %4761 = vmatmul.mubr.bf16.vlgmr.msra.gmra.mxu0 %v4991_v8  ;;  %v5041_v8 = vld [vmem:[%s6831_s2 + $0x13c] ss:$8 sps:$4 sm:$0xff]  }
 0x29f   : > { %4764 = vmatprep.mubr.bf16.mxu0 %v4992_v58  ;;  %2404 = vmatpush1.bf16.msra.mxu0 %v2394_v16 }
 0x2a0   : > { %2405 = vmatprep.subr.bf16.mxu0 %v5000_v10  ;;  %2272 = vmatpush1.bf16.msra.mxu1 %v5027_v3 }
 0x2a1   : > { %4470 = vmatprep.subr.msk.bf16.mxu1 %vm2250_vm7, %v4469_v18  ;;  %v5057_v18 = vld [vmem:[%s6831_s2 + $0xd4] ss:$8 sps:$4 sm:$0xff]  }
 0x2a3   : > { %2406 = vmatpush1.bf16.msra.mxu0 %v4998_v63 }
 0x2a4   : > { %2407 = vmatprep.subr.bf16.mxu0 %v5003_v11  ;;  %v2565_v11 = vsel %vm2250_vm7, %v4468_v12, 0 }
 0x2a6   : > { %4765 = vmatmul.mubr.bf16.gmra.mxu0 %v4993_v51 }
 0x2a7   : > { %2431 = vmatprep.mubr.bf16.mxu0 %v6928_v45  ;;  %2408 = vmatpush1.bf16.msra.mxu0 %v5001_v29  ;;  %v5039_v29 = vld [vmem:[%s6831_s2 + $0x138] ss:$8 sps:$4 sm:$0xff]  }
 0x2a8   : > { %2409 = vmatprep.subr.bf16.mxu0 %v5009_v32 }
 0x2ab   : > { %2410 = vmatpush1.bf16.msra.mxu0 %v5007_v46  ;;  %v5047_v46 = vld [vmem:[%s6831_s2 + $0x12c] ss:$8 sps:$4 sm:$0xff]  }
 0x2ac   : > { %2411 = vmatprep.subr.bf16.mxu0 %v5015_v34  ;;  %v5045_v34 = vld [vmem:[%s6831_s2 + $0x128] ss:$8 sps:$4 sm:$0xff]  }
 0x2af   : > { %2412 = vmatpush1.bf16.msra.mxu0 %v5013_v52 }
 0x2b0   : > { %2413 = vmatprep.subr.bf16.mxu0 %v5021_v38 }
 0x2b3   : > { %2414 = vmatpush1.bf16.msra.mxu0 %v5019_v6  ;;  %v5054_v6 = vld [vmem:[%s6831_s2 + $0x11c] ss:$8 sps:$4 sm:$0xff]  }
 0x2b4   : > { %4499 = vmatprep.subr.msk.bf16.mxu0 %vm2250_vm7, %v4498_v49 }
 0x35e   : > { %v4762_v19 = vpop.f32.mrf.mxu0 }
 0x35f   : > { %v4662_v56 = vpack.c.bf16 %v4762_v19, %v4762_v19 }
 0x360   : > { %v2018_v7 = vpop.f32.mrf.mxu0 }
 0x361   : > { %2084 = vst.msk [vmem:[#allocation2 + $0x8] sm:$0xf] %vm2081_vm8, %v4662_v56  ;;  %v4660_v14 = vpack.c.bf16 %v2018_v7, %v2018_v7  ;;  %v5060_v56 = vld [vmem:[%s6831_s2 + $0x10c] ss:$8 sps:$4 sm:$0xff]  }
 0x362   : > { %v4763_v48 = vpop.f32.mrf.mxu0 }
 0x363   : > { %2082 = vst.msk [vmem:[#allocation2] sm:$0xf] %vm2081_vm8, %v4660_v14  ;;  %v4663_v33 = vpack.c.bf16 %v4763_v48, %v4763_v48  ;;  %v5055_v48 = vld [vmem:[%s6831_s2 + $0xd0] ss:$8 sps:$4 sm:$0xff]  }
 0x364   : > { %v2021_v2 = vpop.f32.mrf.mxu0 }
 0x365   : > { %2085 = vst.msk [vmem:[#allocation2 + $0xc] sm:$0xf] %vm2081_vm8, %v4663_v33  ;;  %v4661_v21 = vpack.c.bf16 %v2021_v2, %v2021_v2  ;;  %v5058_v2 = vld [vmem:[%s6831_s2 + $0x108] ss:$8 sps:$4 sm:$0xff]  }
 0x366   : > { %v4766_v24 = vpop.f32.mrf.mxu0 }
 0x367   : > { %2083 = vst.msk [vmem:[#allocation2 + $0x4] sm:$0xf] %vm2081_vm8, %v4661_v21  ;;  %v4666_v13 = vpack.c.bf16 %v4766_v24, %v4766_v24  ;;  %v5064_v21 = vld [vmem:[%s6831_s2 + $0xc4] ss:$8 sps:$4 sm:$0xff]  }
 0x368   : > { %v2034_v20 = vpop.f32.mrf.mxu0 }
 0x369   : > { %2088 = vst.msk [vmem:[#allocation2 + $0x18] sm:$0xf] %vm2081_vm8, %v4666_v13  ;;  %v4664_v15 = vpack.c.bf16 %v2034_v20, %v2034_v20 }
 0x36a   : > { %v4767_v30 = vpop.f32.mrf.mxu0  ;;  %v2091_v27 = vld [vmem:[#allocation2] sm:$0xf] }
 0x36b   : > { %2086 = vst.msk [vmem:[#allocation2 + $0x10] sm:$0xf] %vm2081_vm8, %v4664_v15  ;;  %v4667_v36 = vpack.c.bf16 %v4767_v30, %v4767_v30  ;;  %v2866_v28 = vld [vmem:[#allocation2] sm:$0xc] }
 0x36c   : > { %v2037_v22 = vpop.f32.mrf.mxu0  ;;  %v6208_v39 = vld [vmem:[#allocation2 + $0x8] sm:$0xff]   ;;  %v2472_v40 = vld [vmem:[#allocation2] sm:$0xe]  ;;  %v6309_v15 = vld [vmem:[#allocation2 + $0x20] ss:$0 sps:$4 sm:$0x11]  }
 0x36d   : > { %2089 = vst.msk [vmem:[#allocation2 + $0x1c] sm:$0xf] %vm2081_vm8, %v4667_v36  ;;  %v4665_v37 = vpack.c.bf16 %v2037_v22, %v2037_v22  ;;  %v2154_v61 = vshll.u32 %v6208_v39, 16  ;;  %v2883_v62 = vrot.slane %v6208_v39, 2  ;;  %v2158_v52 = vshrl.u32 %v6208_v39, 16 }
 0x36e   : > { %v2092_v5 = vld [vmem:[#allocation2 + $0x4] sm:$0xf]  ;;  %v5062_v30 = vld [vmem:[%s6831_s2 + $0xc0] ss:$8 sps:$4 sm:$0xff]   ;;  %v2178_v31 = vshll.u32 %v6309_v15, 16 }
 0x36f   : > { %2087 = vst.msk [vmem:[#allocation2 + $0x14] sm:$0xf] %vm2081_vm8, %v4665_v37  ;;  %v4407_v42 = vcombine.low %v2091_v27, %v2092_v5  ;;  %v4515_v9 = vcombine.low %v2866_v28, %v2092_v5  ;;  %v2156_v10 = vrot.slane %v2154_v61, 1  ;;  %v6286_v19 = vcombine.low %v2472_v40, %v2092_v5  ;;  %v5067_v22 = vld [vmem:[%s6831_s2 + $0xb4] ss:$8 sps:$4 sm:$0xff]  }
 0x370   : > { %v4514_v5 = vld [vmem:[%s6831_s2 + $0x1b0] sm:$0x33] }
 0x371   : > { %4442 = vmatmul.mubr.msk.bf16.vlgmr.msra.gmra.mxu0 %vm2237_vm9, %v4407_v42  ;;  %v2149_v47 = vshll.u32 %v4407_v42, 16  ;;  %v2882_v17 = vrot.slane %v4515_v9, 2  ;;  %v2147_v55 = vshrl.u32 %v4407_v42, 16  ;;  %v2160_v54 = vor.u32 %v2158_v52, %v2156_v10 }
 0x372   : > { %2441 = vmatprep.mubr.bf16.mxu0 %v6928_v45  ;;  %2782 = vmatpush1.bf16.msra.mxu0 %v2772_v53  ;;  %v2676_v24 = vshrl.u32 %v6286_v19, 16  ;;  %v2679_v13 = vshll.u32 %v6286_v19, 16  ;;  %v2683_v42 = vrot.slane %v2158_v52, 1  ;;  %v2684_v53 = vrot.slane %v2154_v61, 2  ;;  %v5075_v52 = vld [vmem:[%s6831_s2 + $0x194] ss:$8 sps:$4 sm:$0xff]  }
 0x373   : > { %v2151_v25 = vrot.slane %v2149_v47, 1  ;;  %2783 = vmatprep.subr.bf16.mxu0 %v5035_v0  ;;  %v6226_v58 = vsel %vm1435_vm3, %v2882_v17, %v2883_v62  ;;  %v5065_v0 = vld [vmem:[%s6831_s2 + $0xb0] ss:$8 sps:$4 sm:$0xff]   ;;  %v2180_v47 = vrot.slane %v2178_v31, 1  ;;  %v5094_v31 = vld [vmem:[%s6835_s6] sm:$0xff]  }
 0x374   : > { %v6240_v23 = vld [vmem:[#allocation2 + $0x18] sm:$0xff]   ;;  %v2678_v37 = vrot.slane %v2676_v24, 1  ;;  %v2681_v27 = vrot.slane %v2679_v13, 2  ;;  %v2495_v24 = vrot.slane %v6309_v15, 1 }
 0x375   : > { %v2152_v16 = vor.u32 %v2151_v25, %v2147_v55  ;;  %v2887_v38 = vrot.slane %v6240_v23, 2  ;;  %v2170_v14 = vshll.u32 %v6240_v23, 16  ;;  %v2174_v28 = vshrl.u32 %v6240_v23, 16 }
 0x376   : > { %2784 = vmatpush1.bf16.msra.mxu0 %v5033_v59  ;;  %v6230_v63 = vld [vmem:[#allocation2 + $0x10] sm:$0xff]   ;;  %v4527_v59 = vcombine.high %v4514_v5, %v4514_v5  ;;  %v2682_v17 = vor.u32 %v2681_v27, %v2678_v37  ;;  %v5096_v37 = vld [vmem:[%s6835_s6 + $0x40] sm:$0xff]  }
 0x377   : > { %v2157_v51 = vsel %vm590_vm1, %v2152_v16, %v2156_v10  ;;  %2785 = vmatprep.subr.bf16.mxu0 %v5041_v8  ;;  %v2162_v32 = vshll.u32 %v6230_v63, 16  ;;  %v2885_v35 = vrot.slane %v6230_v63, 2  ;;  %v2166_v7 = vshrl.u32 %v6230_v63, 16 }
 0x378   : > { %4425 = vmatmul.mubr.msk.bf16.vlgmr.msra.gmra.mxu1 %vm2237_vm9, %v2157_v51  ;;  %v2172_v20 = vrot.slane %v2170_v14, 1  ;;  %v2488_v8 = vrot.slane %v6286_v19, 1  ;;  %v4526_v16 = vcombine.low %v4514_v5, %v4514_v5  ;;  %v2489_v51 = vrot.slane %v6208_v39, 1  ;;  %v5082_v19 = vld [vmem:[%s6831_s2 + $0x174] ss:$8 sps:$4 sm:$0xff]  }
 0x379   : > { %4443 = vmatmul.mubr.msk.bf16.gmra.mxu0 %vm2237_vm9, %v6208_v39  ;;  %2299 = vmatprep.mubr.bf16.mxu1 %v6928_v45  ;;  %v2164_v43 = vrot.slane %v2162_v32, 1  ;;  %v6269_v60 = vsel %vm1435_vm3, %v2883_v62, %v2885_v35  ;;  %v6274_v3 = vsel %vm1435_vm3, %v2885_v35, %v2887_v38  ;;  %v2685_v62 = vor.u32 %v2684_v53, %v2683_v42  ;;  %v5070_v39 = vld [vmem:[%s6831_s2 + $0x1a0] ss:$8 sps:$4 sm:$0xff]  }
 0x37a   : > { %2451 = vmatprep.mubr.bf16.mxu0 %v6928_v45  ;;  %2575 = vmatpush1.bf16.msra.mxu1 %v2565_v11  ;;  %v2176_v9 = vor.u32 %v2174_v28, %v2172_v20  ;;  %v2688_v61 = vrot.slane %v2162_v32, 2  ;;  %v2687_v25 = vrot.slane %v2166_v7, 1  ;;  %v2490_v11 = vsel %vm975_vm2, %v2488_v8, %v2489_v51 }
 0x37b   : > { %2786 = vmatpush1.bf16.msra.mxu0 %v5039_v29  ;;  %2576 = vmatprep.subr.bf16.mxu1 %v5044_v1  ;;  %v2165_v49 = vsel %vm590_vm1, %v2160_v54, %v2164_v43  ;;  %v2168_v33 = vor.u32 %v2166_v7, %v2164_v43  ;;  %v2686_v12 = vsel %vm1191_vm4, %v2682_v17, %v2685_v62  ;;  %v2959_v29 = vsel %vm2250_vm7, %v4526_v16, 0  ;;  %v5072_v1 = vld [vmem:[%s6831_s2 + $0x1a4] ss:$8 sps:$4 sm:$0xff]   ;;  %v5073_v54 = vld [vmem:[%s6831_s2 + $0x190] ss:$8 sps:$4 sm:$0xff]  }
 0x37c   : > { %2787 = vmatprep.subr.bf16.mxu0 %v5047_v46  ;;  %v2181_v55 = vsel %vm590_vm1, %v2176_v9, %v2180_v47  ;;  %v2689_v10 = vor.u32 %v2688_v61, %v2687_v25  ;;  %v5076_v46 = vld [vmem:[#allocation2 + $0x20] ss:$0 sps:$4 sm:$0x33]   ;;  %v2692_v35 = vrot.slane %v2170_v14, 2  ;;  %v2493_v7 = vrot.slane %v6240_v23, 1 }
 0x37d   : > { %v2173_v36 = vsel %vm590_vm1, %v2168_v33, %v2172_v20  ;;  %v2696_v43 = vshrl.u32 %v5076_v46, 16  ;;  %v5080_v14 = vld [vmem:[%s6831_s2 + $0x170] ss:$8 sps:$4 sm:$0xff]   ;;  %v5085_v33 = vld [vmem:[%s6831_s2 + $0x164] ss:$8 sps:$4 sm:$0xff]   ;;  %v2889_v20 = vrot.slane %v5076_v46, 2 }
 0x37e   : > { %2577 = vmatpush1.bf16.msra.mxu1 %v5042_v41  ;;  %v2690_v32 = vsel %vm1191_vm4, %v2685_v62, %v2689_v10  ;;  %v2691_v41 = vrot.slane %v2174_v28, 1  ;;  %v2496_v13 = vsel %vm975_vm2, %v2493_v7, %v2495_v24 }
 0x37f   : > { %2788 = vmatpush1.bf16.msra.mxu0 %v5045_v34  ;;  %2578 = vmatprep.subr.bf16.mxu1 %v5051_v57  ;;  %v2491_v34 = vrot.slane %v6230_v63, 1  ;;  %v2699_v57 = vshll.u32 %v5076_v46, 16  ;;  %v2890_v15 = vsel %vm1435_vm3, %v2887_v38, %v2889_v20  ;;  %v5090_v38 = vld [vmem:[%s6835_s6 + $0x20] sm:$0xff]  }
 0x380   : > { %4426 = vmatmul.mubr.msk.bf16.gmra.mxu1 %vm2237_vm9, %v2165_v49  ;;  %2789 = vmatprep.subr.bf16.mxu0 %v5054_v6  ;;  %v2693_v6 = vor.u32 %v2692_v35, %v2691_v41  ;;  %v2698_v49 = vrot.slane %v2696_v43, 1 }
 0x381   : > { %4444 = vmatmul.mubr.msk.bf16.gmra.mxu0 %vm2237_vm9, %v6230_v63  ;;  %2309 = vmatprep.mubr.bf16.mxu1 %v6928_v45  ;;  %v5079_v63 = vld [vmem:[%s6831_s2 + $0x184] ss:$8 sps:$4 sm:$0xff]  }
 0x382   : > { %2461 = vmatprep.mubr.bf16.mxu0 %v6928_v45  ;;  %2579 = vmatpush1.bf16.msra.mxu1 %v5049_v26  ;;  %v2492_v26 = vsel %vm975_vm2, %v2489_v51, %v2491_v34  ;;  %v2694_v40 = vsel %vm1191_vm4, %v2689_v10, %v2693_v6 }
 0x383   : > { %2790 = vmatpush1.bf16.msra.mxu0 %v5052_v4  ;;  %2580 = vmatprep.subr.bf16.mxu1 %v5057_v18  ;;  %v2701_v4 = vrot.slane %v2699_v57, 2  ;;  %v5077_v18 = vld [vmem:[%s6831_s2 + $0x180] ss:$8 sps:$4 sm:$0xff]  }
 0x384   : > { %2791 = vmatprep.subr.bf16.mxu0 %v5060_v56 }
 0x385   : > { %v2702_v56 = vor.u32 %v2701_v4, %v2698_v49 }
 0x386   : > { %2581 = vmatpush1.bf16.msra.mxu1 %v5055_v48  ;;  %v2494_v48 = vsel %vm975_vm2, %v2491_v34, %v2493_v7 }
 0x387   : > { %2792 = vmatpush1.bf16.msra.mxu0 %v5058_v2  ;;  %2582 = vmatprep.subr.bf16.mxu1 %v5064_v21  ;;  %v2703_v2 = vsel %vm1191_vm4, %v2693_v6, %v2702_v56  ;;  %v5083_v21 = vld [vmem:[%s6831_s2 + $0x160] ss:$8 sps:$4 sm:$0xff]  }
 0x388   : > { %4427 = vmatmul.mubr.msk.bf16.gmra.mxu1 %vm2237_vm9, %v2173_v36  ;;  %3201 = vmatprep.subr.bf16.mxu0 %v6928_v45  ;;  %v5093_v36 = vld [vmem:[%s6835_s6 + $0x8] sm:$0xff]  }
 0x389   : > { %4445 = vmatmul.mubr.msk.bf16.gmra.mxu0 %vm2237_vm9, %v6240_v23  ;;  %2319 = vmatprep.mubr.bf16.mxu1 %v6928_v45  ;;  %v5089_v23 = vld [vmem:[%s6835_s6 + $0x28] sm:$0xff]  }
 0x38a   : > { %2809 = vmatprep.mubr.bf16.mxu0 %v6928_v45  ;;  %2583 = vmatpush1.bf16.msra.mxu1 %v5062_v30  ;;  %v5092_v30 = vld [vmem:[%s6835_s6 + $0x10] sm:$0xff]  }
 0x38b   : > { %2584 = vmatprep.subr.bf16.mxu1 %v5067_v22  ;;  %v5095_v22 = vld [vmem:[%s6835_s6 + $0x48] sm:$0xff]  }
 0x38e   : > { %2585 = vmatpush1.bf16.msra.mxu1 %v5065_v0 }
 0x38f   : > { %4528 = vmatprep.subr.msk.bf16.mxu1 %vm2250_vm7, %v4527_v59 }
 0x390   : > { %4428 = vmatmul.mubr.msk.bf16.gmra.mxu1 %vm2237_vm9, %v2181_v55 }
 0x391   : > { %4500 = vmatmul.mubr.msk.bf16.vlgmr.msra.gmra.mxu0 %vm2237_vm9, %v2686_v12  ;;  %2602 = vmatprep.mubr.bf16.mxu1 %v6928_v45 }
 0x392   : > { %2819 = vmatprep.mubr.bf16.mxu0 %v6928_v45 }
 0x398   : > { %4471 = vmatmul.mubr.msk.bf16.vlgmr.msra.gmra.mxu1 %vm2237_vm9, %v2490_v11 }
 0x399   : > { %4501 = vmatmul.mubr.msk.bf16.gmra.mxu0 %vm2237_vm9, %v2690_v32  ;;  %2612 = vmatprep.mubr.bf16.mxu1 %v6928_v45 }
 0x39a   : > { %2829 = vmatprep.mubr.bf16.mxu0 %v6928_v45  ;;  %2969 = vmatpush1.bf16.msra.mxu1 %v2959_v29 }
 0x39b   : > { %2970 = vmatprep.subr.bf16.mxu1 %v5072_v1 }
 0x39e   : > { %2971 = vmatpush1.bf16.msra.mxu1 %v5070_v39 }
 0x39f   : > { %2972 = vmatprep.subr.bf16.mxu1 %v5075_v52 }
 0x3a0   : > { %4472 = vmatmul.mubr.msk.bf16.gmra.mxu1 %vm2237_vm9, %v2492_v26 }
 0x3a1   : > { %4502 = vmatmul.mubr.msk.bf16.gmra.mxu0 %vm2237_vm9, %v2694_v40  ;;  %2622 = vmatprep.mubr.bf16.mxu1 %v6928_v45 }
 0x3a2   : > { %2839 = vmatprep.mubr.bf16.mxu0 %v6928_v45  ;;  %2973 = vmatpush1.bf16.msra.mxu1 %v5073_v54 }
 0x3a3   : > { %2974 = vmatprep.subr.bf16.mxu1 %v5079_v63 }
 0x3a6   : > { %2975 = vmatpush1.bf16.msra.mxu1 %v5077_v18 }
 0x3a7   : > { %2976 = vmatprep.subr.bf16.mxu1 %v5082_v19 }
 0x3a8   : > { %4473 = vmatmul.mubr.msk.bf16.gmra.mxu1 %vm2237_vm9, %v2494_v48 }
 0x3a9   : > { %4503 = vmatmul.mubr.msk.bf16.gmra.mxu0 %vm2237_vm9, %v2703_v2  ;;  %2632 = vmatprep.mubr.bf16.mxu1 %v6928_v45 }
 0x3aa   : > { %2977 = vmatpush1.bf16.msra.mxu1 %v5080_v14 }
 0x3ab   : > { %2978 = vmatprep.subr.bf16.mxu1 %v5085_v33 }
 0x3ae   : > { %2979 = vmatpush1.bf16.msra.mxu1 %v5083_v21 }
 0x3b0   : > { %4474 = vmatmul.mubr.msk.bf16.gmra.mxu1 %vm2237_vm9, %v2496_v13 }
 0x3b1   : > { %2996 = vmatprep.mubr.bf16.mxu1 %v6928_v45 }
 0x3b8   : > { %4529 = vmatmul.mubr.msk.bf16.vlgmr.msra.gmra.mxu1 %vm2237_vm9, %v6226_v58  ;;  %v5087_v58 = vld [vmem:[%s6835_s6 + $0x38] sm:$0xff]  }
 0x3b9   : > { %3006 = vmatprep.mubr.bf16.mxu1 %v6928_v45  ;;  %3202 = vmatpush1.bf16.msra.mxu0 %v5087_v58 }
 0x3ba   : > { %3203 = vmatprep.subr.bf16.mxu0 %v6928_v45 }
 0x3c0   : > { %4530 = vmatmul.mubr.msk.bf16.gmra.mxu1 %vm2237_vm9, %v6269_v60  ;;  %v5088_v60 = vld [vmem:[%s6835_s6 + $0x30] sm:$0xff]  }
 0x3c1   : > { %3016 = vmatprep.mubr.bf16.mxu1 %v6928_v45  ;;  %3204 = vmatpush1.bf16.msra.mxu0 %v5088_v60 }
 0x3c2   : > { %3205 = vmatprep.subr.bf16.mxu0 %v6928_v45 }
 0x3c5   : > { %3206 = vmatpush1.bf16.msra.mxu0 %v5089_v23 }
 0x3c6   : > { %3207 = vmatprep.subr.bf16.mxu0 %v6928_v45 }
 0x3c8   : > { %4531 = vmatmul.mubr.msk.bf16.gmra.mxu1 %vm2237_vm9, %v6274_v3  ;;  %v5091_v3 = vld [vmem:[%s6835_s6 + $0x18] sm:$0xff]  }
 0x3c9   : > { %3026 = vmatprep.mubr.bf16.mxu1 %v6928_v45  ;;  %3208 = vmatpush1.bf16.msra.mxu0 %v5090_v38 }
 0x3ca   : > { %3209 = vmatprep.subr.bf16.mxu0 %v6928_v45 }
 0x3cd   : > { %3210 = vmatpush1.bf16.msra.mxu0 %v5091_v3 }
 0x3ce   : > { %3211 = vmatprep.subr.bf16.mxu0 %v6928_v45 }
 0x3d0   : > { %4532 = vmatmul.mubr.msk.bf16.gmra.mxu1 %vm2237_vm9, %v2890_v15 }
 0x3d1   : > { %3212 = vmatpush1.bf16.msra.mxu0 %v5092_v30 }
 0x3d2   : > { %3213 = vmatprep.subr.bf16.mxu0 %v6928_v45 }
 0x3d5   : > { %3214 = vmatpush1.bf16.msra.mxu0 %v5093_v36 }
 0x3d6   : > { %3215 = vmatprep.subr.bf16.mxu0 %v6928_v45 }
 0x3d9   : > { %3216 = vmatpush1.bf16.msra.mxu0 %v5094_v31 }
 0x3da   : > { %3229 = vmatprep.subr.bf16.mxu0 %v6928_v45 }
 0x3dd   : > { %3230 = vmatpush2.bf16.msra.mxu0 %v5095_v22 }
 0x3de   : > { %3231 = vmatprep.subr.bf16.mxu0 %v6928_v45 }
 0x3e1   : > { %3232 = vmatpush2.bf16.msra.mxu0 %v5096_v37 }
 0x431   : > { %v2433_v27 = vpop.f32.mrf.mxu0 }
 0x433   : > { %v2435_v5 = vpop.f32.mrf.mxu0 }
 0x435   : > { %v2437_v28 = vpop.f32.mrf.mxu0 }
 0x437   : > { %v2439_v42 = vpop.f32.mrf.mxu0 }
 0x438   : > { %v2291_v53 = vpop.f32.mrf.mxu1 }
 0x439   : > { %v6451_v0 = vpop.f32.mrf.mxu0  ;;  %v2434_v38 = vadd.f32 %v2433_v27, %v2291_v53 }
 0x43a   : > { %v2293_v9 = vpop.f32.mrf.mxu1 }
 0x43b   : > { %v6453_v47 = vpop.f32.mrf.mxu0  ;;  %v2436_v23 = vadd.f32 %v2435_v5, %v2293_v9 }
 0x43c   : > { %v2295_v59 = vpop.f32.mrf.mxu1 }
 0x43d   : > { %v6455_v17 = vpop.f32.mrf.mxu0  ;;  %v2438_v36 = vadd.f32 %v2437_v28, %v2295_v59  ;;  %v6933_v59 = vsub.s32 1, %v5939_v50 }
 0x43e   : > { %v2297_v62 = vpop.f32.mrf.mxu1 }
 0x43f   : > { %v6457_v55 = vpop.f32.mrf.mxu0  ;;  %v2440_v44 = vadd.f32 %v2439_v42, %v2297_v62 }
 0x440   : > { %v2301_v61 = vpop.f32.mrf.mxu1 }
 0x441   : > { %v6459_v25 = vpop.f32.mrf.mxu0  ;;  %v2444_v62 = vadd.f32 %v6451_v0, %v2301_v61 }
 0x442   : > { %v2303_v12 = vpop.f32.mrf.mxu1 }
 0x443   : > { %v6461_v8 = vpop.f32.mrf.mxu0  ;;  %v2446_v9 = vadd.f32 %v6453_v47, %v2303_v12 }
 0x444   : > { %v6463_v16 = vpop.f32.mrf.mxu1 }
 0x445   : > { %v6465_v10 = vpop.f32.mrf.mxu0 }
 0x446   : > { %v6467_v51 = vpop.f32.mrf.mxu1 }
 0x447   : > { %v6469_v11 = vpop.f32.mrf.mxu0 }
 0x448   : > { %v6471_v29 = vpop.f32.mrf.mxu1 }
 0x449   : > { %v6473_v1 = vpop.f32.mrf.mxu0 }
 0x44a   : > { %v6475_v32 = vpop.f32.mrf.mxu1 }
 0x44b   : > { %v6477_v46 = vpop.f32.mrf.mxu0 }
 0x44c   : > { %v6479_v35 = vpop.f32.mrf.mxu1 }
 0x44d   : > { %v6483_v39 = vpop.f32.mrf.mxu0 }
 0x44e   : > { %v6481_v41 = vpop.f32.mrf.mxu1  ;;  %6929 = vst [vmem:[#allocation13_spill] sm:$0xff] %v6483_v39 }
 0x44f   : > { %v6489_v43 = vpop.f32.mrf.mxu0 }
 0x450   : > { %v6485_v34 = vpop.f32.mrf.mxu1  ;;  %6930 = vst [vmem:[#allocation28_spill] sm:$0xff] %v6489_v43 }
 0x451   : > { %v2811_v54 = vpop.f32.mrf.mxu0 }
 0x452   : > { %v6487_v52 = vpop.f32.mrf.mxu1 }
 0x453   : > { %v2813_v40 = vpop.f32.mrf.mxu0 }
 0x454   : > { %v6491_v57 = vpop.f32.mrf.mxu1 }
 0x455   : > { %v2815_v18 = vpop.f32.mrf.mxu0 }
 0x456   : > { %v6493_v6 = vpop.f32.mrf.mxu1 }
 0x457   : > { %6931 = vst [vmem:[#allocation26_spill] sm:$0xff] %v6493_v6  ;;  %v2817_v7 = vpop.f32.mrf.mxu0 }
 0x458   : > { %v2604_v26 = vpop.f32.mrf.mxu1 }
 0x459   : > { %v2821_v33 = vpop.f32.mrf.mxu0  ;;  %v2643_v22 = vadd.f32 %v2604_v26, %v2434_v38  ;;  %v2450_v38 = vadd.f32 %v6457_v55, %v6467_v51 }
 0x45a   : > { %v2606_v63 = vpop.f32.mrf.mxu1 }
 0x45b   : > { %v2823_v24 = vpop.f32.mrf.mxu0  ;;  %v2644_v31 = vadd.f32 %v2606_v63, %v2436_v23  ;;  %v2850_v27 = vadd.f32 %v2811_v54, %v2643_v22  ;;  %v2448_v54 = vadd.f32 %v6455_v17, %v6463_v16 }
 0x45c   : > { %v2608_v49 = vpop.f32.mrf.mxu1 }
 0x45d   : > { %v2825_v15 = vpop.f32.mrf.mxu0  ;;  %v2645_v45 = vadd.f32 %v2608_v49, %v2438_v36  ;;  %v2851_v5 = vadd.f32 %v2813_v40, %v2644_v31 }
 0x45e   : > { %v2610_v4 = vpop.f32.mrf.mxu1 }
 0x45f   : > { %v2827_v3 = vpop.f32.mrf.mxu0  ;;  %v2646_v39 = vadd.f32 %v2610_v4, %v2440_v44  ;;  %v2852_v42 = vadd.f32 %v2815_v18, %v2645_v45  ;;  %v6934_v44 = vsub.s32 0, %v5939_v50 }
 0x460   : > { %v2614_v19 = vpop.f32.mrf.mxu1 }
 0x461   : > { %v6511_v43 = vpop.f32.mrf.mxu0  ;;  %v2853_v12 = vadd.f32 %v2817_v7, %v2646_v39  ;;  %v2647_v36 = vadd.f32 %v2614_v19, %v2444_v62  ;;  %v2456_v39 = vadd.f32 %v6461_v8, %v6475_v32 }
 0x462   : > { %v2616_v56 = vpop.f32.mrf.mxu1 }
 0x463   : > { %v2833_v63 = vpop.f32.mrf.mxu0  ;;  %v2648_v40 = vadd.f32 %v2616_v56, %v2446_v9  ;;  %v2854_v51 = vadd.f32 %v2821_v33, %v2647_v36 }
 0x464   : > { %v2618_v14 = vpop.f32.mrf.mxu1 }
 0x465   : > { %v2649_v18 = vadd.f32 %v2618_v14, %v2448_v54  ;;  %v2855_v16 = vadd.f32 %v2823_v24, %v2648_v40 }
 0x466   : > { %v2620_v48 = vpop.f32.mrf.mxu1 }
 0x467   : > { %v2650_v22 = vadd.f32 %v2620_v48, %v2450_v38 }
 0x468   : > { %v6495_v2 = vpop.f32.mrf.mxu1 }
 0x469   : > { %v2857_v33 = vadd.f32 %v2827_v3, %v2650_v22  ;;  %v6937_v22 = vld [vmem:[#allocation28_spill] sm:$0xff] }
 0x46a   : > { %v6497_v21 = vpop.f32.mrf.mxu1 }
 0x46c   : > { %v6499_v13 = vpop.f32.mrf.mxu1 }
 0x46e   : > { %v6501_v20 = vpop.f32.mrf.mxu1 }
 0x470   : > { %v6503_v58 = vpop.f32.mrf.mxu1 }
 0x471   : > { %6932 = vst [vmem:[#allocation27_spill] sm:$0xff] %v6503_v58  ;;  %v3053_v58 = vld [vmem:[%s6841_s12] sm:$0x3] }
 0x472   : > { %v6505_v60 = vpop.f32.mrf.mxu1  ;;  %v6519_v26 = vrot.slane %v3053_v58, %v6933_v59  ;;  %v6524_v4 = vrot.slane %v3053_v58, %v6934_v44  ;;  %v2652_v59 = vadd.f32 %v6497_v21, %v2456_v39 }
 0x474   : > { %v6507_v30 = vpop.f32.mrf.mxu1 }
 0x476   : > { %v6509_v37 = vpop.f32.mrf.mxu1 }
 0x478   : > { %v2998_v6 = vpop.f32.mrf.mxu1 }
 0x479   : > { %v3037_v49 = vadd.f32 %v2998_v6, %v2850_v27  ;;  %v2835_v6 = vpop.f32.mrf.mxu0  ;;  %v2454_v27 = vadd.f32 %v6459_v25, %v6471_v29 }
 0x47a   : > { %v3000_v53 = vpop.f32.mrf.mxu1 }
 0x47b   : > { %v3038_v28 = vadd.f32 %v3000_v53, %v2851_v5  ;;  %v3065_v58 = vadd.f32 %v6524_v4, %v3037_v49  ;;  %v2856_v5 = vadd.f32 %v2825_v15, %v2649_v18  ;;  %v2458_v53 = vadd.f32 %v6465_v10, %v6479_v35  ;;  %v2837_v48 = vpop.f32.mrf.mxu0  ;;  %v6935_v18 = vld [vmem:[#allocation13_spill] sm:$0xff] }
 0x47c   : > { %v3002_v23 = vpop.f32.mrf.mxu1  ;;  %v2651_v15 = vadd.f32 %v6495_v2, %v2454_v27  ;;  %v2859_v2 = vadd.f32 %v2833_v63, %v2652_v59 }
 0x47d   : > { %v3039_v47 = vadd.f32 %v3002_v23, %v2852_v42  ;;  %v3066_v0 = vadd.f32 %v6519_v26, %v3038_v28  ;;  %v3081_v9 = vmax.f32 %v3065_v58, 0.0  ;;  %v2460_v42 = vadd.f32 %v6469_v11, %v6481_v41  ;;  %v2841_v21 = vpop.f32.mrf.mxu0 }
 0x47e   : > { %v3004_v45 = vpop.f32.mrf.mxu1  ;;  %v2653_v25 = vadd.f32 %v6499_v13, %v2458_v53  ;;  %v2466_v13 = vadd.f32 %v6477_v46, %v6487_v52  ;;  %v2858_v54 = vadd.f32 %v6511_v43, %v2651_v15 }
 0x47f   : > { %v3067_v61 = vadd.f32 %v6524_v4, %v3039_v47  ;;  %v3040_v50 = vadd.f32 %v3004_v45, %v2853_v12  ;;  %v3082_v56 = vmax.f32 %v3066_v0, 0.0  ;;  %v2654_v11 = vadd.f32 %v6501_v20, %v2460_v42  ;;  %v2843_v0 = vpop.f32.mrf.mxu0 }
 0x480   : > { %v3008_v31 = vpop.f32.mrf.mxu1  ;;  %v2860_v36 = vadd.f32 %v2835_v6, %v2653_v25  ;;  %v2464_v45 = vadd.f32 %v6473_v1, %v6485_v34  ;;  %v2468_v20 = vadd.f32 %v6935_v18, %v6491_v57  ;;  %v2656_v46 = vadd.f32 %v6505_v60, %v2466_v13 }
 0x481   : > { %v3068_v17 = vadd.f32 %v6519_v26, %v3040_v50  ;;  %v3083_v55 = vmax.f32 %v3067_v61, 0.0  ;;  %v3041_v28 = vadd.f32 %v3008_v31, %v2854_v51  ;;  %v2861_v43 = vadd.f32 %v2837_v48, %v2654_v11  ;;  %v6936_v31 = vld [vmem:[#allocation26_spill] sm:$0xff]  ;;  %v2845_v60 = vpop.f32.mrf.mxu0 }
 0x482   : > { %v3010_v19 = vpop.f32.mrf.mxu1  ;;  %v2657_v1 = vadd.f32 %v6507_v30, %v2468_v20 }
 0x483   : > { %v3084_v7 = vmax.f32 %v3068_v17, 0.0  ;;  %v3042_v14 = vadd.f32 %v3010_v19, %v2855_v16  ;;  %v3101_v62 = vpack.c.bf16 %v3083_v55, %v3081_v9  ;;  %v3069_v44 = vadd.f32 %v6524_v4, %v3041_v28  ;;  %v6938_v16 = vld [vmem:[#allocation27_spill] sm:$0xff]  ;;  %v2847_v59 = vpop.f32.mrf.mxu0 }
 0x484   : > { %v3012_v24 = vpop.f32.mrf.mxu1  ;;  %v2470_v17 = vadd.f32 %v6937_v22, %v6936_v31  ;;  %v2655_v6 = vadd.f32 %v6938_v16, %v2464_v45  ;;  %v5098_v22 = vld [vmem:[%s6836_s7 + $0x8] sm:$0xff]   ;;  %v5100_v16 = vld [vmem:[%s6832_s3 + $0x20] sm:$0xff]  }
 0x485   : > { %v3102_v8 = vpack.c.bf16 %v3084_v7, %v3082_v56  ;;  %v3043_v32 = vadd.f32 %v3012_v24, %v2856_v5  ;;  %v3070_v10 = vadd.f32 %v6519_v26, %v3042_v14  ;;  %v3085_v61 = vmax.f32 %v3069_v44, 0.0  ;;  %4794 = vmatprep.subr.bf16.mxu0 %v5100_v16 }
 0x486   : > { %v3014_v49 = vpop.f32.mrf.mxu1  ;;  %v2658_v7 = vadd.f32 %v6509_v37, %v2470_v17  ;;  %v2863_v5 = vadd.f32 %v2843_v0, %v2656_v46  ;;  %v2862_v53 = vadd.f32 %v2841_v21, %v2655_v6  ;;  %v2864_v24 = vadd.f32 %v2845_v60, %v2657_v1  ;;  %v5102_v6 = vld [vmem:[%s6832_s3 + $0x18] sm:$0xff]   ;;  %v5104_v1 = vld [vmem:[%s6832_s3 + $0x10] sm:$0xff]  }
 0x487   : > { %v3071_v29 = vadd.f32 %v6524_v4, %v3043_v32  ;;  %v3044_v35 = vadd.f32 %v3014_v49, %v2857_v33  ;;  %4543 = vmatprep.mubr.msk.bf16.mxu0 %vm679_vm0, %v3102_v8  ;;  %v3086_v47 = vmax.f32 %v3070_v10, 0.0  ;;  %v6939_v17 = vmov 0   ;;  %v5105_v60 = vld [vmem:[%s6832_s3 + $0x30] sm:$0xff]  }
 0x488   : > { %v3018_v3 = vpop.f32.mrf.mxu1  ;;  %3234 = vmatmul.mubr.bf16.vlgmr.msra.gmra.mxu0 %v3101_v62  ;;  %v2865_v62 = vadd.f32 %v2847_v59, %v2658_v7  ;;  %3357 = vst.msk [vmem:[#allocation3 + $0x10] sm:$0xf] %vm3352_vm11, %v6939_v17  ;;  %v5111_v7 = vld [vmem:[%s6832_s3 + $0x70] sm:$0xff]  }
 0x489   : > { %v3072_v41 = vadd.f32 %v6519_v26, %v3044_v35  ;;  %v3087_v23 = vmax.f32 %v3071_v29, 0.0  ;;  %v3045_v63 = vadd.f32 %v3018_v3, %v2858_v54  ;;  %4795 = vmatpush3.bf16.msra.mxu0 %v5100_v16  ;;  %v5120_v16 = vld [vmem:[%s6832_s3 + $0x50] sm:$0xff]  }
 0x48a   : > { %v3020_v40 = vpop.f32.mrf.mxu1  ;;  %4796 = vmatprep.subr.bf16.mxu0 %v5102_v6 }
 0x48b   : > { %v3088_v12 = vmax.f32 %v3072_v41, 0.0  ;;  %v3046_v38 = vadd.f32 %v3020_v40, %v2859_v2  ;;  %v3103_v39 = vpack.c.bf16 %v3087_v23, %v3085_v61  ;;  %v3073_v19 = vadd.f32 %v6524_v4, %v3045_v63  ;;  %v5097_v23 = vld [vmem:[%s6836_s7] sm:$0xff]  }
 0x48c   : > { %v3022_v50 = vpop.f32.mrf.mxu1  ;;  %4776 = vmatprep.mubr.msk.bf16.mxu1 %vm3280_vm10, %v5097_v23 }
 0x48d   : > { %v3104_v52 = vpack.c.bf16 %v3088_v12, %v3086_v47  ;;  %v3047_v58 = vadd.f32 %v3022_v50, %v2860_v36  ;;  %v3074_v34 = vadd.f32 %v6519_v26, %v3046_v38  ;;  %v3089_v8 = vmax.f32 %v3073_v19, 0.0  ;;  %4797 = vmatpush3.bf16.msra.mxu0 %v5102_v6  ;;  %v5107_v19 = vld [vmem:[%s6832_s3 + $0x28] sm:$0xff]  }
 0x48e   : > { %v3024_v55 = vpop.f32.mrf.mxu1  ;;  %4798 = vmatprep.subr.bf16.mxu0 %v5104_v1 }
 0x48f   : > { %v3075_v57 = vadd.f32 %v6524_v4, %v3047_v58  ;;  %v3048_v51 = vadd.f32 %v3024_v55, %v2861_v43  ;;  %4544 = vmatprep.mubr.msk.bf16.mxu0 %vm679_vm0, %v3104_v52  ;;  %v3090_v48 = vmax.f32 %v3074_v34, 0.0  ;;  %v5101_v55 = vld [vmem:[%s6832_s3 + $0x40] sm:$0xff]   ;;  %v5106_v34 = vld [vmem:[%s6832_s3 + $0x8] sm:$0xff]  }
 0x490   : > { %v3028_v56 = vpop.f32.mrf.mxu1  ;;  %3242 = vmatmul.mubr.bf16.gmra.mxu0 %v3103_v39  ;;  %v5099_v39 = vld [vmem:[%s6832_s3 + $0x48] sm:$0xff]  }
 0x491   : > { %v3076_v14 = vadd.f32 %v6519_v26, %v3048_v51  ;;  %v3091_v27 = vmax.f32 %v3075_v57, 0.0  ;;  %v3049_v32 = vadd.f32 %v3028_v56, %v2862_v53  ;;  %v5103_v57 = vld [vmem:[%s6832_s3 + $0x38] sm:$0xff]   ;;  %4799 = vmatpush3.bf16.msra.mxu0 %v5104_v1  ;;  %v5108_v51 = vld [vmem:[%s6832_s3] sm:$0xff]  }
 0x492   : > { %v3030_v30 = vpop.f32.mrf.mxu1  ;;  %4800 = vmatprep.subr.bf16.mxu0 %v5106_v34  ;;  %v5112_v56 = vld [vmem:[%s6832_s3 + $0x98] sm:$0xff]   ;;  %v5124_v1 = vld [vmem:[%s6832_s3 + $0xc0] sm:$0xff]  }
 0x493   : > { %v3092_v9 = vmax.f32 %v3076_v14, 0.0  ;;  %v3050_v28 = vadd.f32 %v3030_v30, %v2863_v5  ;;  %v3105_v49 = vpack.c.bf16 %v3091_v27, %v3089_v8  ;;  %v3077_v35 = vadd.f32 %v6524_v4, %v3049_v32  ;;  %v6627_v8 = vld [vmem:[#allocation3 + $0x10] ss:$0 sps:$4 sm:$0x11]  }
 0x494   : > { %v3032_v33 = vpop.f32.mrf.mxu1 }
 0x495   : > { %v3106_v42 = vpack.c.bf16 %v3092_v9, %v3090_v48  ;;  %v3051_v15 = vadd.f32 %v3032_v33, %v2864_v24  ;;  %v3078_v37 = vadd.f32 %v6519_v26, %v3050_v28  ;;  %v3093_v41 = vmax.f32 %v3077_v35, 0.0  ;;  %4801 = vmatpush3.bf16.msra.mxu0 %v5106_v34 }
 0x496   : > { %v3034_v25 = vpop.f32.mrf.mxu1  ;;  %4802 = vmatprep.subr.bf16.mxu0 %v5108_v51  ;;  %v3604_v34 = vrot.slane %v6627_v8, 1 }
 0x497   : > { %v3079_v10 = vadd.f32 %v6524_v4, %v3051_v15  ;;  %v3052_v29 = vadd.f32 %v3034_v25, %v2865_v62  ;;  %4545 = vmatprep.mubr.msk.bf16.mxu0 %vm679_vm0, %v3106_v42  ;;  %v3094_v3 = vmax.f32 %v3078_v37, 0.0  ;;  %v3413_v37 = vshll.u32 %v6627_v8, 16 }
 0x498   : > { %3250 = vmatmul.mubr.bf16.gmra.mxu0 %v3105_v49 }
 0x499   : > { %v3080_v21 = vadd.f32 %v6519_v26, %v3052_v29  ;;  %v3095_v44 = vmax.f32 %v3079_v10, 0.0  ;;  %4803 = vmatpush3.bf16.msra.mxu0 %v5108_v51  ;;  %v5115_v10 = vld [vmem:[%s6832_s3 + $0x90] sm:$0xff]   ;;  %v3415_v23 = vrot.slane %v3413_v37, 1 }
 0x49a   : > { %4822 = vmatprep.subr.bf16.mxu0 %v5112_v56 }
 0x49b   : > { %v3096_v11 = vmax.f32 %v3080_v21, 0.0  ;;  %v3107_v13 = vpack.c.bf16 %v3095_v44, %v3093_v41 }
 0x49d   : > { %v3108_v2 = vpack.c.bf16 %v3096_v11, %v3094_v3 }
 0x49f   : > { %4546 = vmatprep.mubr.msk.bf16.mxu0 %vm679_vm0, %v3108_v2 }
 0x4a0   : > { %3258 = vmatmul.mubr.bf16.gmra.mxu0 %v3107_v13 }
 0x548   : > { %v3235_v4 = vpop.f32.mrf.mxu0 }
 0x54a   : > { %v3237_v54 = vpop.f32.mrf.mxu0 }
 0x54c   : > { %v3238_v40 = vpop.f32.mrf.mxu0 }
 0x54d   : > { %v3266_v31 = vpack.c.bf16 %v3238_v40, %v3235_v4  ;;  %v5117_v4 = vld [vmem:[%s6832_s3 + $0x88] sm:$0xff]  }
 0x54e   : > { %v3240_v26 = vpop.f32.mrf.mxu0 }
 0x550   : > { %v3243_v47 = vpop.f32.mrf.mxu0 }
 0x552   : > { %v3245_v12 = vpop.f32.mrf.mxu0 }
 0x554   : > { %v3246_v38 = vpop.f32.mrf.mxu0 }
 0x555   : > { %v3267_v43 = vpack.c.bf16 %v3246_v38, %v3243_v47  ;;  %v6645_v47 = vld [vmem:[#allocation3 + $0x10] ss:$0 sps:$4 sm:$0x33]  }
 0x556   : > { %v3248_v36 = vpop.f32.mrf.mxu0 }
 0x558   : > { %v3251_v45 = vpop.f32.mrf.mxu0 }
 0x55a   : > { %v3253_v18 = vpop.f32.mrf.mxu0 }
 0x55c   : > { %v3254_v20 = vpop.f32.mrf.mxu0 }
 0x55d   : > { %v3268_v58 = vpack.c.bf16 %v3254_v20, %v3251_v45  ;;  %v5114_v45 = vld [vmem:[%s6832_s3 + $0x68] sm:$0xff]  }
 0x55e   : > { %v3256_v0 = vpop.f32.mrf.mxu0 }
 0x55f   : > { %v5119_v0 = vld [vmem:[%s6832_s3 + $0x80] sm:$0xff]  }
 0x560   : > { %v3259_v61 = vpop.f32.mrf.mxu0 }
 0x562   : > { %v3261_v63 = vpop.f32.mrf.mxu0 }
 0x564   : > { %v3262_v50 = vpop.f32.mrf.mxu0 }
 0x565   : > { %v3269_v46 = vpack.c.bf16 %v3262_v50, %v3259_v61  ;;  %v3723_v50 = vshrl.u32 %v6645_v47, 16 }
 0x566   : > { %v3264_v52 = vpop.f32.mrf.mxu0 }
 0x567   : > { %4768 = vmatprep.subr.bf16.mxu1 %v3269_v46  ;;  %v5116_v52 = vld [vmem:[%s6832_s3 + $0x60] sm:$0xff]  }
 0x568   : > { %4769 = vmatpush3.bf16.msra.mxu1 %v3269_v46  ;;  %v3726_v46 = vshll.u32 %v6645_v47, 16 }
 0x569   : > { %4770 = vmatprep.subr.bf16.mxu1 %v3268_v58 }
 0x56c   : > { %4771 = vmatpush3.bf16.msra.mxu1 %v3268_v58  ;;  %v5121_v58 = vld [vmem:[%s6832_s3 + $0x78] sm:$0xff]  }
 0x56d   : > { %4772 = vmatprep.subr.bf16.mxu1 %v3267_v43 }
 0x570   : > { %4773 = vmatpush3.bf16.msra.mxu1 %v3267_v43  ;;  %v3725_v43 = vrot.slane %v3723_v50, 1  ;;  %v3929_v50 = vld [vmem:[%s6837_s8] sm:$0x3] }
 0x571   : > { %4774 = vmatprep.subr.bf16.mxu1 %v3266_v31 }
 0x574   : > { %4775 = vmatpush3.bf16.msra.mxu1 %v3266_v31  ;;  %v3728_v31 = vrot.slane %v3726_v46, 2 }
 0x575   : > { %4780 = vmatprep.subr.bf16.mxu1 %v5099_v39 }
 0x576   : > { %v3729_v17 = vor.u32 %v3728_v31, %v3725_v43  ;;  %v5133_v43 = vld [vmem:[%s6838_s9 + $0x20] sm:$0xff]   ;;  %v5134_v31 = vld [vmem:[%s6838_s9 + $0x18] sm:$0xff]  }
 0x577   : > { %4777 = vmatmul.mubr.msk.bf16.vlgmr.msra.gmra.mxu1 %vm3280_vm10, %v5098_v22  ;;  %v5118_v22 = vld [vmem:[%s6832_s3 + $0x58] sm:$0xff]  }
 0x578   : > { %4781 = vmatpush3.bf16.msra.mxu1 %v5099_v39 }
 0x579   : > { %4782 = vmatprep.subr.bf16.mxu1 %v5101_v55 }
 0x57c   : > { %4783 = vmatpush3.bf16.msra.mxu1 %v5101_v55 }
 0x57d   : > { %4784 = vmatprep.subr.bf16.mxu1 %v5103_v57 }
 0x580   : > { %4785 = vmatpush3.bf16.msra.mxu1 %v5103_v57 }
 0x581   : > { %4786 = vmatprep.subr.bf16.mxu1 %v5105_v60 }
 0x584   : > { %4787 = vmatpush3.bf16.msra.mxu1 %v5105_v60  ;;  %v5126_v60 = vld [vmem:[%s6832_s3 + $0xb8] sm:$0xff]  }
 0x585   : > { %4788 = vmatprep.subr.bf16.mxu1 %v5107_v19 }
 0x588   : > { %4789 = vmatpush3.bf16.msra.mxu1 %v5107_v19 }
 0x589   : > { %4808 = vmatprep.subr.bf16.mxu1 %v5111_v7 }
 0x637   : > { %v4778_v14 = vpop.f32.mrf.mxu1 }
 0x638   : > { %v4670_v5 = vpack.c.bf16 %v4778_v14, %v4778_v14  ;;  %v5128_v14 = vld [vmem:[%s6832_s3 + $0xa8] sm:$0xff]  }
 0x639   : > { %v3321_v27 = vpop.f32.mrf.mxu1 }
 0x63a   : > { %3355 = vst.msk [vmem:[#allocation3 + $0x8] sm:$0xf] %vm3352_vm11, %v4670_v5  ;;  %v4668_v53 = vpack.c.bf16 %v3321_v27, %v3321_v27  ;;  %v5129_v5 = vld [vmem:[%s6832_s3 + $0xa0] sm:$0xff]   ;;  %v3838_v27 = vrot.slane %v6645_v47, 2 }
 0x63b   : > { %v4779_v30 = vpop.f32.mrf.mxu1 }
 0x63c   : > { %3353 = vst.msk [vmem:[#allocation3] sm:$0xf] %vm3352_vm11, %v4668_v53  ;;  %v4671_v48 = vpack.c.bf16 %v4779_v30, %v4779_v30  ;;  %v5207_v30 = vmov 0.0  }
 0x63d   : > { %v3324_v9 = vpop.f32.mrf.mxu1 }
 0x63e   : > { %3356 = vst.msk [vmem:[#allocation3 + $0xc] sm:$0xf] %vm3352_vm11, %v4671_v48  ;;  %v4669_v28 = vpack.c.bf16 %v3324_v9, %v3324_v9 }
 0x640   : > { %3354 = vst.msk [vmem:[#allocation3 + $0x4] sm:$0xf] %vm3352_vm11, %v4669_v28 }
 0x643   : > { %v3358_v59 = vld [vmem:[#allocation3] sm:$0xf] }
 0x644   : > { %v3586_v15 = vld [vmem:[#allocation3] sm:$0xe] }
 0x645   : > { %v6625_v24 = vld [vmem:[#allocation3 + $0x8] sm:$0xff]   ;;  %v3820_v6 = vld [vmem:[#allocation3] sm:$0xc] }
 0x646   : > { %v3405_v33 = vshll.u32 %v6625_v24, 16  ;;  %v3409_v42 = vshrl.u32 %v6625_v24, 16  ;;  %v3602_v18 = vrot.slane %v6625_v24, 1  ;;  %v3836_v51 = vrot.slane %v6625_v24, 2 }
 0x647   : > { %v6629_v32 = vld [vmem:[#allocation3 + $0x4] sm:$0xf] }
 0x648   : > { %v4565_v62 = vcombine.low %v3358_v59, %v6629_v32  ;;  %v4592_v49 = vcombine.low %v3586_v15, %v6629_v32  ;;  %v3407_v25 = vrot.slane %v3405_v33, 1  ;;  %v3718_v44 = vrot.slane %v3409_v42, 1 }
 0x649   : > { %v3719_v3 = vrot.slane %v3405_v33, 2  ;;  %v4628_v55 = vcombine.low %v3820_v6, %v6629_v32  ;;  %v3605_v19 = vsel %vm975_vm2, %v3602_v18, %v3604_v34  ;;  %v3839_v53 = vsel %vm1435_vm3, %v3836_v51, %v3838_v27  ;;  %v5138_v6 = vld [vmem:[%s6839_s10 + $0x28] ss:$0 sps:$4 sm:$0x33]   ;;  %v5141_v34 = vld [vmem:[%s6839_s10 + $0x10] sm:$0xff]  }
 0x64a   : > { %v3400_v29 = vshll.u32 %v4565_v62, 16  ;;  %4804 = vmatprep.mubr.msk.bf16.mxu0 %vm3447_vm12, %v4565_v62  ;;  %v3711_v35 = vshrl.u32 %v4592_v49, 16  ;;  %v3714_v21 = vshll.u32 %v4592_v49, 16  ;;  %v3398_v11 = vshrl.u32 %v4565_v62, 16  ;;  %v5142_v27 = vld [vmem:[%s6839_s10 + $0x8] sm:$0xff]  }
 0x64b   : > { %4805 = vmatmul.mubr.msk.bf16.vlgmr.msra.gmra.mxu0 %vm3447_vm12, %v6625_v24  ;;  %v3411_v13 = vor.u32 %v3409_v42, %v3407_v25  ;;  %v3601_v26 = vrot.slane %v4592_v49, 1  ;;  %v3720_v38 = vor.u32 %v3719_v3, %v3718_v44  ;;  %v3835_v57 = vrot.slane %v4628_v55, 2  ;;  %v5139_v55 = vld [vmem:[%s6839_s10 + $0x20] sm:$0xff]  }
 0x64c   : > { %v3402_v41 = vrot.slane %v3400_v29, 1  ;;  %4823 = vmatpush3.bf16.msra.mxu0 %v5112_v56  ;;  %v3713_v2 = vrot.slane %v3711_v35, 1  ;;  %v3716_v54 = vrot.slane %v3714_v21, 2 }
 0x64d   : > { %4824 = vmatprep.subr.bf16.mxu0 %v5115_v10  ;;  %v3416_v20 = vsel %vm590_vm1, %v3411_v13, %v3415_v23  ;;  %v3603_v63 = vsel %vm975_vm2, %v3601_v26, %v3602_v18  ;;  %v3730_v39 = vsel %vm1191_vm4, %v3720_v38, %v3729_v17  ;;  %v3837_v56 = vsel %vm1435_vm3, %v3835_v57, %v3836_v51  ;;  %v5136_v17 = vld [vmem:[%s6838_s9 + $0x8] sm:$0xff]   ;;  %v4636_v57 = vld [vmem:[%s6842_s13] ss:$0 sm:$0xff] }
 0x64e   : > { %v3403_v40 = vor.u32 %v3402_v41, %v3398_v11  ;;  %v3717_v12 = vor.u32 %v3716_v54, %v3713_v2 }
 0x650   : > { %v3408_v36 = vsel %vm590_vm1, %v3403_v40, %v3407_v25  ;;  %4825 = vmatpush3.bf16.msra.mxu0 %v5115_v10  ;;  %v3721_v61 = vsel %vm1191_vm4, %v3717_v12, %v3720_v38 }
 0x651   : > { %4790 = vmatprep.mubr.msk.bf16.mxu1 %vm3447_vm12, %v3408_v36  ;;  %4826 = vmatprep.subr.bf16.mxu0 %v5117_v4 }
 0x652   : > { %4791 = vmatmul.mubr.msk.bf16.vlgmr.msra.gmra.mxu1 %vm3447_vm12, %v3416_v20  ;;  %4832 = vmatprep.mubr.msk.bf16.mxu0 %vm3447_vm12, %v3721_v61  ;;  %v5130_v61 = vld [vmem:[%s6838_s9 + $0x38] ss:$0 sps:$4 sm:$0xff]  }
 0x653   : > { %4809 = vmatpush3.bf16.msra.mxu1 %v5111_v7  ;;  %4818 = vmatprep.mubr.msk.bf16.mxu1 %vm3447_vm12, %v3603_v63  ;;  %v5127_v7 = vld [vmem:[%s6832_s3 + $0xb0] sm:$0xff]   ;;  %v4056_v46 = vsel %vm1851_vm5, %v5130_v61, 0 }
 0x654   : > { %4810 = vmatprep.subr.bf16.mxu1 %v5114_v45  ;;  %4827 = vmatpush3.bf16.msra.mxu0 %v5117_v4 }
 0x655   : > { %4828 = vmatprep.subr.bf16.mxu0 %v5119_v0 }
 0x657   : > { %4811 = vmatpush3.bf16.msra.mxu1 %v5114_v45 }
 0x658   : > { %4812 = vmatprep.subr.bf16.mxu1 %v5116_v52  ;;  %4829 = vmatpush3.bf16.msra.mxu0 %v5119_v0 }
 0x659   : > { %4830 = vmatprep.subr.bf16.mxu0 %v5121_v58 }
 0x65b   : > { %4813 = vmatpush3.bf16.msra.mxu1 %v5116_v52  ;;  %v5131_v52 = vld [vmem:[%s6838_s9 + $0x30] sm:$0xff]  }
 0x65c   : > { %4814 = vmatprep.subr.bf16.mxu1 %v5118_v22  ;;  %4831 = vmatpush3.bf16.msra.mxu0 %v5121_v58  ;;  %v5132_v58 = vld [vmem:[%s6838_s9 + $0x28] sm:$0xff]  }
 0x65d   : > { %4850 = vmatprep.subr.bf16.mxu0 %v5207_v30 }
 0x65f   : > { %4815 = vmatpush3.bf16.msra.mxu1 %v5118_v22  ;;  %4833 = vmatmul.mubr.msk.bf16.vlgmr.msra.gmra.mxu0 %vm3447_vm12, %v3730_v39  ;;  %v5135_v22 = vld [vmem:[%s6838_s9 + $0x10] sm:$0xff]   ;;  %v4155_v39 = vsel %vm2250_vm7, %v5138_v6, 0 }
 0x660   : > { %4816 = vmatprep.subr.bf16.mxu1 %v5120_v16  ;;  %4854 = vmatprep.mubr.msk.bf16.mxu0 %vm5208_vm13, %v5207_v30 }
 0x663   : > { %4817 = vmatpush3.bf16.msra.mxu1 %v5120_v16  ;;  %v5137_v16 = vld [vmem:[%s6838_s9] sm:$0xff]  }
 0x664   : > { %4836 = vmatprep.subr.bf16.mxu1 %v5124_v1 }
 0x666   : > { %4819 = vmatmul.mubr.msk.bf16.vlgmr.msra.gmra.mxu1 %vm3447_vm12, %v3605_v19 }
 0x667   : > { %4837 = vmatpush3.bf16.msra.mxu1 %v5124_v1  ;;  %4846 = vmatprep.mubr.msk.bf16.mxu1 %vm3447_vm12, %v3837_v56  ;;  %v5140_v1 = vld [vmem:[%s6839_s10 + $0x18] sm:$0xff]  }
 0x668   : > { %4838 = vmatprep.subr.bf16.mxu1 %v5126_v60 }
 0x66b   : > { %4839 = vmatpush3.bf16.msra.mxu1 %v5126_v60 }
 0x66c   : > { %4840 = vmatprep.subr.bf16.mxu1 %v5127_v7 }
 0x66f   : > { %4841 = vmatpush3.bf16.msra.mxu1 %v5127_v7 }
 0x670   : > { %4842 = vmatprep.subr.bf16.mxu1 %v5128_v14 }
 0x673   : > { %4843 = vmatpush3.bf16.msra.mxu1 %v5128_v14 }
 0x674   : > { %4844 = vmatprep.subr.bf16.mxu1 %v5129_v5 }
 0x677   : > { %4845 = vmatpush3.bf16.msra.mxu1 %v5129_v5 }
 0x678   : > { %4878 = vmatprep.subr.bf16.mxu1 %v5207_v30 }
 0x67a   : > { %4847 = vmatmul.mubr.msk.bf16.vlgmr.msra.gmra.mxu1 %vm3447_vm12, %v3839_v53  ;;  %v5143_v53 = vld [vmem:[%s6839_s10] sm:$0xff]  }
 0x67b   : > { %4890 = vmatprep.mubr.msk.bf16.mxu1 %vm5208_vm13, %v5207_v30  ;;  %4879 = vmatpush3.bf16.msra.mxu1 %v4155_v39 }
 0x67c   : > { %4880 = vmatprep.subr.bf16.mxu1 %v5207_v30 }
 0x67f   : > { %4881 = vmatpush3.bf16.msra.mxu1 %v5139_v55 }
 0x680   : > { %4882 = vmatprep.subr.bf16.mxu1 %v5207_v30 }
 0x683   : > { %4883 = vmatpush3.bf16.msra.mxu1 %v5140_v1 }
 0x684   : > { %4884 = vmatprep.subr.bf16.mxu1 %v5207_v30 }
 0x687   : > { %4885 = vmatpush3.bf16.msra.mxu1 %v5141_v34 }
 0x688   : > { %4886 = vmatprep.subr.bf16.mxu1 %v5207_v30 }
 0x68b   : > { %4887 = vmatpush3.bf16.msra.mxu1 %v5142_v27 }
 0x68c   : > { %4888 = vmatprep.subr.bf16.mxu1 %v5207_v30 }
 0x68f   : > { %4889 = vmatpush3.bf16.msra.mxu1 %v5143_v53 }
 0x70b   : > { %v4806_v28 = vpop.f32.mrf.mxu0 }
 0x70d   : > { %v3571_v59 = vpop.f32.mrf.mxu0 }
 0x70f   : > { %v4807_v32 = vpop.f32.mrf.mxu0 }
 0x711   : > { %v3574_v42 = vpop.f32.mrf.mxu0 }
 0x712   : > { %v4792_v48 = vpop.f32.mrf.mxu1 }
 0x713   : > { %v3580_v37 = vadd.f32 %v4806_v28, %v4792_v48  ;;  %v4638_v48 = vld [vmem:[%s6843_s14] ss:$0 sm:$0xff] }
 0x714   : > { %v3488_v9 = vpop.f32.mrf.mxu1 }
 0x715   : > { %v3572_v41 = vadd.f32 %v3571_v59, %v3488_v9 }
 0x716   : > { %v4793_v24 = vpop.f32.mrf.mxu1 }
 0x717   : > { %v3583_v10 = vadd.f32 %v4807_v32, %v4793_v24 }
 0x718   : > { %v3491_v8 = vpop.f32.mrf.mxu1 }
 0x719   : > { %v3575_v35 = vadd.f32 %v3574_v42, %v3491_v8 }
 0x71f   : > { %v4834_v62 = vpop.f32.mrf.mxu0 }
 0x721   : > { %v3801_v25 = vpop.f32.mrf.mxu0 }
 0x723   : > { %v4835_v3 = vpop.f32.mrf.mxu0 }
 0x725   : > { %v3804_v40 = vpop.f32.mrf.mxu0 }
 0x726   : > { %v4820_v33 = vpop.f32.mrf.mxu1 }
 0x727   : > { %v3693_v21 = vadd.f32 %v4820_v33, %v3580_v37 }
 0x728   : > { %v3676_v15 = vpop.f32.mrf.mxu1 }
 0x729   : > { %v3818_v23 = vadd.f32 %v4834_v62, %v3693_v21  ;;  %v3691_v4 = vadd.f32 %v3676_v15, %v3572_v41 }
 0x72a   : > { %v4821_v49 = vpop.f32.mrf.mxu1 }
 0x72b   : > { %v3694_v44 = vadd.f32 %v4821_v49, %v3583_v10  ;;  %v3816_v45 = vadd.f32 %v3801_v25, %v3691_v4 }
 0x72c   : > { %v3679_v29 = vpop.f32.mrf.mxu1 }
 0x72d   : > { %v3692_v2 = vadd.f32 %v3679_v29, %v3575_v35  ;;  %v3819_v54 = vadd.f32 %v4835_v3, %v3694_v44 }
 0x72f   : > { %v3817_v47 = vadd.f32 %v3804_v40, %v3692_v2 }
 0x73a   : > { %v4848_v11 = vpop.f32.mrf.mxu1 }
 0x73b   : > { %v3927_v12 = vadd.f32 %v4848_v11, %v3818_v23 }
 0x73c   : > { %v3910_v13 = vpop.f32.mrf.mxu1 }
 0x73d   : > { %v3925_v0 = vadd.f32 %v3910_v13, %v3816_v45 }
 0x73e   : > { %v4849_v26 = vpop.f32.mrf.mxu1 }
 0x73f   : > { %v3928_v38 = vadd.f32 %v4849_v26, %v3819_v54 }
 0x740   : > { %v3913_v36 = vpop.f32.mrf.mxu1 }
 0x741   : > { %v3931_v18 = vpack.c.bf16 %v3928_v38, %v3927_v12  ;;  %v3926_v20 = vadd.f32 %v3913_v36, %v3817_v47 }
 0x743   : > { %4851 = vmatpush3.bf16.msra.mxu0 %v3931_v18  ;;  %v3930_v63 = vpack.c.bf16 %v3926_v20, %v3925_v0 }
 0x744   : > { %4852 = vmatprep.subr.bf16.mxu0 %v5207_v30 }
 0x747   : > { %4853 = vmatpush3.bf16.msra.mxu0 %v3930_v63 }
 0x748   : > { %4858 = vmatprep.subr.bf16.mxu0 %v5207_v30 }
 0x74a   : > { %4855 = vmatmul.mubr.msk.bf16.vlgmr.msra.gmra.mxu0 %vm679_vm0, %v3929_v50 }
 0x74b   : > { %4859 = vmatpush3.bf16.msra.mxu0 %v4056_v46  ;;  %4874 = vmatprep.mubr.msk.bf16.mxu0 %vm5208_vm13, %v5207_v30 }
 0x74c   : > { %4860 = vmatprep.subr.bf16.mxu0 %v5207_v30 }
 0x74f   : > { %4861 = vmatpush3.bf16.msra.mxu0 %v5131_v52 }
 0x750   : > { %4862 = vmatprep.subr.bf16.mxu0 %v5207_v30 }
 0x753   : > { %4863 = vmatpush3.bf16.msra.mxu0 %v5132_v58 }
 0x754   : > { %4864 = vmatprep.subr.bf16.mxu0 %v5207_v30 }
 0x757   : > { %4865 = vmatpush3.bf16.msra.mxu0 %v5133_v43 }
 0x758   : > { %4866 = vmatprep.subr.bf16.mxu0 %v5207_v30 }
 0x75b   : > { %4867 = vmatpush3.bf16.msra.mxu0 %v5134_v31 }
 0x75c   : > { %4868 = vmatprep.subr.bf16.mxu0 %v5207_v30 }
 0x75f   : > { %4869 = vmatpush3.bf16.msra.mxu0 %v5135_v22 }
 0x760   : > { %4870 = vmatprep.subr.bf16.mxu0 %v5207_v30 }
 0x763   : > { %4871 = vmatpush3.bf16.msra.mxu0 %v5136_v17 }
 0x764   : > { %4872 = vmatprep.subr.bf16.mxu0 %v5207_v30  ;;  %v4648_v30 = vld [vmem:[%s6940_s27] ss:$0 sm:$0xff] }
 0x767   : > { %4873 = vmatpush3.bf16.msra.mxu0 %v5137_v16 }
 0x80a   : > { %v3976_v51 = vpop.f32.mrf.mxu0 }
 0x80b   : > { %v3977_v60 = vadd.f32 %v4636_v57, %v3976_v51 }
 0x80c   : > { %v4856_v19 = vpop.f32.mrf.mxu0 }
 0x80d   : > { %v3982_v56 = vmax.f32 %v3977_v60, 0.0 }
 0x80e   : > { %v3979_v7 = vpop.f32.mrf.mxu0 }
 0x80f   : > { %v3983_v14 = vpack.c.bf16 %v3982_v56, %v3982_v56 }
 0x810   : > { %v4857_v5 = vpop.f32.mrf.mxu0 }
 0x811   : > { %4875 = vmatmul.mubr.msk.bf16.vlgmr.msra.gmra.mxu0 %vm4051_vm14, %v3983_v14 }
 0x8d1   : > { %v4092_v9 = vpop.f32.mrf.mxu0 }
 0x8d2   : > { %v4093_v28 = vadd.f32 %v4638_v48, %v4092_v9 }
 0x8d3   : > { %v4876_v24 = vpop.f32.mrf.mxu0 }
 0x8d4   : > { %v4098_v59 = vmax.f32 %v4093_v28, 0.0 }
 0x8d5   : > { %v4095_v8 = vpop.f32.mrf.mxu0 }
 0x8d6   : > { %v4099_v32 = vpack.c.bf16 %v4098_v59, %v4098_v59 }
 0x8d7   : > { %v4877_v33 = vpop.f32.mrf.mxu0 }
 0x8d8   : > { %4891 = vmatmul.mubr.msk.bf16.vlgmr.msra.gmra.mxu1 %vm2237_vm9, %v4099_v32 }
 0x998   : > { %v4191_v42 = vpop.f32.mrf.mxu1 }
 0x999   : > { %v4192_v15 = vadd.f32 %v4648_v30, %v4191_v42 }
 0x99a   : > { %v4892_v62 = vpop.f32.mrf.mxu1 }
 0x99b   : > { %4197 = vst [vmem:[%s514_s16] sm:$0xf] %v4192_v15 }
 0x99c   : > { %v4194_v49 = vpop.f32.mrf.mxu1 }
 0x99d   : > { %5157 = shalt.err (!%p5154_p3)
}
 0x99e   : > { %s5158_s23 = scalar_lea.hbm %s6788_s20, 64  ;;  %s5162_s15 = scalar_lea.hbm %s6941_s19, 128 }
 0x99f   : > { %p5159_p4 = scmp.ne.s32.totalorder %s6788_s20, %s5158_s23  ;;  %p5163_p9 = scmp.lt.s32.totalorder %s6788_s20, %s6941_s19 }
 0x9a0   : > { %p5164_p10 = scmp.lt.s32.totalorder %s5162_s15, %s5158_s23 }
 0x9a1   : > { %p5160_p7 = pnand %p5159_p4, %p5333_p5 }
 0x9a2   : > { %p5165_p11 = por %p5164_p10, %p5163_p9 }
 0x9a3   : > { %p5161_p8 = pneg %p5160_p7 }
 0x9a5   : > { %p5166_p12 = pnand %p5165_p11, %p5161_p8 }
 0x9a7   : > { %5169 = shalt.err (!%p5166_p12)
}
 0x9a8   : > { %4895 = dma.vmem_to_hbm [thread:$0]  (%p5333_p5), %s6790_s21, 64, %s6788_s20, %s4199_s26   ;;  %v4893_v25 = vpop.f32.mrf.mxu1 }
 0x9a9 PF: > { %s6942_s17 = sld [smem:[#allocation9_spill]] }
 0x9aa   : > { %s6943_s28 = sld [smem:[#allocation7_spill]] }
 0x9af   : > { %p4901_p13 = scmp.ge.s32.totalorder %s6942_s17, 2 }
 0x9b0   : > { %s4224_s29 = sand.u32 1, %s6943_s28  }
 0x9b1   : > { %p4898_p0 = pnand %p4901_p13, %p5337_p6  ;;  %s4225_s18 = scalar_lea.sflag [#allocation5], %s4224_s29 }
 0x9b3   : > { %p4899_p1 = pneg %p4898_p0 }
 0x9b5   : > { %5187 = dma.done.wait (%p4899_p1), %s4225_s18, 64  }
 0x9b6   : > { %5189 = vsyncadd (%p4899_p1), %s4225_s18, 4294967232  ;;  %s6945_s24 = sld [smem:[#allocation10_spill]]  ;;  %s6948_s21 = smov %s5196_s22 }
 0x9b7   : > { %s6946_s23 = sld [smem:[#allocation8_spill]] }
 0x9b8   : > { %s6947_s0 = sld [smem:[#allocation11_spill]] }
 0x9bc   : > { %p26_p2 = scmp.ge.s32.totalorder %s6945_s24, 4  }
 0x9bd   : > { %s6949_s22 = smov %s6946_s23 }
 0x9be   : > { %s6950_s23 = smov %s6947_s0  ;;  %28 = sbr.rel (!%p26_p2) target bundleno = 7 (0x7), region = 131 }
 0x9c3   :  { %4230 = vsyncpa [#allocation5], 1 }
 0x9c4   :  { %4232 = vsyncpa [#allocation5 + $0x1], 1 }

</bundles_post_ra>
